<compile_context>
chip_gen: v6e
topology: v6e:2x2x1
jax: 0.10.0
libtpu: 0.0.40
codegen_flags: <defaults>
</compile_context>

<pallas_src>
import jax
import jax.numpy as jnp
from jax.experimental import pallas as pl
from jax.experimental.pallas import tpu as pltpu


def latent_ode_kernel(
    data_ref, dts_ref, eps_ref,
    # GRU: fused input->hidden (D_in, 3L) with b_hr/b_hz folded into its bias,
    #      fused hidden->hidden (L, 3L), b_hn passed separately (stays inside r*(...)).
    wih_ref, bih_ref, whh_ref, bhn_ref,
    # hiddens_to_z0 (second layer split into mean / std halves in the wrapper)
    w1_ref, b1_ref, w2m_ref, b2m_ref, w2s_ref, b2s_ref,
    # ODE gradient net
    wo1_ref, bo1_ref, wo2_ref, bo2_ref,
    # decoder
    wd_ref, bd_ref,
    out_ref,
):
    S, B, D_in = data_ref.shape
    TB = out_ref.shape[0]
    L = eps_ref.shape[1]
    T = TB // B
    H1 = wo1_ref.shape[1]          # ODE-func hidden width (50)
    f32 = jnp.float32

    # ---------------- GRU encoder ----------------------------------------------
    # Hoisted input->hidden projection: ONE matmul over all S*B rows and all 3 gates.
    # b_hr / b_hz are already folded into bih (wrapper), so the loop body has no gate-bias adds
    # except the mandatory b_hn inside the r*(...) term.
    x_all = data_ref[...].reshape(S * B, D_in)
    gi = jnp.dot(x_all, wih_ref[...], preferred_element_type=f32) + bih_ref[...]
    gi_r = gi[:, 0 * L:1 * L]
    gi_z = gi[:, 1 * L:2 * L]
    gi_n = gi[:, 2 * L:3 * L]

    # Hoist loop-invariant loads / broadcasts (JAX does not CSE broadcast_in_dim).
    whh = whh_ref[...]
    bhn = jnp.broadcast_to(bhn_ref[...], (B, L))

    h = jnp.zeros((B, L), f32)
    for t in range(S):                      # static trip count -> fully unrolled
        lo = t * B
        gh = jnp.dot(h, whh, preferred_element_type=f32)       # single (B, 3L) matmul/step
        r = jax.nn.sigmoid(gi_r[lo:lo + B] + gh[:, 0 * L:1 * L])
        z = jax.nn.sigmoid(gi_z[lo:lo + B] + gh[:, 1 * L:2 * L])
        n = jnp.tanh(gi_n[lo:lo + B] + r * (gh[:, 2 * L:3 * L] + bhn))  # PyTorch GRU semantics
        h = (1.0 - z) * n + z * h

    # -------------- hiddens_to_z0 -> (mean, |std|) -> reparameterized z0 --------
    hid = jnp.tanh(jnp.dot(h, w1_ref[...], preferred_element_type=f32) + b1_ref[...])
    mean = jnp.dot(hid, w2m_ref[...], preferred_element_type=f32) + b2m_ref[...]
    std = jnp.abs(jnp.dot(hid, w2s_ref[...], preferred_element_type=f32) + b2s_ref[...])
    z0 = eps_ref[...] * std + mean

    # ---------------- fixed-grid RK4 (torchdiffeq method='rk4', 3/8 rule) -------
    # TODO(synk): only fixed-grid RK4 is implemented (matches this module's method='rk4'
    # default); adaptive solvers (dopri5) have no clean Pallas equivalent.
    wo1 = wo1_ref[...]
    wo2 = wo2_ref[...]
    bo1 = jnp.broadcast_to(bo1_ref[...], (B, H1))   # hoisted once, reused by all 28 evals
    bo2 = jnp.broadcast_to(bo2_ref[...], (B, L))

    def ode_f(y):  # ODEFunc ignores t, as in the reference
        a = jnp.tanh(jnp.dot(y, wo1, preferred_element_type=f32) + bo1)
        return jnp.dot(a, wo2, preferred_element_type=f32) + bo2

    ys = [z0]
    y = z0
    for i in range(T - 1):                  # static trip count -> fully unrolled
        dt = dts_ref[i]                     # precomputed scalar dt from SMEM
        k1 = ode_f(y)
        k2 = ode_f(y + dt * k1 * (1.0 / 3.0))
        k3 = ode_f(y + dt * (k2 - k1 * (1.0 / 3.0)))
        k4 = ode_f(y + dt * (k1 - k2 + k3))
        y = y + (k1 + 3.0 * (k2 + k3) + k4) * (dt * 0.125)
        ys.append(y)

    # --------- single batched decode + ONE flat dense store ---------------------
    traj = jnp.concatenate(ys, axis=0)      # (T*B, L)
    dec = jnp.dot(traj, wd_ref[...], preferred_element_type=f32) + bd_ref[...]
    out_ref[...] = dec.astype(out_ref.dtype)   # flat (T*B, D_in): no in-kernel relayout


def split_params_for_kernel(params, L):
    """Prepare packed (PyTorch-layout) parameters for the kernel:
    - fold b_hr / b_hz into the input-projection bias (safe; b_hn must stay separate),
    - split hiddens_to_z0 layer-2 into mean / std halves."""
    (w_ih, w_hh, b_ih, b_hh, w1, b1, w2, b2, wo1, bo1, wo2, bo2, wd, bd) = params
    b_i_fused = b_ih + jnp.concatenate(
        [b_hh[:, :2 * L], jnp.zeros((1, L), b_hh.dtype)], axis=1)
    bhn = b_hh[:, 2 * L:3 * L]
    w2m, w2s = w2[:, :L], w2[:, L:]
    b2m, b2s = b2[:, :L], b2[:, L:]
    return (w_ih, b_i_fused, w_hh, bhn,
            w1, b1, w2m, b2m, w2s, b2s,
            wo1, bo1, wo2, bo2, wd, bd)


def latent_ode_forward(data, time_points, eps, params):
    """data: (B, S, D_in) float32 (batch_first like nn.GRU), time_points: (T,), eps: (B, L).
    Returns the decoded trajectory (T, B, D_in), matching decoder(odeint(...)) in the reference."""
    B, S, D_in = data.shape
    T = time_points.shape[0]
    L = eps.shape[1]

    data_tm = jnp.transpose(data, (1, 0, 2))                          # (S, B, D_in) time-major
    dts = (time_points[1:] - time_points[:-1]).astype(jnp.float32)    # (T-1,) precomputed dt's

    kernel_params = split_params_for_kernel(params, L)

    vmem = pl.BlockSpec(memory_space=pltpu.MemorySpace.VMEM)
    smem = pl.BlockSpec(memory_space=pltpu.MemorySpace.SMEM)
    in_specs = [vmem, smem, vmem] + [vmem] * len(kernel_params)

    out_flat = pl.pallas_call(
        latent_ode_kernel,
        out_shape=jax.ShapeDtypeStruct((T * B, D_in), jnp.float32),   # flat: one dense store
        in_specs=in_specs,
        out_specs=vmem,
    )(data_tm, dts, eps, *kernel_params)
    return out_flat.reshape(T, B, D_in)                               # metadata-only reshape


def init_params(key, input_dim, latent_dim):
    """Deterministic synthetic init.  nn.Linear: N(0, 0.1), zero bias (init_network_weights).
    GRU weights/biases use the same deterministic normal (shapes match nn.GRU)."""
    L = latent_dim
    std = 0.1
    ks = jax.random.split(key, 9)

    def lin(k, din, dout):
        w = (jax.random.normal(k, (din, dout)) * std).astype(jnp.float32)
        b = jnp.zeros((1, dout), jnp.float32)
        return w, b

    w_ih = (jax.random.normal(ks[0], (input_dim, 3 * L)) * std).astype(jnp.float32)
    w_hh = (jax.random.normal(ks[1], (L, 3 * L)) * std).astype(jnp.float32)
    b_ih = (jax.random.normal(ks[2], (1, 3 * L)) * std).astype(jnp.float32)
    b_hh = (jax.random.normal(ks[3], (1, 3 * L)) * std).astype(jnp.float32)

    w1, b1 = lin(ks[4], L, 50)          # hiddens_to_z0 layer 1
    w2, b2 = lin(ks[5], 50, 2 * L)      # hiddens_to_z0 layer 2
    wo1, bo1 = lin(ks[6], L, 50)        # ODE func layer 1
    wo2, bo2 = lin(ks[7], 50, L)        # ODE func layer 2
    wd, bd = lin(ks[8], L, input_dim)   # decoder

    return (w_ih, w_hh, b_ih, b_hh, w1, b1, w2, b2, wo1, bo1, wo2, bo2, wd, bd)


if __name__ == "__main__":
    B, S, D_in, L, T = 2, 8, 4, 32, 8

    key = jax.random.PRNGKey(0)
    k_data, k_eps, k_par = jax.random.split(key, 3)

    data = jax.random.normal(k_data, (B, S, D_in), dtype=jnp.float32)
    time_points = jnp.linspace(0.0, 1.0, T, dtype=jnp.float32)
    eps = jax.random.normal(k_eps, (B, L), dtype=jnp.float32)  # standard-gaussian sample for z0
    params = init_params(k_par, D_in, L)

    out = latent_ode_forward(data, time_points, eps, params)
    out = jax.block_until_ready(out)

    assert out.shape == (T, B, D_in), out.shape
    assert bool(jnp.all(jnp.isfinite(out)))
    print("KERNEL_OK")
</pallas_src>

<mosaic_0001>
module attributes {stable_mosaic.version = 11 : i64} {
  func.func @latent_ode_kernel(%arg0: memref<8x2x4xf32, #tpu.memory_space<vmem>>, %arg1: memref<7xf32, #tpu.memory_space<smem>>, %arg2: memref<2x32xf32, #tpu.memory_space<vmem>>, %arg3: memref<4x96xf32, #tpu.memory_space<vmem>>, %arg4: memref<1x96xf32, #tpu.memory_space<vmem>>, %arg5: memref<32x96xf32, #tpu.memory_space<vmem>>, %arg6: memref<1x32xf32, #tpu.memory_space<vmem>>, %arg7: memref<32x50xf32, #tpu.memory_space<vmem>>, %arg8: memref<1x50xf32, #tpu.memory_space<vmem>>, %arg9: memref<50x32xf32, #tpu.memory_space<vmem>>, %arg10: memref<1x32xf32, #tpu.memory_space<vmem>>, %arg11: memref<50x32xf32, #tpu.memory_space<vmem>>, %arg12: memref<1x32xf32, #tpu.memory_space<vmem>>, %arg13: memref<32x50xf32, #tpu.memory_space<vmem>>, %arg14: memref<1x50xf32, #tpu.memory_space<vmem>>, %arg15: memref<50x32xf32, #tpu.memory_space<vmem>>, %arg16: memref<1x32xf32, #tpu.memory_space<vmem>>, %arg17: memref<32x4xf32, #tpu.memory_space<vmem>>, %arg18: memref<1x4xf32, #tpu.memory_space<vmem>>, %arg19: memref<16x4xf32, #tpu.memory_space<vmem>>) attributes {dimension_semantics = [], scalar_prefetch = 0 : i64, scratch_operands = 0 : i64, tpu.core_type = #tpu.core_type<tc>} {
    %c0 = arith.constant 0 : index
    %c0_0 = arith.constant 0 : index
    %c0_1 = arith.constant 0 : index
    %0 = vector.load %arg0[%c0, %c0_0, %c0_1] : memref<8x2x4xf32, #tpu.memory_space<vmem>>, vector<8x2x4xf32>
    %1 = vector.shape_cast %0 : vector<8x2x4xf32> to vector<16x4xf32>
    %c0_2 = arith.constant 0 : index
    %c0_3 = arith.constant 0 : index
    %2 = vector.load %arg3[%c0_2, %c0_3] : memref<4x96xf32, #tpu.memory_space<vmem>>, vector<4x96xf32>
    %cst = arith.constant dense<0.000000e+00> : vector<16x96xf32>
    %3 = tpu.matmul %1, %2, %cst {dimension_numbers = #tpu.dot_dimension_numbers<[1], [0], [0], [1], [0, 0, 1, 1], [], []>} : vector<16x4xf32>, vector<4x96xf32>, vector<16x96xf32> -> vector<16x96xf32>
    %c0_4 = arith.constant 0 : index
    %c0_5 = arith.constant 0 : index
    %4 = vector.load %arg4[%c0_4, %c0_5] : memref<1x96xf32, #tpu.memory_space<vmem>>, vector<1x96xf32>
    %5 = vector.broadcast %4 : vector<1x96xf32> to vector<16x96xf32>
    %6 = arith.addf %3, %5 : vector<16x96xf32>
    %7 = vector.extract_strided_slice %6 {offsets = [0, 0], sizes = [16, 32], strides = [1, 1]} : vector<16x96xf32> to vector<16x32xf32>
    %8 = vector.extract_strided_slice %6 {offsets = [0, 32], sizes = [16, 32], strides = [1, 1]} : vector<16x96xf32> to vector<16x32xf32>
    %9 = vector.extract_strided_slice %6 {offsets = [0, 64], sizes = [16, 32], strides = [1, 1]} : vector<16x96xf32> to vector<16x32xf32>
    %c0_6 = arith.constant 0 : index
    %c0_7 = arith.constant 0 : index
    %10 = vector.load %arg5[%c0_6, %c0_7] : memref<32x96xf32, #tpu.memory_space<vmem>>, vector<32x96xf32>
    %c0_8 = arith.constant 0 : index
    %c0_9 = arith.constant 0 : index
    %11 = vector.load %arg6[%c0_8, %c0_9] : memref<1x32xf32, #tpu.memory_space<vmem>>, vector<1x32xf32>
    %12 = vector.shape_cast %11 : vector<1x32xf32> to vector<1x32xf32>
    %13 = vector.broadcast %12 : vector<1x32xf32> to vector<2x32xf32>
    %cst_10 = arith.constant 0.000000e+00 : f32
    %14 = vector.broadcast %cst_10 : f32 to vector<2x32xf32>
    %cst_11 = arith.constant dense<0.000000e+00> : vector<2x96xf32>
    %15 = tpu.matmul %14, %10, %cst_11 {dimension_numbers = #tpu.dot_dimension_numbers<[1], [0], [0], [1], [0, 0, 1, 1], [], []>} : vector<2x32xf32>, vector<32x96xf32>, vector<2x96xf32> -> vector<2x96xf32>
    %16 = vector.extract_strided_slice %7 {offsets = [0, 0], sizes = [2, 32], strides = [1, 1]} : vector<16x32xf32> to vector<2x32xf32>
    %17 = vector.extract_strided_slice %15 {offsets = [0, 0], sizes = [2, 32], strides = [1, 1]} : vector<2x96xf32> to vector<2x32xf32>
    %18 = arith.addf %16, %17 : vector<2x32xf32>
    %19 = arith.negf %18 : vector<2x32xf32>
    %20 = math.exp %19 : vector<2x32xf32>
    %cst_12 = arith.constant 1.000000e+00 : f32
    %21 = vector.broadcast %cst_12 : f32 to vector<2x32xf32>
    %22 = arith.addf %21, %20 : vector<2x32xf32>
    %23 = arith.divf %21, %22 : vector<2x32xf32>
    %24 = vector.extract_strided_slice %8 {offsets = [0, 0], sizes = [2, 32], strides = [1, 1]} : vector<16x32xf32> to vector<2x32xf32>
    %25 = vector.extract_strided_slice %15 {offsets = [0, 32], sizes = [2, 32], strides = [1, 1]} : vector<2x96xf32> to vector<2x32xf32>
    %26 = arith.addf %24, %25 : vector<2x32xf32>
    %27 = arith.negf %26 : vector<2x32xf32>
    %28 = math.exp %27 : vector<2x32xf32>
    %cst_13 = arith.constant 1.000000e+00 : f32
    %29 = vector.broadcast %cst_13 : f32 to vector<2x32xf32>
    %30 = arith.addf %29, %28 : vector<2x32xf32>
    %31 = arith.divf %29, %30 : vector<2x32xf32>
    %32 = vector.extract_strided_slice %9 {offsets = [0, 0], sizes = [2, 32], strides = [1, 1]} : vector<16x32xf32> to vector<2x32xf32>
    %33 = vector.extract_strided_slice %15 {offsets = [0, 64], sizes = [2, 32], strides = [1, 1]} : vector<2x96xf32> to vector<2x32xf32>
    %34 = arith.addf %33, %13 : vector<2x32xf32>
    %35 = arith.mulf %23, %34 : vector<2x32xf32>
    %36 = arith.addf %32, %35 : vector<2x32xf32>
    %37 = math.tanh %36 : vector<2x32xf32>
    %cst_14 = arith.constant 1.000000e+00 : f32
    %38 = vector.broadcast %cst_14 : f32 to vector<2x32xf32>
    %39 = arith.subf %38, %31 : vector<2x32xf32>
    %40 = arith.mulf %39, %37 : vector<2x32xf32>
    %41 = arith.mulf %31, %14 : vector<2x32xf32>
    %42 = arith.addf %40, %41 : vector<2x32xf32>
    %cst_15 = arith.constant dense<0.000000e+00> : vector<2x96xf32>
    %43 = tpu.matmul %42, %10, %cst_15 {dimension_numbers = #tpu.dot_dimension_numbers<[1], [0], [0], [1], [0, 0, 1, 1], [], []>} : vector<2x32xf32>, vector<32x96xf32>, vector<2x96xf32> -> vector<2x96xf32>
    %44 = vector.extract_strided_slice %7 {offsets = [2, 0], sizes = [2, 32], strides = [1, 1]} : vector<16x32xf32> to vector<2x32xf32>
    %45 = vector.extract_strided_slice %43 {offsets = [0, 0], sizes = [2, 32], strides = [1, 1]} : vector<2x96xf32> to vector<2x32xf32>
    %46 = arith.addf %44, %45 : vector<2x32xf32>
    %47 = arith.negf %46 : vector<2x32xf32>
    %48 = math.exp %47 : vector<2x32xf32>
    %cst_16 = arith.constant 1.000000e+00 : f32
    %49 = vector.broadcast %cst_16 : f32 to vector<2x32xf32>
    %50 = arith.addf %49, %48 : vector<2x32xf32>
    %51 = arith.divf %49, %50 : vector<2x32xf32>
    %52 = vector.extract_strided_slice %8 {offsets = [2, 0], sizes = [2, 32], strides = [1, 1]} : vector<16x32xf32> to vector<2x32xf32>
    %53 = vector.extract_strided_slice %43 {offsets = [0, 32], sizes = [2, 32], strides = [1, 1]} : vector<2x96xf32> to vector<2x32xf32>
    %54 = arith.addf %52, %53 : vector<2x32xf32>
    %55 = arith.negf %54 : vector<2x32xf32>
    %56 = math.exp %55 : vector<2x32xf32>
    %cst_17 = arith.constant 1.000000e+00 : f32
    %57 = vector.broadcast %cst_17 : f32 to vector<2x32xf32>
    %58 = arith.addf %57, %56 : vector<2x32xf32>
    %59 = arith.divf %57, %58 : vector<2x32xf32>
    %60 = vector.extract_strided_slice %9 {offsets = [2, 0], sizes = [2, 32], strides = [1, 1]} : vector<16x32xf32> to vector<2x32xf32>
    %61 = vector.extract_strided_slice %43 {offsets = [0, 64], sizes = [2, 32], strides = [1, 1]} : vector<2x96xf32> to vector<2x32xf32>
    %62 = arith.addf %61, %13 : vector<2x32xf32>
    %63 = arith.mulf %51, %62 : vector<2x32xf32>
    %64 = arith.addf %60, %63 : vector<2x32xf32>
    %65 = math.tanh %64 : vector<2x32xf32>
    %cst_18 = arith.constant 1.000000e+00 : f32
    %66 = vector.broadcast %cst_18 : f32 to vector<2x32xf32>
    %67 = arith.subf %66, %59 : vector<2x32xf32>
    %68 = arith.mulf %67, %65 : vector<2x32xf32>
    %69 = arith.mulf %59, %42 : vector<2x32xf32>
    %70 = arith.addf %68, %69 : vector<2x32xf32>
    %cst_19 = arith.constant dense<0.000000e+00> : vector<2x96xf32>
    %71 = tpu.matmul %70, %10, %cst_19 {dimension_numbers = #tpu.dot_dimension_numbers<[1], [0], [0], [1], [0, 0, 1, 1], [], []>} : vector<2x32xf32>, vector<32x96xf32>, vector<2x96xf32> -> vector<2x96xf32>
    %72 = vector.extract_strided_slice %7 {offsets = [4, 0], sizes = [2, 32], strides = [1, 1]} : vector<16x32xf32> to vector<2x32xf32>
    %73 = vector.extract_strided_slice %71 {offsets = [0, 0], sizes = [2, 32], strides = [1, 1]} : vector<2x96xf32> to vector<2x32xf32>
    %74 = arith.addf %72, %73 : vector<2x32xf32>
    %75 = arith.negf %74 : vector<2x32xf32>
    %76 = math.exp %75 : vector<2x32xf32>
    %cst_20 = arith.constant 1.000000e+00 : f32
    %77 = vector.broadcast %cst_20 : f32 to vector<2x32xf32>
    %78 = arith.addf %77, %76 : vector<2x32xf32>
    %79 = arith.divf %77, %78 : vector<2x32xf32>
    %80 = vector.extract_strided_slice %8 {offsets = [4, 0], sizes = [2, 32], strides = [1, 1]} : vector<16x32xf32> to vector<2x32xf32>
    %81 = vector.extract_strided_slice %71 {offsets = [0, 32], sizes = [2, 32], strides = [1, 1]} : vector<2x96xf32> to vector<2x32xf32>
    %82 = arith.addf %80, %81 : vector<2x32xf32>
    %83 = arith.negf %82 : vector<2x32xf32>
    %84 = math.exp %83 : vector<2x32xf32>
    %cst_21 = arith.constant 1.000000e+00 : f32
    %85 = vector.broadcast %cst_21 : f32 to vector<2x32xf32>
    %86 = arith.addf %85, %84 : vector<2x32xf32>
    %87 = arith.divf %85, %86 : vector<2x32xf32>
    %88 = vector.extract_strided_slice %9 {offsets = [4, 0], sizes = [2, 32], strides = [1, 1]} : vector<16x32xf32> to vector<2x32xf32>
    %89 = vector.extract_strided_slice %71 {offsets = [0, 64], sizes = [2, 32], strides = [1, 1]} : vector<2x96xf32> to vector<2x32xf32>
    %90 = arith.addf %89, %13 : vector<2x32xf32>
    %91 = arith.mulf %79, %90 : vector<2x32xf32>
    %92 = arith.addf %88, %91 : vector<2x32xf32>
    %93 = math.tanh %92 : vector<2x32xf32>
    %cst_22 = arith.constant 1.000000e+00 : f32
    %94 = vector.broadcast %cst_22 : f32 to vector<2x32xf32>
    %95 = arith.subf %94, %87 : vector<2x32xf32>
    %96 = arith.mulf %95, %93 : vector<2x32xf32>
    %97 = arith.mulf %87, %70 : vector<2x32xf32>
    %98 = arith.addf %96, %97 : vector<2x32xf32>
    %cst_23 = arith.constant dense<0.000000e+00> : vector<2x96xf32>
    %99 = tpu.matmul %98, %10, %cst_23 {dimension_numbers = #tpu.dot_dimension_numbers<[1], [0], [0], [1], [0, 0, 1, 1], [], []>} : vector<2x32xf32>, vector<32x96xf32>, vector<2x96xf32> -> vector<2x96xf32>
    %100 = vector.extract_strided_slice %7 {offsets = [6, 0], sizes = [2, 32], strides = [1, 1]} : vector<16x32xf32> to vector<2x32xf32>
    %101 = vector.extract_strided_slice %99 {offsets = [0, 0], sizes = [2, 32], strides = [1, 1]} : vector<2x96xf32> to vector<2x32xf32>
    %102 = arith.addf %100, %101 : vector<2x32xf32>
    %103 = arith.negf %102 : vector<2x32xf32>
    %104 = math.exp %103 : vector<2x32xf32>
    %cst_24 = arith.constant 1.000000e+00 : f32
    %105 = vector.broadcast %cst_24 : f32 to vector<2x32xf32>
    %106 = arith.addf %105, %104 : vector<2x32xf32>
    %107 = arith.divf %105, %106 : vector<2x32xf32>
    %108 = vector.extract_strided_slice %8 {offsets = [6, 0], sizes = [2, 32], strides = [1, 1]} : vector<16x32xf32> to vector<2x32xf32>
    %109 = vector.extract_strided_slice %99 {offsets = [0, 32], sizes = [2, 32], strides = [1, 1]} : vector<2x96xf32> to vector<2x32xf32>
    %110 = arith.addf %108, %109 : vector<2x32xf32>
    %111 = arith.negf %110 : vector<2x32xf32>
    %112 = math.exp %111 : vector<2x32xf32>
    %cst_25 = arith.constant 1.000000e+00 : f32
    %113 = vector.broadcast %cst_25 : f32 to vector<2x32xf32>
    %114 = arith.addf %113, %112 : vector<2x32xf32>
    %115 = arith.divf %113, %114 : vector<2x32xf32>
    %116 = vector.extract_strided_slice %9 {offsets = [6, 0], sizes = [2, 32], strides = [1, 1]} : vector<16x32xf32> to vector<2x32xf32>
    %117 = vector.extract_strided_slice %99 {offsets = [0, 64], sizes = [2, 32], strides = [1, 1]} : vector<2x96xf32> to vector<2x32xf32>
    %118 = arith.addf %117, %13 : vector<2x32xf32>
    %119 = arith.mulf %107, %118 : vector<2x32xf32>
    %120 = arith.addf %116, %119 : vector<2x32xf32>
    %121 = math.tanh %120 : vector<2x32xf32>
    %cst_26 = arith.constant 1.000000e+00 : f32
    %122 = vector.broadcast %cst_26 : f32 to vector<2x32xf32>
    %123 = arith.subf %122, %115 : vector<2x32xf32>
    %124 = arith.mulf %123, %121 : vector<2x32xf32>
    %125 = arith.mulf %115, %98 : vector<2x32xf32>
    %126 = arith.addf %124, %125 : vector<2x32xf32>
    %cst_27 = arith.constant dense<0.000000e+00> : vector<2x96xf32>
    %127 = tpu.matmul %126, %10, %cst_27 {dimension_numbers = #tpu.dot_dimension_numbers<[1], [0], [0], [1], [0, 0, 1, 1], [], []>} : vector<2x32xf32>, vector<32x96xf32>, vector<2x96xf32> -> vector<2x96xf32>
    %128 = vector.extract_strided_slice %7 {offsets = [8, 0], sizes = [2, 32], strides = [1, 1]} : vector<16x32xf32> to vector<2x32xf32>
    %129 = vector.extract_strided_slice %127 {offsets = [0, 0], sizes = [2, 32], strides = [1, 1]} : vector<2x96xf32> to vector<2x32xf32>
    %130 = arith.addf %128, %129 : vector<2x32xf32>
    %131 = arith.negf %130 : vector<2x32xf32>
    %132 = math.exp %131 : vector<2x32xf32>
    %cst_28 = arith.constant 1.000000e+00 : f32
    %133 = vector.broadcast %cst_28 : f32 to vector<2x32xf32>
    %134 = arith.addf %133, %132 : vector<2x32xf32>
    %135 = arith.divf %133, %134 : vector<2x32xf32>
    %136 = vector.extract_strided_slice %8 {offsets = [8, 0], sizes = [2, 32], strides = [1, 1]} : vector<16x32xf32> to vector<2x32xf32>
    %137 = vector.extract_strided_slice %127 {offsets = [0, 32], sizes = [2, 32], strides = [1, 1]} : vector<2x96xf32> to vector<2x32xf32>
    %138 = arith.addf %136, %137 : vector<2x32xf32>
    %139 = arith.negf %138 : vector<2x32xf32>
    %140 = math.exp %139 : vector<2x32xf32>
    %cst_29 = arith.constant 1.000000e+00 : f32
    %141 = vector.broadcast %cst_29 : f32 to vector<2x32xf32>
    %142 = arith.addf %141, %140 : vector<2x32xf32>
    %143 = arith.divf %141, %142 : vector<2x32xf32>
    %144 = vector.extract_strided_slice %9 {offsets = [8, 0], sizes = [2, 32], strides = [1, 1]} : vector<16x32xf32> to vector<2x32xf32>
    %145 = vector.extract_strided_slice %127 {offsets = [0, 64], sizes = [2, 32], strides = [1, 1]} : vector<2x96xf32> to vector<2x32xf32>
    %146 = arith.addf %145, %13 : vector<2x32xf32>
    %147 = arith.mulf %135, %146 : vector<2x32xf32>
    %148 = arith.addf %144, %147 : vector<2x32xf32>
    %149 = math.tanh %148 : vector<2x32xf32>
    %cst_30 = arith.constant 1.000000e+00 : f32
    %150 = vector.broadcast %cst_30 : f32 to vector<2x32xf32>
    %151 = arith.subf %150, %143 : vector<2x32xf32>
    %152 = arith.mulf %151, %149 : vector<2x32xf32>
    %153 = arith.mulf %143, %126 : vector<2x32xf32>
    %154 = arith.addf %152, %153 : vector<2x32xf32>
    %cst_31 = arith.constant dense<0.000000e+00> : vector<2x96xf32>
    %155 = tpu.matmul %154, %10, %cst_31 {dimension_numbers = #tpu.dot_dimension_numbers<[1], [0], [0], [1], [0, 0, 1, 1], [], []>} : vector<2x32xf32>, vector<32x96xf32>, vector<2x96xf32> -> vector<2x96xf32>
    %156 = vector.extract_strided_slice %7 {offsets = [10, 0], sizes = [2, 32], strides = [1, 1]} : vector<16x32xf32> to vector<2x32xf32>
    %157 = vector.extract_strided_slice %155 {offsets = [0, 0], sizes = [2, 32], strides = [1, 1]} : vector<2x96xf32> to vector<2x32xf32>
    %158 = arith.addf %156, %157 : vector<2x32xf32>
    %159 = arith.negf %158 : vector<2x32xf32>
    %160 = math.exp %159 : vector<2x32xf32>
    %cst_32 = arith.constant 1.000000e+00 : f32
    %161 = vector.broadcast %cst_32 : f32 to vector<2x32xf32>
    %162 = arith.addf %161, %160 : vector<2x32xf32>
    %163 = arith.divf %161, %162 : vector<2x32xf32>
    %164 = vector.extract_strided_slice %8 {offsets = [10, 0], sizes = [2, 32], strides = [1, 1]} : vector<16x32xf32> to vector<2x32xf32>
    %165 = vector.extract_strided_slice %155 {offsets = [0, 32], sizes = [2, 32], strides = [1, 1]} : vector<2x96xf32> to vector<2x32xf32>
    %166 = arith.addf %164, %165 : vector<2x32xf32>
    %167 = arith.negf %166 : vector<2x32xf32>
    %168 = math.exp %167 : vector<2x32xf32>
    %cst_33 = arith.constant 1.000000e+00 : f32
    %169 = vector.broadcast %cst_33 : f32 to vector<2x32xf32>
    %170 = arith.addf %169, %168 : vector<2x32xf32>
    %171 = arith.divf %169, %170 : vector<2x32xf32>
    %172 = vector.extract_strided_slice %9 {offsets = [10, 0], sizes = [2, 32], strides = [1, 1]} : vector<16x32xf32> to vector<2x32xf32>
    %173 = vector.extract_strided_slice %155 {offsets = [0, 64], sizes = [2, 32], strides = [1, 1]} : vector<2x96xf32> to vector<2x32xf32>
    %174 = arith.addf %173, %13 : vector<2x32xf32>
    %175 = arith.mulf %163, %174 : vector<2x32xf32>
    %176 = arith.addf %172, %175 : vector<2x32xf32>
    %177 = math.tanh %176 : vector<2x32xf32>
    %cst_34 = arith.constant 1.000000e+00 : f32
    %178 = vector.broadcast %cst_34 : f32 to vector<2x32xf32>
    %179 = arith.subf %178, %171 : vector<2x32xf32>
    %180 = arith.mulf %179, %177 : vector<2x32xf32>
    %181 = arith.mulf %171, %154 : vector<2x32xf32>
    %182 = arith.addf %180, %181 : vector<2x32xf32>
    %cst_35 = arith.constant dense<0.000000e+00> : vector<2x96xf32>
    %183 = tpu.matmul %182, %10, %cst_35 {dimension_numbers = #tpu.dot_dimension_numbers<[1], [0], [0], [1], [0, 0, 1, 1], [], []>} : vector<2x32xf32>, vector<32x96xf32>, vector<2x96xf32> -> vector<2x96xf32>
    %184 = vector.extract_strided_slice %7 {offsets = [12, 0], sizes = [2, 32], strides = [1, 1]} : vector<16x32xf32> to vector<2x32xf32>
    %185 = vector.extract_strided_slice %183 {offsets = [0, 0], sizes = [2, 32], strides = [1, 1]} : vector<2x96xf32> to vector<2x32xf32>
    %186 = arith.addf %184, %185 : vector<2x32xf32>
    %187 = arith.negf %186 : vector<2x32xf32>
    %188 = math.exp %187 : vector<2x32xf32>
    %cst_36 = arith.constant 1.000000e+00 : f32
    %189 = vector.broadcast %cst_36 : f32 to vector<2x32xf32>
    %190 = arith.addf %189, %188 : vector<2x32xf32>
    %191 = arith.divf %189, %190 : vector<2x32xf32>
    %192 = vector.extract_strided_slice %8 {offsets = [12, 0], sizes = [2, 32], strides = [1, 1]} : vector<16x32xf32> to vector<2x32xf32>
    %193 = vector.extract_strided_slice %183 {offsets = [0, 32], sizes = [2, 32], strides = [1, 1]} : vector<2x96xf32> to vector<2x32xf32>
    %194 = arith.addf %192, %193 : vector<2x32xf32>
    %195 = arith.negf %194 : vector<2x32xf32>
    %196 = math.exp %195 : vector<2x32xf32>
    %cst_37 = arith.constant 1.000000e+00 : f32
    %197 = vector.broadcast %cst_37 : f32 to vector<2x32xf32>
    %198 = arith.addf %197, %196 : vector<2x32xf32>
    %199 = arith.divf %197, %198 : vector<2x32xf32>
    %200 = vector.extract_strided_slice %9 {offsets = [12, 0], sizes = [2, 32], strides = [1, 1]} : vector<16x32xf32> to vector<2x32xf32>
    %201 = vector.extract_strided_slice %183 {offsets = [0, 64], sizes = [2, 32], strides = [1, 1]} : vector<2x96xf32> to vector<2x32xf32>
    %202 = arith.addf %201, %13 : vector<2x32xf32>
    %203 = arith.mulf %191, %202 : vector<2x32xf32>
    %204 = arith.addf %200, %203 : vector<2x32xf32>
    %205 = math.tanh %204 : vector<2x32xf32>
    %cst_38 = arith.constant 1.000000e+00 : f32
    %206 = vector.broadcast %cst_38 : f32 to vector<2x32xf32>
    %207 = arith.subf %206, %199 : vector<2x32xf32>
    %208 = arith.mulf %207, %205 : vector<2x32xf32>
    %209 = arith.mulf %199, %182 : vector<2x32xf32>
    %210 = arith.addf %208, %209 : vector<2x32xf32>
    %cst_39 = arith.constant dense<0.000000e+00> : vector<2x96xf32>
    %211 = tpu.matmul %210, %10, %cst_39 {dimension_numbers = #tpu.dot_dimension_numbers<[1], [0], [0], [1], [0, 0, 1, 1], [], []>} : vector<2x32xf32>, vector<32x96xf32>, vector<2x96xf32> -> vector<2x96xf32>
    %212 = vector.extract_strided_slice %7 {offsets = [14, 0], sizes = [2, 32], strides = [1, 1]} : vector<16x32xf32> to vector<2x32xf32>
    %213 = vector.extract_strided_slice %211 {offsets = [0, 0], sizes = [2, 32], strides = [1, 1]} : vector<2x96xf32> to vector<2x32xf32>
    %214 = arith.addf %212, %213 : vector<2x32xf32>
    %215 = arith.negf %214 : vector<2x32xf32>
    %216 = math.exp %215 : vector<2x32xf32>
    %cst_40 = arith.constant 1.000000e+00 : f32
    %217 = vector.broadcast %cst_40 : f32 to vector<2x32xf32>
    %218 = arith.addf %217, %216 : vector<2x32xf32>
    %219 = arith.divf %217, %218 : vector<2x32xf32>
    %220 = vector.extract_strided_slice %8 {offsets = [14, 0], sizes = [2, 32], strides = [1, 1]} : vector<16x32xf32> to vector<2x32xf32>
    %221 = vector.extract_strided_slice %211 {offsets = [0, 32], sizes = [2, 32], strides = [1, 1]} : vector<2x96xf32> to vector<2x32xf32>
    %222 = arith.addf %220, %221 : vector<2x32xf32>
    %223 = arith.negf %222 : vector<2x32xf32>
    %224 = math.exp %223 : vector<2x32xf32>
    %cst_41 = arith.constant 1.000000e+00 : f32
    %225 = vector.broadcast %cst_41 : f32 to vector<2x32xf32>
    %226 = arith.addf %225, %224 : vector<2x32xf32>
    %227 = arith.divf %225, %226 : vector<2x32xf32>
    %228 = vector.extract_strided_slice %9 {offsets = [14, 0], sizes = [2, 32], strides = [1, 1]} : vector<16x32xf32> to vector<2x32xf32>
    %229 = vector.extract_strided_slice %211 {offsets = [0, 64], sizes = [2, 32], strides = [1, 1]} : vector<2x96xf32> to vector<2x32xf32>
    %230 = arith.addf %229, %13 : vector<2x32xf32>
    %231 = arith.mulf %219, %230 : vector<2x32xf32>
    %232 = arith.addf %228, %231 : vector<2x32xf32>
    %233 = math.tanh %232 : vector<2x32xf32>
    %cst_42 = arith.constant 1.000000e+00 : f32
    %234 = vector.broadcast %cst_42 : f32 to vector<2x32xf32>
    %235 = arith.subf %234, %227 : vector<2x32xf32>
    %236 = arith.mulf %235, %233 : vector<2x32xf32>
    %237 = arith.mulf %227, %210 : vector<2x32xf32>
    %238 = arith.addf %236, %237 : vector<2x32xf32>
    %c0_43 = arith.constant 0 : index
    %c0_44 = arith.constant 0 : index
    %239 = vector.load %arg7[%c0_43, %c0_44] : memref<32x50xf32, #tpu.memory_space<vmem>>, vector<32x50xf32>
    %cst_45 = arith.constant dense<0.000000e+00> : vector<2x50xf32>
    %240 = tpu.matmul %238, %239, %cst_45 {dimension_numbers = #tpu.dot_dimension_numbers<[1], [0], [0], [1], [0, 0, 1, 1], [], []>} : vector<2x32xf32>, vector<32x50xf32>, vector<2x50xf32> -> vector<2x50xf32>
    %c0_46 = arith.constant 0 : index
    %c0_47 = arith.constant 0 : index
    %241 = vector.load %arg8[%c0_46, %c0_47] : memref<1x50xf32, #tpu.memory_space<vmem>>, vector<1x50xf32>
    %242 = vector.broadcast %241 : vector<1x50xf32> to vector<2x50xf32>
    %243 = arith.addf %240, %242 : vector<2x50xf32>
    %244 = math.tanh %243 : vector<2x50xf32>
    %c0_48 = arith.constant 0 : index
    %c0_49 = arith.constant 0 : index
    %245 = vector.load %arg9[%c0_48, %c0_49] : memref<50x32xf32, #tpu.memory_space<vmem>>, vector<50x32xf32>
    %cst_50 = arith.constant dense<0.000000e+00> : vector<2x32xf32>
    %246 = tpu.matmul %244, %245, %cst_50 {dimension_numbers = #tpu.dot_dimension_numbers<[1], [0], [0], [1], [0, 0, 1, 1], [], []>} : vector<2x50xf32>, vector<50x32xf32>, vector<2x32xf32> -> vector<2x32xf32>
    %c0_51 = arith.constant 0 : index
    %c0_52 = arith.constant 0 : index
    %247 = vector.load %arg10[%c0_51, %c0_52] : memref<1x32xf32, #tpu.memory_space<vmem>>, vector<1x32xf32>
    %248 = vector.broadcast %247 : vector<1x32xf32> to vector<2x32xf32>
    %249 = arith.addf %246, %248 : vector<2x32xf32>
    %c0_53 = arith.constant 0 : index
    %c0_54 = arith.constant 0 : index
    %250 = vector.load %arg11[%c0_53, %c0_54] : memref<50x32xf32, #tpu.memory_space<vmem>>, vector<50x32xf32>
    %cst_55 = arith.constant dense<0.000000e+00> : vector<2x32xf32>
    %251 = tpu.matmul %244, %250, %cst_55 {dimension_numbers = #tpu.dot_dimension_numbers<[1], [0], [0], [1], [0, 0, 1, 1], [], []>} : vector<2x50xf32>, vector<50x32xf32>, vector<2x32xf32> -> vector<2x32xf32>
    %c0_56 = arith.constant 0 : index
    %c0_57 = arith.constant 0 : index
    %252 = vector.load %arg12[%c0_56, %c0_57] : memref<1x32xf32, #tpu.memory_space<vmem>>, vector<1x32xf32>
    %253 = vector.broadcast %252 : vector<1x32xf32> to vector<2x32xf32>
    %254 = arith.addf %251, %253 : vector<2x32xf32>
    %255 = math.absf %254 : vector<2x32xf32>
    %c0_58 = arith.constant 0 : index
    %c0_59 = arith.constant 0 : index
    %256 = vector.load %arg2[%c0_58, %c0_59] : memref<2x32xf32, #tpu.memory_space<vmem>>, vector<2x32xf32>
    %257 = arith.mulf %256, %255 : vector<2x32xf32>
    %258 = arith.addf %257, %249 : vector<2x32xf32>
    %c0_60 = arith.constant 0 : index
    %c0_61 = arith.constant 0 : index
    %259 = vector.load %arg13[%c0_60, %c0_61] : memref<32x50xf32, #tpu.memory_space<vmem>>, vector<32x50xf32>
    %c0_62 = arith.constant 0 : index
    %c0_63 = arith.constant 0 : index
    %260 = vector.load %arg15[%c0_62, %c0_63] : memref<50x32xf32, #tpu.memory_space<vmem>>, vector<50x32xf32>
    %c0_64 = arith.constant 0 : index
    %c0_65 = arith.constant 0 : index
    %261 = vector.load %arg14[%c0_64, %c0_65] : memref<1x50xf32, #tpu.memory_space<vmem>>, vector<1x50xf32>
    %262 = vector.shape_cast %261 : vector<1x50xf32> to vector<1x50xf32>
    %263 = vector.broadcast %262 : vector<1x50xf32> to vector<2x50xf32>
    %c0_66 = arith.constant 0 : index
    %c0_67 = arith.constant 0 : index
    %264 = vector.load %arg16[%c0_66, %c0_67] : memref<1x32xf32, #tpu.memory_space<vmem>>, vector<1x32xf32>
    %265 = vector.shape_cast %264 : vector<1x32xf32> to vector<1x32xf32>
    %266 = vector.broadcast %265 : vector<1x32xf32> to vector<2x32xf32>
    %c0_68 = arith.constant 0 : index
    %267 = memref.load %arg1[%c0_68] : memref<7xf32, #tpu.memory_space<smem>>
    %cst_69 = arith.constant dense<0.000000e+00> : vector<2x50xf32>
    %268 = tpu.matmul %258, %259, %cst_69 {dimension_numbers = #tpu.dot_dimension_numbers<[1], [0], [0], [1], [0, 0, 1, 1], [], []>} : vector<2x32xf32>, vector<32x50xf32>, vector<2x50xf32> -> vector<2x50xf32>
    %269 = arith.addf %268, %263 : vector<2x50xf32>
    %270 = math.tanh %269 : vector<2x50xf32>
    %cst_70 = arith.constant dense<0.000000e+00> : vector<2x32xf32>
    %271 = tpu.matmul %270, %260, %cst_70 {dimension_numbers = #tpu.dot_dimension_numbers<[1], [0], [0], [1], [0, 0, 1, 1], [], []>} : vector<2x50xf32>, vector<50x32xf32>, vector<2x32xf32> -> vector<2x32xf32>
    %272 = arith.addf %271, %266 : vector<2x32xf32>
    %273 = vector.broadcast %267 : f32 to vector<2x32xf32>
    %274 = arith.mulf %273, %272 : vector<2x32xf32>
    %cst_71 = arith.constant 0.333333343 : f32
    %275 = vector.broadcast %cst_71 : f32 to vector<2x32xf32>
    %276 = arith.mulf %274, %275 : vector<2x32xf32>
    %277 = arith.addf %258, %276 : vector<2x32xf32>
    %cst_72 = arith.constant dense<0.000000e+00> : vector<2x50xf32>
    %278 = tpu.matmul %277, %259, %cst_72 {dimension_numbers = #tpu.dot_dimension_numbers<[1], [0], [0], [1], [0, 0, 1, 1], [], []>} : vector<2x32xf32>, vector<32x50xf32>, vector<2x50xf32> -> vector<2x50xf32>
    %279 = arith.addf %278, %263 : vector<2x50xf32>
    %280 = math.tanh %279 : vector<2x50xf32>
    %cst_73 = arith.constant dense<0.000000e+00> : vector<2x32xf32>
    %281 = tpu.matmul %280, %260, %cst_73 {dimension_numbers = #tpu.dot_dimension_numbers<[1], [0], [0], [1], [0, 0, 1, 1], [], []>} : vector<2x50xf32>, vector<50x32xf32>, vector<2x32xf32> -> vector<2x32xf32>
    %282 = arith.addf %281, %266 : vector<2x32xf32>
    %cst_74 = arith.constant 0.333333343 : f32
    %283 = vector.broadcast %cst_74 : f32 to vector<2x32xf32>
    %284 = arith.mulf %272, %283 : vector<2x32xf32>
    %285 = arith.subf %282, %284 : vector<2x32xf32>
    %286 = vector.broadcast %267 : f32 to vector<2x32xf32>
    %287 = arith.mulf %286, %285 : vector<2x32xf32>
    %288 = arith.addf %258, %287 : vector<2x32xf32>
    %cst_75 = arith.constant dense<0.000000e+00> : vector<2x50xf32>
    %289 = tpu.matmul %288, %259, %cst_75 {dimension_numbers = #tpu.dot_dimension_numbers<[1], [0], [0], [1], [0, 0, 1, 1], [], []>} : vector<2x32xf32>, vector<32x50xf32>, vector<2x50xf32> -> vector<2x50xf32>
    %290 = arith.addf %289, %263 : vector<2x50xf32>
    %291 = math.tanh %290 : vector<2x50xf32>
    %cst_76 = arith.constant dense<0.000000e+00> : vector<2x32xf32>
    %292 = tpu.matmul %291, %260, %cst_76 {dimension_numbers = #tpu.dot_dimension_numbers<[1], [0], [0], [1], [0, 0, 1, 1], [], []>} : vector<2x50xf32>, vector<50x32xf32>, vector<2x32xf32> -> vector<2x32xf32>
    %293 = arith.addf %292, %266 : vector<2x32xf32>
    %294 = arith.subf %272, %282 : vector<2x32xf32>
    %295 = arith.addf %294, %293 : vector<2x32xf32>
    %296 = vector.broadcast %267 : f32 to vector<2x32xf32>
    %297 = arith.mulf %296, %295 : vector<2x32xf32>
    %298 = arith.addf %258, %297 : vector<2x32xf32>
    %cst_77 = arith.constant dense<0.000000e+00> : vector<2x50xf32>
    %299 = tpu.matmul %298, %259, %cst_77 {dimension_numbers = #tpu.dot_dimension_numbers<[1], [0], [0], [1], [0, 0, 1, 1], [], []>} : vector<2x32xf32>, vector<32x50xf32>, vector<2x50xf32> -> vector<2x50xf32>
    %300 = arith.addf %299, %263 : vector<2x50xf32>
    %301 = math.tanh %300 : vector<2x50xf32>
    %cst_78 = arith.constant dense<0.000000e+00> : vector<2x32xf32>
    %302 = tpu.matmul %301, %260, %cst_78 {dimension_numbers = #tpu.dot_dimension_numbers<[1], [0], [0], [1], [0, 0, 1, 1], [], []>} : vector<2x50xf32>, vector<50x32xf32>, vector<2x32xf32> -> vector<2x32xf32>
    %303 = arith.addf %302, %266 : vector<2x32xf32>
    %304 = arith.addf %282, %293 : vector<2x32xf32>
    %cst_79 = arith.constant 3.000000e+00 : f32
    %305 = vector.broadcast %cst_79 : f32 to vector<2x32xf32>
    %306 = arith.mulf %305, %304 : vector<2x32xf32>
    %307 = arith.addf %272, %306 : vector<2x32xf32>
    %308 = arith.addf %307, %303 : vector<2x32xf32>
    %cst_80 = arith.constant 1.250000e-01 : f32
    %309 = arith.mulf %267, %cst_80 : f32
    %310 = vector.broadcast %309 : f32 to vector<2x32xf32>
    %311 = arith.mulf %308, %310 : vector<2x32xf32>
    %312 = arith.addf %258, %311 : vector<2x32xf32>
    %c1 = arith.constant 1 : index
    %313 = memref.load %arg1[%c1] : memref<7xf32, #tpu.memory_space<smem>>
    %cst_81 = arith.constant dense<0.000000e+00> : vector<2x50xf32>
    %314 = tpu.matmul %312, %259, %cst_81 {dimension_numbers = #tpu.dot_dimension_numbers<[1], [0], [0], [1], [0, 0, 1, 1], [], []>} : vector<2x32xf32>, vector<32x50xf32>, vector<2x50xf32> -> vector<2x50xf32>
    %315 = arith.addf %314, %263 : vector<2x50xf32>
    %316 = math.tanh %315 : vector<2x50xf32>
    %cst_82 = arith.constant dense<0.000000e+00> : vector<2x32xf32>
    %317 = tpu.matmul %316, %260, %cst_82 {dimension_numbers = #tpu.dot_dimension_numbers<[1], [0], [0], [1], [0, 0, 1, 1], [], []>} : vector<2x50xf32>, vector<50x32xf32>, vector<2x32xf32> -> vector<2x32xf32>
    %318 = arith.addf %317, %266 : vector<2x32xf32>
    %319 = vector.broadcast %313 : f32 to vector<2x32xf32>
    %320 = arith.mulf %319, %318 : vector<2x32xf32>
    %cst_83 = arith.constant 0.333333343 : f32
    %321 = vector.broadcast %cst_83 : f32 to vector<2x32xf32>
    %322 = arith.mulf %320, %321 : vector<2x32xf32>
    %323 = arith.addf %312, %322 : vector<2x32xf32>
    %cst_84 = arith.constant dense<0.000000e+00> : vector<2x50xf32>
    %324 = tpu.matmul %323, %259, %cst_84 {dimension_numbers = #tpu.dot_dimension_numbers<[1], [0], [0], [1], [0, 0, 1, 1], [], []>} : vector<2x32xf32>, vector<32x50xf32>, vector<2x50xf32> -> vector<2x50xf32>
    %325 = arith.addf %324, %263 : vector<2x50xf32>
    %326 = math.tanh %325 : vector<2x50xf32>
    %cst_85 = arith.constant dense<0.000000e+00> : vector<2x32xf32>
    %327 = tpu.matmul %326, %260, %cst_85 {dimension_numbers = #tpu.dot_dimension_numbers<[1], [0], [0], [1], [0, 0, 1, 1], [], []>} : vector<2x50xf32>, vector<50x32xf32>, vector<2x32xf32> -> vector<2x32xf32>
    %328 = arith.addf %327, %266 : vector<2x32xf32>
    %cst_86 = arith.constant 0.333333343 : f32
    %329 = vector.broadcast %cst_86 : f32 to vector<2x32xf32>
    %330 = arith.mulf %318, %329 : vector<2x32xf32>
    %331 = arith.subf %328, %330 : vector<2x32xf32>
    %332 = vector.broadcast %313 : f32 to vector<2x32xf32>
    %333 = arith.mulf %332, %331 : vector<2x32xf32>
    %334 = arith.addf %312, %333 : vector<2x32xf32>
    %cst_87 = arith.constant dense<0.000000e+00> : vector<2x50xf32>
    %335 = tpu.matmul %334, %259, %cst_87 {dimension_numbers = #tpu.dot_dimension_numbers<[1], [0], [0], [1], [0, 0, 1, 1], [], []>} : vector<2x32xf32>, vector<32x50xf32>, vector<2x50xf32> -> vector<2x50xf32>
    %336 = arith.addf %335, %263 : vector<2x50xf32>
    %337 = math.tanh %336 : vector<2x50xf32>
    %cst_88 = arith.constant dense<0.000000e+00> : vector<2x32xf32>
    %338 = tpu.matmul %337, %260, %cst_88 {dimension_numbers = #tpu.dot_dimension_numbers<[1], [0], [0], [1], [0, 0, 1, 1], [], []>} : vector<2x50xf32>, vector<50x32xf32>, vector<2x32xf32> -> vector<2x32xf32>
    %339 = arith.addf %338, %266 : vector<2x32xf32>
    %340 = arith.subf %318, %328 : vector<2x32xf32>
    %341 = arith.addf %340, %339 : vector<2x32xf32>
    %342 = vector.broadcast %313 : f32 to vector<2x32xf32>
    %343 = arith.mulf %342, %341 : vector<2x32xf32>
    %344 = arith.addf %312, %343 : vector<2x32xf32>
    %cst_89 = arith.constant dense<0.000000e+00> : vector<2x50xf32>
    %345 = tpu.matmul %344, %259, %cst_89 {dimension_numbers = #tpu.dot_dimension_numbers<[1], [0], [0], [1], [0, 0, 1, 1], [], []>} : vector<2x32xf32>, vector<32x50xf32>, vector<2x50xf32> -> vector<2x50xf32>
    %346 = arith.addf %345, %263 : vector<2x50xf32>
    %347 = math.tanh %346 : vector<2x50xf32>
    %cst_90 = arith.constant dense<0.000000e+00> : vector<2x32xf32>
    %348 = tpu.matmul %347, %260, %cst_90 {dimension_numbers = #tpu.dot_dimension_numbers<[1], [0], [0], [1], [0, 0, 1, 1], [], []>} : vector<2x50xf32>, vector<50x32xf32>, vector<2x32xf32> -> vector<2x32xf32>
    %349 = arith.addf %348, %266 : vector<2x32xf32>
    %350 = arith.addf %328, %339 : vector<2x32xf32>
    %cst_91 = arith.constant 3.000000e+00 : f32
    %351 = vector.broadcast %cst_91 : f32 to vector<2x32xf32>
    %352 = arith.mulf %351, %350 : vector<2x32xf32>
    %353 = arith.addf %318, %352 : vector<2x32xf32>
    %354 = arith.addf %353, %349 : vector<2x32xf32>
    %cst_92 = arith.constant 1.250000e-01 : f32
    %355 = arith.mulf %313, %cst_92 : f32
    %356 = vector.broadcast %355 : f32 to vector<2x32xf32>
    %357 = arith.mulf %354, %356 : vector<2x32xf32>
    %358 = arith.addf %312, %357 : vector<2x32xf32>
    %c2 = arith.constant 2 : index
    %359 = memref.load %arg1[%c2] : memref<7xf32, #tpu.memory_space<smem>>
    %cst_93 = arith.constant dense<0.000000e+00> : vector<2x50xf32>
    %360 = tpu.matmul %358, %259, %cst_93 {dimension_numbers = #tpu.dot_dimension_numbers<[1], [0], [0], [1], [0, 0, 1, 1], [], []>} : vector<2x32xf32>, vector<32x50xf32>, vector<2x50xf32> -> vector<2x50xf32>
    %361 = arith.addf %360, %263 : vector<2x50xf32>
    %362 = math.tanh %361 : vector<2x50xf32>
    %cst_94 = arith.constant dense<0.000000e+00> : vector<2x32xf32>
    %363 = tpu.matmul %362, %260, %cst_94 {dimension_numbers = #tpu.dot_dimension_numbers<[1], [0], [0], [1], [0, 0, 1, 1], [], []>} : vector<2x50xf32>, vector<50x32xf32>, vector<2x32xf32> -> vector<2x32xf32>
    %364 = arith.addf %363, %266 : vector<2x32xf32>
    %365 = vector.broadcast %359 : f32 to vector<2x32xf32>
    %366 = arith.mulf %365, %364 : vector<2x32xf32>
    %cst_95 = arith.constant 0.333333343 : f32
    %367 = vector.broadcast %cst_95 : f32 to vector<2x32xf32>
    %368 = arith.mulf %366, %367 : vector<2x32xf32>
    %369 = arith.addf %358, %368 : vector<2x32xf32>
    %cst_96 = arith.constant dense<0.000000e+00> : vector<2x50xf32>
    %370 = tpu.matmul %369, %259, %cst_96 {dimension_numbers = #tpu.dot_dimension_numbers<[1], [0], [0], [1], [0, 0, 1, 1], [], []>} : vector<2x32xf32>, vector<32x50xf32>, vector<2x50xf32> -> vector<2x50xf32>
    %371 = arith.addf %370, %263 : vector<2x50xf32>
    %372 = math.tanh %371 : vector<2x50xf32>
    %cst_97 = arith.constant dense<0.000000e+00> : vector<2x32xf32>
    %373 = tpu.matmul %372, %260, %cst_97 {dimension_numbers = #tpu.dot_dimension_numbers<[1], [0], [0], [1], [0, 0, 1, 1], [], []>} : vector<2x50xf32>, vector<50x32xf32>, vector<2x32xf32> -> vector<2x32xf32>
    %374 = arith.addf %373, %266 : vector<2x32xf32>
    %cst_98 = arith.constant 0.333333343 : f32
    %375 = vector.broadcast %cst_98 : f32 to vector<2x32xf32>
    %376 = arith.mulf %364, %375 : vector<2x32xf32>
    %377 = arith.subf %374, %376 : vector<2x32xf32>
    %378 = vector.broadcast %359 : f32 to vector<2x32xf32>
    %379 = arith.mulf %378, %377 : vector<2x32xf32>
    %380 = arith.addf %358, %379 : vector<2x32xf32>
    %cst_99 = arith.constant dense<0.000000e+00> : vector<2x50xf32>
    %381 = tpu.matmul %380, %259, %cst_99 {dimension_numbers = #tpu.dot_dimension_numbers<[1], [0], [0], [1], [0, 0, 1, 1], [], []>} : vector<2x32xf32>, vector<32x50xf32>, vector<2x50xf32> -> vector<2x50xf32>
    %382 = arith.addf %381, %263 : vector<2x50xf32>
    %383 = math.tanh %382 : vector<2x50xf32>
    %cst_100 = arith.constant dense<0.000000e+00> : vector<2x32xf32>
    %384 = tpu.matmul %383, %260, %cst_100 {dimension_numbers = #tpu.dot_dimension_numbers<[1], [0], [0], [1], [0, 0, 1, 1], [], []>} : vector<2x50xf32>, vector<50x32xf32>, vector<2x32xf32> -> vector<2x32xf32>
    %385 = arith.addf %384, %266 : vector<2x32xf32>
    %386 = arith.subf %364, %374 : vector<2x32xf32>
    %387 = arith.addf %386, %385 : vector<2x32xf32>
    %388 = vector.broadcast %359 : f32 to vector<2x32xf32>
    %389 = arith.mulf %388, %387 : vector<2x32xf32>
    %390 = arith.addf %358, %389 : vector<2x32xf32>
    %cst_101 = arith.constant dense<0.000000e+00> : vector<2x50xf32>
    %391 = tpu.matmul %390, %259, %cst_101 {dimension_numbers = #tpu.dot_dimension_numbers<[1], [0], [0], [1], [0, 0, 1, 1], [], []>} : vector<2x32xf32>, vector<32x50xf32>, vector<2x50xf32> -> vector<2x50xf32>
    %392 = arith.addf %391, %263 : vector<2x50xf32>
    %393 = math.tanh %392 : vector<2x50xf32>
    %cst_102 = arith.constant dense<0.000000e+00> : vector<2x32xf32>
    %394 = tpu.matmul %393, %260, %cst_102 {dimension_numbers = #tpu.dot_dimension_numbers<[1], [0], [0], [1], [0, 0, 1, 1], [], []>} : vector<2x50xf32>, vector<50x32xf32>, vector<2x32xf32> -> vector<2x32xf32>
    %395 = arith.addf %394, %266 : vector<2x32xf32>
    %396 = arith.addf %374, %385 : vector<2x32xf32>
    %cst_103 = arith.constant 3.000000e+00 : f32
    %397 = vector.broadcast %cst_103 : f32 to vector<2x32xf32>
    %398 = arith.mulf %397, %396 : vector<2x32xf32>
    %399 = arith.addf %364, %398 : vector<2x32xf32>
    %400 = arith.addf %399, %395 : vector<2x32xf32>
    %cst_104 = arith.constant 1.250000e-01 : f32
    %401 = arith.mulf %359, %cst_104 : f32
    %402 = vector.broadcast %401 : f32 to vector<2x32xf32>
    %403 = arith.mulf %400, %402 : vector<2x32xf32>
    %404 = arith.addf %358, %403 : vector<2x32xf32>
    %c3 = arith.constant 3 : index
    %405 = memref.load %arg1[%c3] : memref<7xf32, #tpu.memory_space<smem>>
    %cst_105 = arith.constant dense<0.000000e+00> : vector<2x50xf32>
    %406 = tpu.matmul %404, %259, %cst_105 {dimension_numbers = #tpu.dot_dimension_numbers<[1], [0], [0], [1], [0, 0, 1, 1], [], []>} : vector<2x32xf32>, vector<32x50xf32>, vector<2x50xf32> -> vector<2x50xf32>
    %407 = arith.addf %406, %263 : vector<2x50xf32>
    %408 = math.tanh %407 : vector<2x50xf32>
    %cst_106 = arith.constant dense<0.000000e+00> : vector<2x32xf32>
    %409 = tpu.matmul %408, %260, %cst_106 {dimension_numbers = #tpu.dot_dimension_numbers<[1], [0], [0], [1], [0, 0, 1, 1], [], []>} : vector<2x50xf32>, vector<50x32xf32>, vector<2x32xf32> -> vector<2x32xf32>
    %410 = arith.addf %409, %266 : vector<2x32xf32>
    %411 = vector.broadcast %405 : f32 to vector<2x32xf32>
    %412 = arith.mulf %411, %410 : vector<2x32xf32>
    %cst_107 = arith.constant 0.333333343 : f32
    %413 = vector.broadcast %cst_107 : f32 to vector<2x32xf32>
    %414 = arith.mulf %412, %413 : vector<2x32xf32>
    %415 = arith.addf %404, %414 : vector<2x32xf32>
    %cst_108 = arith.constant dense<0.000000e+00> : vector<2x50xf32>
    %416 = tpu.matmul %415, %259, %cst_108 {dimension_numbers = #tpu.dot_dimension_numbers<[1], [0], [0], [1], [0, 0, 1, 1], [], []>} : vector<2x32xf32>, vector<32x50xf32>, vector<2x50xf32> -> vector<2x50xf32>
    %417 = arith.addf %416, %263 : vector<2x50xf32>
    %418 = math.tanh %417 : vector<2x50xf32>
    %cst_109 = arith.constant dense<0.000000e+00> : vector<2x32xf32>
    %419 = tpu.matmul %418, %260, %cst_109 {dimension_numbers = #tpu.dot_dimension_numbers<[1], [0], [0], [1], [0, 0, 1, 1], [], []>} : vector<2x50xf32>, vector<50x32xf32>, vector<2x32xf32> -> vector<2x32xf32>
    %420 = arith.addf %419, %266 : vector<2x32xf32>
    %cst_110 = arith.constant 0.333333343 : f32
    %421 = vector.broadcast %cst_110 : f32 to vector<2x32xf32>
    %422 = arith.mulf %410, %421 : vector<2x32xf32>
    %423 = arith.subf %420, %422 : vector<2x32xf32>
    %424 = vector.broadcast %405 : f32 to vector<2x32xf32>
    %425 = arith.mulf %424, %423 : vector<2x32xf32>
    %426 = arith.addf %404, %425 : vector<2x32xf32>
    %cst_111 = arith.constant dense<0.000000e+00> : vector<2x50xf32>
    %427 = tpu.matmul %426, %259, %cst_111 {dimension_numbers = #tpu.dot_dimension_numbers<[1], [0], [0], [1], [0, 0, 1, 1], [], []>} : vector<2x32xf32>, vector<32x50xf32>, vector<2x50xf32> -> vector<2x50xf32>
    %428 = arith.addf %427, %263 : vector<2x50xf32>
    %429 = math.tanh %428 : vector<2x50xf32>
    %cst_112 = arith.constant dense<0.000000e+00> : vector<2x32xf32>
    %430 = tpu.matmul %429, %260, %cst_112 {dimension_numbers = #tpu.dot_dimension_numbers<[1], [0], [0], [1], [0, 0, 1, 1], [], []>} : vector<2x50xf32>, vector<50x32xf32>, vector<2x32xf32> -> vector<2x32xf32>
    %431 = arith.addf %430, %266 : vector<2x32xf32>
    %432 = arith.subf %410, %420 : vector<2x32xf32>
    %433 = arith.addf %432, %431 : vector<2x32xf32>
    %434 = vector.broadcast %405 : f32 to vector<2x32xf32>
    %435 = arith.mulf %434, %433 : vector<2x32xf32>
    %436 = arith.addf %404, %435 : vector<2x32xf32>
    %cst_113 = arith.constant dense<0.000000e+00> : vector<2x50xf32>
    %437 = tpu.matmul %436, %259, %cst_113 {dimension_numbers = #tpu.dot_dimension_numbers<[1], [0], [0], [1], [0, 0, 1, 1], [], []>} : vector<2x32xf32>, vector<32x50xf32>, vector<2x50xf32> -> vector<2x50xf32>
    %438 = arith.addf %437, %263 : vector<2x50xf32>
    %439 = math.tanh %438 : vector<2x50xf32>
    %cst_114 = arith.constant dense<0.000000e+00> : vector<2x32xf32>
    %440 = tpu.matmul %439, %260, %cst_114 {dimension_numbers = #tpu.dot_dimension_numbers<[1], [0], [0], [1], [0, 0, 1, 1], [], []>} : vector<2x50xf32>, vector<50x32xf32>, vector<2x32xf32> -> vector<2x32xf32>
    %441 = arith.addf %440, %266 : vector<2x32xf32>
    %442 = arith.addf %420, %431 : vector<2x32xf32>
    %cst_115 = arith.constant 3.000000e+00 : f32
    %443 = vector.broadcast %cst_115 : f32 to vector<2x32xf32>
    %444 = arith.mulf %443, %442 : vector<2x32xf32>
    %445 = arith.addf %410, %444 : vector<2x32xf32>
    %446 = arith.addf %445, %441 : vector<2x32xf32>
    %cst_116 = arith.constant 1.250000e-01 : f32
    %447 = arith.mulf %405, %cst_116 : f32
    %448 = vector.broadcast %447 : f32 to vector<2x32xf32>
    %449 = arith.mulf %446, %448 : vector<2x32xf32>
    %450 = arith.addf %404, %449 : vector<2x32xf32>
    %c4 = arith.constant 4 : index
    %451 = memref.load %arg1[%c4] : memref<7xf32, #tpu.memory_space<smem>>
    %cst_117 = arith.constant dense<0.000000e+00> : vector<2x50xf32>
    %452 = tpu.matmul %450, %259, %cst_117 {dimension_numbers = #tpu.dot_dimension_numbers<[1], [0], [0], [1], [0, 0, 1, 1], [], []>} : vector<2x32xf32>, vector<32x50xf32>, vector<2x50xf32> -> vector<2x50xf32>
    %453 = arith.addf %452, %263 : vector<2x50xf32>
    %454 = math.tanh %453 : vector<2x50xf32>
    %cst_118 = arith.constant dense<0.000000e+00> : vector<2x32xf32>
    %455 = tpu.matmul %454, %260, %cst_118 {dimension_numbers = #tpu.dot_dimension_numbers<[1], [0], [0], [1], [0, 0, 1, 1], [], []>} : vector<2x50xf32>, vector<50x32xf32>, vector<2x32xf32> -> vector<2x32xf32>
    %456 = arith.addf %455, %266 : vector<2x32xf32>
    %457 = vector.broadcast %451 : f32 to vector<2x32xf32>
    %458 = arith.mulf %457, %456 : vector<2x32xf32>
    %cst_119 = arith.constant 0.333333343 : f32
    %459 = vector.broadcast %cst_119 : f32 to vector<2x32xf32>
    %460 = arith.mulf %458, %459 : vector<2x32xf32>
    %461 = arith.addf %450, %460 : vector<2x32xf32>
    %cst_120 = arith.constant dense<0.000000e+00> : vector<2x50xf32>
    %462 = tpu.matmul %461, %259, %cst_120 {dimension_numbers = #tpu.dot_dimension_numbers<[1], [0], [0], [1], [0, 0, 1, 1], [], []>} : vector<2x32xf32>, vector<32x50xf32>, vector<2x50xf32> -> vector<2x50xf32>
    %463 = arith.addf %462, %263 : vector<2x50xf32>
    %464 = math.tanh %463 : vector<2x50xf32>
    %cst_121 = arith.constant dense<0.000000e+00> : vector<2x32xf32>
    %465 = tpu.matmul %464, %260, %cst_121 {dimension_numbers = #tpu.dot_dimension_numbers<[1], [0], [0], [1], [0, 0, 1, 1], [], []>} : vector<2x50xf32>, vector<50x32xf32>, vector<2x32xf32> -> vector<2x32xf32>
    %466 = arith.addf %465, %266 : vector<2x32xf32>
    %cst_122 = arith.constant 0.333333343 : f32
    %467 = vector.broadcast %cst_122 : f32 to vector<2x32xf32>
    %468 = arith.mulf %456, %467 : vector<2x32xf32>
    %469 = arith.subf %466, %468 : vector<2x32xf32>
    %470 = vector.broadcast %451 : f32 to vector<2x32xf32>
    %471 = arith.mulf %470, %469 : vector<2x32xf32>
    %472 = arith.addf %450, %471 : vector<2x32xf32>
    %cst_123 = arith.constant dense<0.000000e+00> : vector<2x50xf32>
    %473 = tpu.matmul %472, %259, %cst_123 {dimension_numbers = #tpu.dot_dimension_numbers<[1], [0], [0], [1], [0, 0, 1, 1], [], []>} : vector<2x32xf32>, vector<32x50xf32>, vector<2x50xf32> -> vector<2x50xf32>
    %474 = arith.addf %473, %263 : vector<2x50xf32>
    %475 = math.tanh %474 : vector<2x50xf32>
    %cst_124 = arith.constant dense<0.000000e+00> : vector<2x32xf32>
    %476 = tpu.matmul %475, %260, %cst_124 {dimension_numbers = #tpu.dot_dimension_numbers<[1], [0], [0], [1], [0, 0, 1, 1], [], []>} : vector<2x50xf32>, vector<50x32xf32>, vector<2x32xf32> -> vector<2x32xf32>
    %477 = arith.addf %476, %266 : vector<2x32xf32>
    %478 = arith.subf %456, %466 : vector<2x32xf32>
    %479 = arith.addf %478, %477 : vector<2x32xf32>
    %480 = vector.broadcast %451 : f32 to vector<2x32xf32>
    %481 = arith.mulf %480, %479 : vector<2x32xf32>
    %482 = arith.addf %450, %481 : vector<2x32xf32>
    %cst_125 = arith.constant dense<0.000000e+00> : vector<2x50xf32>
    %483 = tpu.matmul %482, %259, %cst_125 {dimension_numbers = #tpu.dot_dimension_numbers<[1], [0], [0], [1], [0, 0, 1, 1], [], []>} : vector<2x32xf32>, vector<32x50xf32>, vector<2x50xf32> -> vector<2x50xf32>
    %484 = arith.addf %483, %263 : vector<2x50xf32>
    %485 = math.tanh %484 : vector<2x50xf32>
    %cst_126 = arith.constant dense<0.000000e+00> : vector<2x32xf32>
    %486 = tpu.matmul %485, %260, %cst_126 {dimension_numbers = #tpu.dot_dimension_numbers<[1], [0], [0], [1], [0, 0, 1, 1], [], []>} : vector<2x50xf32>, vector<50x32xf32>, vector<2x32xf32> -> vector<2x32xf32>
    %487 = arith.addf %486, %266 : vector<2x32xf32>
    %488 = arith.addf %466, %477 : vector<2x32xf32>
    %cst_127 = arith.constant 3.000000e+00 : f32
    %489 = vector.broadcast %cst_127 : f32 to vector<2x32xf32>
    %490 = arith.mulf %489, %488 : vector<2x32xf32>
    %491 = arith.addf %456, %490 : vector<2x32xf32>
    %492 = arith.addf %491, %487 : vector<2x32xf32>
    %cst_128 = arith.constant 1.250000e-01 : f32
    %493 = arith.mulf %451, %cst_128 : f32
    %494 = vector.broadcast %493 : f32 to vector<2x32xf32>
    %495 = arith.mulf %492, %494 : vector<2x32xf32>
    %496 = arith.addf %450, %495 : vector<2x32xf32>
    %c5 = arith.constant 5 : index
    %497 = memref.load %arg1[%c5] : memref<7xf32, #tpu.memory_space<smem>>
    %cst_129 = arith.constant dense<0.000000e+00> : vector<2x50xf32>
    %498 = tpu.matmul %496, %259, %cst_129 {dimension_numbers = #tpu.dot_dimension_numbers<[1], [0], [0], [1], [0, 0, 1, 1], [], []>} : vector<2x32xf32>, vector<32x50xf32>, vector<2x50xf32> -> vector<2x50xf32>
    %499 = arith.addf %498, %263 : vector<2x50xf32>
    %500 = math.tanh %499 : vector<2x50xf32>
    %cst_130 = arith.constant dense<0.000000e+00> : vector<2x32xf32>
    %501 = tpu.matmul %500, %260, %cst_130 {dimension_numbers = #tpu.dot_dimension_numbers<[1], [0], [0], [1], [0, 0, 1, 1], [], []>} : vector<2x50xf32>, vector<50x32xf32>, vector<2x32xf32> -> vector<2x32xf32>
    %502 = arith.addf %501, %266 : vector<2x32xf32>
    %503 = vector.broadcast %497 : f32 to vector<2x32xf32>
    %504 = arith.mulf %503, %502 : vector<2x32xf32>
    %cst_131 = arith.constant 0.333333343 : f32
    %505 = vector.broadcast %cst_131 : f32 to vector<2x32xf32>
    %506 = arith.mulf %504, %505 : vector<2x32xf32>
    %507 = arith.addf %496, %506 : vector<2x32xf32>
    %cst_132 = arith.constant dense<0.000000e+00> : vector<2x50xf32>
    %508 = tpu.matmul %507, %259, %cst_132 {dimension_numbers = #tpu.dot_dimension_numbers<[1], [0], [0], [1], [0, 0, 1, 1], [], []>} : vector<2x32xf32>, vector<32x50xf32>, vector<2x50xf32> -> vector<2x50xf32>
    %509 = arith.addf %508, %263 : vector<2x50xf32>
    %510 = math.tanh %509 : vector<2x50xf32>
    %cst_133 = arith.constant dense<0.000000e+00> : vector<2x32xf32>
    %511 = tpu.matmul %510, %260, %cst_133 {dimension_numbers = #tpu.dot_dimension_numbers<[1], [0], [0], [1], [0, 0, 1, 1], [], []>} : vector<2x50xf32>, vector<50x32xf32>, vector<2x32xf32> -> vector<2x32xf32>
    %512 = arith.addf %511, %266 : vector<2x32xf32>
    %cst_134 = arith.constant 0.333333343 : f32
    %513 = vector.broadcast %cst_134 : f32 to vector<2x32xf32>
    %514 = arith.mulf %502, %513 : vector<2x32xf32>
    %515 = arith.subf %512, %514 : vector<2x32xf32>
    %516 = vector.broadcast %497 : f32 to vector<2x32xf32>
    %517 = arith.mulf %516, %515 : vector<2x32xf32>
    %518 = arith.addf %496, %517 : vector<2x32xf32>
    %cst_135 = arith.constant dense<0.000000e+00> : vector<2x50xf32>
    %519 = tpu.matmul %518, %259, %cst_135 {dimension_numbers = #tpu.dot_dimension_numbers<[1], [0], [0], [1], [0, 0, 1, 1], [], []>} : vector<2x32xf32>, vector<32x50xf32>, vector<2x50xf32> -> vector<2x50xf32>
    %520 = arith.addf %519, %263 : vector<2x50xf32>
    %521 = math.tanh %520 : vector<2x50xf32>
    %cst_136 = arith.constant dense<0.000000e+00> : vector<2x32xf32>
    %522 = tpu.matmul %521, %260, %cst_136 {dimension_numbers = #tpu.dot_dimension_numbers<[1], [0], [0], [1], [0, 0, 1, 1], [], []>} : vector<2x50xf32>, vector<50x32xf32>, vector<2x32xf32> -> vector<2x32xf32>
    %523 = arith.addf %522, %266 : vector<2x32xf32>
    %524 = arith.subf %502, %512 : vector<2x32xf32>
    %525 = arith.addf %524, %523 : vector<2x32xf32>
    %526 = vector.broadcast %497 : f32 to vector<2x32xf32>
    %527 = arith.mulf %526, %525 : vector<2x32xf32>
    %528 = arith.addf %496, %527 : vector<2x32xf32>
    %cst_137 = arith.constant dense<0.000000e+00> : vector<2x50xf32>
    %529 = tpu.matmul %528, %259, %cst_137 {dimension_numbers = #tpu.dot_dimension_numbers<[1], [0], [0], [1], [0, 0, 1, 1], [], []>} : vector<2x32xf32>, vector<32x50xf32>, vector<2x50xf32> -> vector<2x50xf32>
    %530 = arith.addf %529, %263 : vector<2x50xf32>
    %531 = math.tanh %530 : vector<2x50xf32>
    %cst_138 = arith.constant dense<0.000000e+00> : vector<2x32xf32>
    %532 = tpu.matmul %531, %260, %cst_138 {dimension_numbers = #tpu.dot_dimension_numbers<[1], [0], [0], [1], [0, 0, 1, 1], [], []>} : vector<2x50xf32>, vector<50x32xf32>, vector<2x32xf32> -> vector<2x32xf32>
    %533 = arith.addf %532, %266 : vector<2x32xf32>
    %534 = arith.addf %512, %523 : vector<2x32xf32>
    %cst_139 = arith.constant 3.000000e+00 : f32
    %535 = vector.broadcast %cst_139 : f32 to vector<2x32xf32>
    %536 = arith.mulf %535, %534 : vector<2x32xf32>
    %537 = arith.addf %502, %536 : vector<2x32xf32>
    %538 = arith.addf %537, %533 : vector<2x32xf32>
    %cst_140 = arith.constant 1.250000e-01 : f32
    %539 = arith.mulf %497, %cst_140 : f32
    %540 = vector.broadcast %539 : f32 to vector<2x32xf32>
    %541 = arith.mulf %538, %540 : vector<2x32xf32>
    %542 = arith.addf %496, %541 : vector<2x32xf32>
    %c6 = arith.constant 6 : index
    %543 = memref.load %arg1[%c6] : memref<7xf32, #tpu.memory_space<smem>>
    %cst_141 = arith.constant dense<0.000000e+00> : vector<2x50xf32>
    %544 = tpu.matmul %542, %259, %cst_141 {dimension_numbers = #tpu.dot_dimension_numbers<[1], [0], [0], [1], [0, 0, 1, 1], [], []>} : vector<2x32xf32>, vector<32x50xf32>, vector<2x50xf32> -> vector<2x50xf32>
    %545 = arith.addf %544, %263 : vector<2x50xf32>
    %546 = math.tanh %545 : vector<2x50xf32>
    %cst_142 = arith.constant dense<0.000000e+00> : vector<2x32xf32>
    %547 = tpu.matmul %546, %260, %cst_142 {dimension_numbers = #tpu.dot_dimension_numbers<[1], [0], [0], [1], [0, 0, 1, 1], [], []>} : vector<2x50xf32>, vector<50x32xf32>, vector<2x32xf32> -> vector<2x32xf32>
    %548 = arith.addf %547, %266 : vector<2x32xf32>
    %549 = vector.broadcast %543 : f32 to vector<2x32xf32>
    %550 = arith.mulf %549, %548 : vector<2x32xf32>
    %cst_143 = arith.constant 0.333333343 : f32
    %551 = vector.broadcast %cst_143 : f32 to vector<2x32xf32>
    %552 = arith.mulf %550, %551 : vector<2x32xf32>
    %553 = arith.addf %542, %552 : vector<2x32xf32>
    %cst_144 = arith.constant dense<0.000000e+00> : vector<2x50xf32>
    %554 = tpu.matmul %553, %259, %cst_144 {dimension_numbers = #tpu.dot_dimension_numbers<[1], [0], [0], [1], [0, 0, 1, 1], [], []>} : vector<2x32xf32>, vector<32x50xf32>, vector<2x50xf32> -> vector<2x50xf32>
    %555 = arith.addf %554, %263 : vector<2x50xf32>
    %556 = math.tanh %555 : vector<2x50xf32>
    %cst_145 = arith.constant dense<0.000000e+00> : vector<2x32xf32>
    %557 = tpu.matmul %556, %260, %cst_145 {dimension_numbers = #tpu.dot_dimension_numbers<[1], [0], [0], [1], [0, 0, 1, 1], [], []>} : vector<2x50xf32>, vector<50x32xf32>, vector<2x32xf32> -> vector<2x32xf32>
    %558 = arith.addf %557, %266 : vector<2x32xf32>
    %cst_146 = arith.constant 0.333333343 : f32
    %559 = vector.broadcast %cst_146 : f32 to vector<2x32xf32>
    %560 = arith.mulf %548, %559 : vector<2x32xf32>
    %561 = arith.subf %558, %560 : vector<2x32xf32>
    %562 = vector.broadcast %543 : f32 to vector<2x32xf32>
    %563 = arith.mulf %562, %561 : vector<2x32xf32>
    %564 = arith.addf %542, %563 : vector<2x32xf32>
    %cst_147 = arith.constant dense<0.000000e+00> : vector<2x50xf32>
    %565 = tpu.matmul %564, %259, %cst_147 {dimension_numbers = #tpu.dot_dimension_numbers<[1], [0], [0], [1], [0, 0, 1, 1], [], []>} : vector<2x32xf32>, vector<32x50xf32>, vector<2x50xf32> -> vector<2x50xf32>
    %566 = arith.addf %565, %263 : vector<2x50xf32>
    %567 = math.tanh %566 : vector<2x50xf32>
    %cst_148 = arith.constant dense<0.000000e+00> : vector<2x32xf32>
    %568 = tpu.matmul %567, %260, %cst_148 {dimension_numbers = #tpu.dot_dimension_numbers<[1], [0], [0], [1], [0, 0, 1, 1], [], []>} : vector<2x50xf32>, vector<50x32xf32>, vector<2x32xf32> -> vector<2x32xf32>
    %569 = arith.addf %568, %266 : vector<2x32xf32>
    %570 = arith.subf %548, %558 : vector<2x32xf32>
    %571 = arith.addf %570, %569 : vector<2x32xf32>
    %572 = vector.broadcast %543 : f32 to vector<2x32xf32>
    %573 = arith.mulf %572, %571 : vector<2x32xf32>
    %574 = arith.addf %542, %573 : vector<2x32xf32>
    %cst_149 = arith.constant dense<0.000000e+00> : vector<2x50xf32>
    %575 = tpu.matmul %574, %259, %cst_149 {dimension_numbers = #tpu.dot_dimension_numbers<[1], [0], [0], [1], [0, 0, 1, 1], [], []>} : vector<2x32xf32>, vector<32x50xf32>, vector<2x50xf32> -> vector<2x50xf32>
    %576 = arith.addf %575, %263 : vector<2x50xf32>
    %577 = math.tanh %576 : vector<2x50xf32>
    %cst_150 = arith.constant dense<0.000000e+00> : vector<2x32xf32>
    %578 = tpu.matmul %577, %260, %cst_150 {dimension_numbers = #tpu.dot_dimension_numbers<[1], [0], [0], [1], [0, 0, 1, 1], [], []>} : vector<2x50xf32>, vector<50x32xf32>, vector<2x32xf32> -> vector<2x32xf32>
    %579 = arith.addf %578, %266 : vector<2x32xf32>
    %580 = arith.addf %558, %569 : vector<2x32xf32>
    %cst_151 = arith.constant 3.000000e+00 : f32
    %581 = vector.broadcast %cst_151 : f32 to vector<2x32xf32>
    %582 = arith.mulf %581, %580 : vector<2x32xf32>
    %583 = arith.addf %548, %582 : vector<2x32xf32>
    %584 = arith.addf %583, %579 : vector<2x32xf32>
    %cst_152 = arith.constant 1.250000e-01 : f32
    %585 = arith.mulf %543, %cst_152 : f32
    %586 = vector.broadcast %585 : f32 to vector<2x32xf32>
    %587 = arith.mulf %584, %586 : vector<2x32xf32>
    %588 = arith.addf %542, %587 : vector<2x32xf32>
    %589 = tpu.concatenate %258, %312, %358, %404, %450, %496, %542, %588 in 0 : vector<2x32xf32>, vector<2x32xf32>, vector<2x32xf32>, vector<2x32xf32>, vector<2x32xf32>, vector<2x32xf32>, vector<2x32xf32>, vector<2x32xf32> -> vector<16x32xf32>
    %c0_153 = arith.constant 0 : index
    %c0_154 = arith.constant 0 : index
    %590 = vector.load %arg17[%c0_153, %c0_154] : memref<32x4xf32, #tpu.memory_space<vmem>>, vector<32x4xf32>
    %cst_155 = arith.constant dense<0.000000e+00> : vector<16x4xf32>
    %591 = tpu.matmul %589, %590, %cst_155 {dimension_numbers = #tpu.dot_dimension_numbers<[1], [0], [0], [1], [0, 0, 1, 1], [], []>} : vector<16x32xf32>, vector<32x4xf32>, vector<16x4xf32> -> vector<16x4xf32>
    %c0_156 = arith.constant 0 : index
    %c0_157 = arith.constant 0 : index
    %592 = vector.load %arg18[%c0_156, %c0_157] : memref<1x4xf32, #tpu.memory_space<vmem>>, vector<1x4xf32>
    %593 = vector.broadcast %592 : vector<1x4xf32> to vector<16x4xf32>
    %594 = arith.addf %591, %593 : vector<16x4xf32>
    %c0_158 = arith.constant 0 : index
    %c0_159 = arith.constant 0 : index
    %595 = vector.load %arg19[%c0_158, %c0_159] : memref<16x4xf32, #tpu.memory_space<vmem>>, vector<16x4xf32>
    tpu.vector_store %arg19[%c0_158, %c0_159], %594 {strides = array<i32>} : memref<16x4xf32, #tpu.memory_space<vmem>>, vector<16x4xf32>,
    return
  }
}

</mosaic_0001>

<bundles_post_ra>
// kernel: tpu_custom_call.1
= control target key start
LH: loop header
LB: loop body
LE: loop exit
PB: predicated region body
PF: predicated region fallthrough
CT: control target
= control target key end

     0   :  { %s9061_s0 = inlined_call_operand.vmem [shape: f32[8,2,4], index: 0, kind: input, shape index: {}]   ;;  %s9062_s1 = inlined_call_operand.vmem [shape: f32[7], index: 1, kind: input, shape index: {}]   ;;  %s9063_s2 = inlined_call_operand.vmem [shape: f32[2,32], index: 2, kind: input, shape index: {}]   ;;  %s9064_s3 = inlined_call_operand.vmem [shape: f32[4,96], index: 3, kind: input, shape index: {}]   ;;  %s9065_s4 = inlined_call_operand.vmem [shape: f32[1,96], index: 4, kind: input, shape index: {}]   ;;  %s9066_s5 = inlined_call_operand.vmem [shape: f32[32,96], index: 5, kind: input, shape index: {}]   ;;  %s9067_s6 = inlined_call_operand.vmem [shape: f32[1,32], index: 6, kind: input, shape index: {}]   ;;  %s9068_s7 = inlined_call_operand.vmem [shape: f32[32,50], index: 7, kind: input, shape index: {}]   ;;  %s9069_s8 = inlined_call_operand.vmem [shape: f32[1,50], index: 8, kind: input, shape index: {}]   ;;  %s9070_s9 = inlined_call_operand.vmem [shape: f32[50,32], index: 9, kind: input, shape index: {}]   ;;  %s9071_s10 = inlined_call_operand.vmem [shape: f32[1,32], index: 10, kind: input, shape index: {}]   ;;  %s9072_s11 = inlined_call_operand.vmem [shape: f32[50,32], index: 11, kind: input, shape index: {}]   ;;  %s9073_s12 = inlined_call_operand.vmem [shape: f32[1,32], index: 12, kind: input, shape index: {}]   ;;  %s9074_s13 = inlined_call_operand.vmem [shape: f32[32,50], index: 13, kind: input, shape index: {}]   ;;  %s9075_s14 = inlined_call_operand.vmem [shape: f32[1,50], index: 14, kind: input, shape index: {}]   ;;  %s9076_s15 = inlined_call_operand.vmem [shape: f32[50,32], index: 15, kind: input, shape index: {}]   ;;  %s9077_s16 = inlined_call_operand.vmem [shape: f32[1,32], index: 16, kind: input, shape index: {}]   ;;  %s9078_s17 = inlined_call_operand.vmem [shape: f32[32,4], index: 17, kind: input, shape index: {}]   ;;  %s9079_s18 = inlined_call_operand.vmem [shape: f32[1,4], index: 18, kind: input, shape index: {}]   ;;  %s9080_s19 = inlined_call_operand.vmem [shape: f32[16,4], index: 19, kind: output, shape index: {}]  }
   0x1   :  { %9082 = sst [smem:[#allocation5_spill]] %s9061_s0 }
   0x2   :  { %9083 = sst [smem:[#allocation6_spill]] %s9062_s1 }
   0x3   :  { %9084 = sst [smem:[#allocation7_spill]] %s9063_s2 }
   0x4   :  { %9085 = sst [smem:[#allocation8_spill]] %s9064_s3 }
   0x5   :  { %24 = vsyncpa [#allocation3], 0  ;;  %s9086_s20 = sld [smem:[#allocation6_spill]] }
   0xb   :  { %s33_s21 = sshll.u32 %s9086_s20, 4  ;;  %s34_s21 = int_to_ptr.vmem [resolvable:$true] %s33_s21 }
   0xc   :  { %s7392_s1 = scalar_lea.vmem %s34_s21, 16  ;;  %p7397_p1 = scmp.lt.s32.totalorder %s34_s21, %s34_s21 }
   0xd   :  { %p7393_p0 = scmp.ne.s32.totalorder %s34_s21, %s7392_s1  ;;  %p7398_p2 = scmp.lt.s32.totalorder %s7392_s1, %s7392_s1 }
   0xf   :  { %p7399_p3 = por %p7398_p2, %p7397_p1 }
  0x11   :  { %p7400_p4 = pnand %p7399_p3, %p7393_p0 }
  0x13   :  { %7403 = shalt.err (!%p7400_p4)
}
  0x14   :  { %s7406_s22 = smov [#allocation2]  }
  0x15   :  { %36 = dma.vmem_to_smem %s34_s21, 16, %s7406_s22, [#allocation3]  }
  0x16   :  { %7404 = dma.done.wait [#allocation3], 16  }
  0x17   :  { %7405 = vsyncadd [#allocation3], 4294967280 }
  0x18   :  { %74 = sfence }
  0x19   :  { %v7518_v0 = vld [vmem:[%s9066_s5 + $0x18] sm:$0xff]  ;;  %v7523_v1 = vld [vmem:[%s9066_s5 + $0x10] sm:$0xff]  ;;  %vm138_vm0 = vcmask 1043456   ;;  %v104_v2 = vlaneseq  ;;  %v7407_v3 = vmov 0.0   ;;  %v7529_v4 = vld [vmem:[%s9066_s5 + $0x8] sm:$0xff]  ;;  %vm7408_vm1 = vmmov 0  }
  0x1a   :  { %6330 = vmatprep.subr.mxu1 %v7407_v3  ;;  %6338 = vmatprep.mubr.msk.f32.mxu1 %vm7408_vm1, %v7407_v3  ;;  %s9087_s29 = sld [smem:[#allocation8_spill]]  ;;  %v7409_v12 = vmov 1983009808   ;;  %v7570_v17 = vld [vmem:[%s9066_s5] sm:$0xff]  ;;  %vm133_vm2 = vcmask 31744   ;;  %vm227_vm3 = vcmask 261120  }
  0x1b   :  { %s9088_s20 = sld [smem:[#allocation5_spill]]  ;;  %6331 = vmatpush3.msra.mxu1 %v7518_v0  ;;  %v105_v10 = vshrl.u32 %v104_v2, 7  ;;  %v102_v13 = vunpack.c.l.s4 %v7409_v12  ;;  %v5772_v19 = vld [vmem:[%s9067_s6] ss:$0 sm:$0xff]  ;;  %vm1193_vm4 = vcmask 1041408   ;;  %vm1189_vm5 = vcmask 408576  }
  0x1c   :  { %6332 = vmatprep.subr.mxu1 %v7407_v3  ;;  %v5768_v36 = vld [vmem:[%s9065_s4] ss:$0 sm:$0xff]  ;;  %s7411_s4 = smov 96   ;;  %s9089_s21 = sld [smem:[#allocation7_spill]]  ;;  %vm5664_vm6 = vcmask 1045504  }
  0x1d   :  { %6333 = vmatpush3.msra.mxu1 %v7523_v1  ;;  %v103_v21 = vunpack.c.0.s8 %v102_v13  ;;  %s7933_s26 = sld [smem:[#allocation2]] }
  0x1e   :  { %6334 = vmatprep.subr.mxu1 %v7407_v3  ;;  %s8240_s30 = sld [smem:[#allocation2 + $0x2]] }
  0x1f   :  { %6335 = vmatpush3.msra.mxu1 %v7529_v4  ;;  %v106_v24 = vsub.s32 %v103_v21, %v105_v10  ;;  %s8607_s22 = sld [smem:[#allocation2 + $0x4]] }
  0x20   :  { %v83_v5 = vld [vmem:[%s9087_s29] sm:$0xf]  ;;  %6336 = vmatprep.subr.mxu1 %v7407_v3  ;;  %s8909_s6 = sld [smem:[#allocation2 + $0x6]] }
  0x21   :  { %v75_v6 = vld [vmem:[%s9088_s20] sm:$0x3]  ;;  %6325 = vmatprep.subr.msk.mxu0 %vm138_vm0, %v83_v5  ;;  %v76_v7 = vld [vmem:[%s9088_s20 + $0x2] sm:$0x3]  ;;  %v77_v8 = vld [vmem:[%s9088_s20 + $0x4] sm:$0x3]  ;;  %6337 = vmatpush3.msra.mxu1 %v7570_v17 }
  0x22   :  { %v78_v9 = vld [vmem:[%s9088_s20 + $0x6] sm:$0x3]  ;;  %6326 = vmatpush3.msk.msra.mxu0 %vm138_vm0, %v83_v5  ;;  %v79_v11 = vld [vmem:[%s9088_s20 + $0x8] sm:$0x3]  ;;  %v80_v14 = vld [vmem:[%s9088_s20 + $0xa] sm:$0x3]  ;;  %v99_v18 = vcombine.low %v75_v6, %v76_v7  ;;  %6339 = vmatmul.mubr.f32.vlgmr.msra.gmra.mxu1 %v7407_v3 }
  0x23   :  { %v81_v15 = vld [vmem:[%s9088_s20 + $0xc] sm:$0x3]  ;;  %v82_v16 = vld [vmem:[%s9088_s20 + $0xe] sm:$0x3]  ;;  %6341 = vmatprep.subr.mxu0 %v7407_v3  ;;  %v100_v20 = vcombine.low %v77_v8, %v78_v9  ;;  %v116_v22 = vcombine.low %v79_v11, %v80_v14  ;;  %s7410_s20 = smov 64   ;;  %6352 = vmatprep.subr.mxu1 %v7407_v3  ;;  %s1991_s29 = smul.f32 0.125, %s7933_s26 }
  0x24   :  { %v117_v23 = vcombine.low %v81_v15, %v82_v16  ;;  %308 = vrot.lane.b32.xlu0 %v5772_v19, %s7410_s20  ;;  %v107_v25 = vrot.slane %v99_v18, %v106_v24  ;;  %6353 = vmatpush3.msra.mxu1 %v7518_v0 }
  0x25   :  { %v114_v26 = vrot.slane %v100_v20, %v106_v24  ;;  %v124_v27 = vrot.slane %v116_v22, %v106_v24  ;;  %6354 = vmatprep.subr.mxu1 %v7407_v3  ;;  %6360 = vmatprep.mubr.msk.f32.mxu1 %vm7408_vm1, %v7407_v3  ;;  %s4427_s2 = smul.f32 0.125, %s8607_s22 }
  0x26   :  { %v131_v28 = vrot.slane %v117_v23, %v106_v24  ;;  %6355 = vmatpush3.msra.mxu1 %v7523_v1 }
  0x27   :  { %v115_v29 = vcombine.low %v107_v25, %v114_v26  ;;  %6356 = vmatprep.subr.mxu1 %v7407_v3 }
  0x28   :  { %v132_v30 = vcombine.low %v124_v27, %v131_v28  ;;  %6357 = vmatpush3.msra.mxu1 %v7529_v4 }
  0x29   :  { %6327 = vmatprep.mubr.msk.f32.mxu0 %vm133_vm2, %v115_v29  ;;  %6358 = vmatprep.subr.mxu1 %v7407_v3 }
  0x2a   :  { %6328 = vmatmul.mubr.msk.f32.vlgmr.msra.gmra.mxu0 %vm133_vm2, %v132_v30  ;;  %6359 = vmatpush3.msra.mxu1 %v7570_v17 }
  0x2b   :  { %6342 = vmatpush3.msra.mxu0 %v7518_v0  ;;  %6349 = vmatprep.mubr.msk.f32.mxu0 %vm7408_vm1, %v7407_v3 }
  0x2c   :  { %6343 = vmatprep.subr.mxu0 %v7407_v3  ;;  %6374 = vmatprep.subr.mxu1 %v7407_v3 }
  0x2d   :  { %6344 = vmatpush3.msra.mxu0 %v7523_v1 }
  0x2e   :  { %6345 = vmatprep.subr.mxu0 %v7407_v3 }
  0x2f   :  { %6346 = vmatpush3.msra.mxu0 %v7529_v4 }
  0x30   :  { %6347 = vmatprep.subr.mxu0 %v7407_v3 }
  0x31   :  { %6348 = vmatpush3.msra.mxu0 %v7570_v17 }
  0x32   :  { %6363 = vmatprep.subr.mxu0 %v7407_v3 }
  0x96   :  { %v7603_v31 = vpop.permute.xlu0 %308 }
  0xe2   :  { %v297_v32 = vpop.f32.mrf.mxu1 }
  0xe3   :  { %v311_v33 = vadd.f32 %v7603_v31, %v297_v32 }
  0xe4   :  { %v6340_v34 = vpop.f32.mrf.mxu1 }
  0xe5   :  { %313 = vrot.lane.b32.xlu0 %v311_v33, %s7410_s20 }
  0xea   :  { %v6329_v35 = vpop.f32.mrf.mxu0 }
  0xeb   :  { %v7610_v37 = vadd.f32 %v6329_v35, %v5768_v36 }
  0xec   :  { %v208_v38 = vpop.f32.mrf.mxu0 }
  0xed   :  { %v7612_v39 = vadd.f32 %v5768_v36, %v208_v38 }
  0xef   :  { %v301_v40 = vadd.f32 %v297_v32, %v7612_v39 }
  0xf1   :  { %v5773_v41 = vmul.f32 -1.442695, %v301_v40 }
  0xf3   :  { %7264 = vpow2.f32 %v5773_v41 }
 0x100   :  { %v7265_v42 = vpop.eup %7264 }
 0x101   :  { %v305_v43 = vadd.f32 1.0, %v7265_v42 }
 0x103   :  { %7266 = vrcp.f32 %v305_v43 }
 0x110   :  { %v7267_v44 = vpop.eup %7266 }
 0x111   :  { %v323_v50 = vsub.f32 1.0, %v7267_v44  ;;  %v329_v52 = vmul.f32 0.0, %v7267_v44 }
 0x157   :  { %v314_v45 = vpop.permute.xlu0 %313 }
 0x158   :  { %v316_v46 = vmul.f32 %v7267_v44, %v314_v45 }
 0x15a   :  { %318 = vrot.lane.b32.xlu1 %v316_v46, %s7410_s20 }
 0x1cc   :  { %v319_v47 = vpop.permute.xlu1 %318 }
 0x1cd   :  { %v321_v48 = vadd.f32 %v319_v47, %v7612_v39 }
 0x1cf   :  { %7268 = vtanh.f32 %v321_v48 }
 0x1dc   :  { %v7269_v49 = vpop.eup %7268 }
 0x1dd   :  { %325 = vrot.lane.b32.xlu1 %v7269_v49, %s7411_s4 }
 0x24f   :  { %v326_v51 = vpop.permute.xlu1 %325 }
 0x250   :  { %v328_v53 = vmul.f32 %v326_v51, %v323_v50 }
 0x252   :  { %v330_v54 = vadd.f32 %v329_v52, %v328_v53 }
 0x254   :  { %332 = vrot.lane.b32.xlu0 %v330_v54, %s7411_s4  ;;  %v435_v11 = vrot.slane %v330_v54, 6 }
 0x2c6   :  { %v333_v55 = vpop.permute.xlu0 %332 }
 0x2c7   :  { %6350 = vmatmul.mubr.msk.f32.vlgmr.msra.gmra.mxu0 %vm227_vm3, %v333_v55 }
 0x2c8   :  { %6364 = vmatpush3.msra.mxu0 %v7518_v0  ;;  %6371 = vmatprep.mubr.msk.f32.mxu0 %vm7408_vm1, %v7407_v3 }
 0x2c9   :  { %6365 = vmatprep.subr.mxu0 %v7407_v3 }
 0x2ca   :  { %6366 = vmatpush3.msra.mxu0 %v7523_v1 }
 0x2cb   :  { %6367 = vmatprep.subr.mxu0 %v7407_v3 }
 0x2cc   :  { %6368 = vmatpush3.msra.mxu0 %v7529_v4 }
 0x2cd   :  { %6369 = vmatprep.subr.mxu0 %v7407_v3 }
 0x2ce   :  { %6370 = vmatpush3.msra.mxu0 %v7570_v17 }
 0x2cf   :  { %6385 = vmatprep.subr.mxu0 %v7407_v3 }
 0x387   :  { %v402_v56 = vpop.f32.mrf.mxu0 }
 0x388   :  { %v416_v57 = vadd.f32 %v402_v56, %v7603_v31  ;;  %v407_v60 = vrot.slane %v402_v56, 6 }
 0x389   :  { %v6351_v58 = vpop.f32.mrf.mxu0 }
 0x38a   :  { %v418_v59 = vrot.slane %v416_v57, 6  ;;  %v409_v61 = vadd.f32 %v407_v60, %v7612_v39 }
 0x38c   :  { %419 = vrot.lane.b32.xlu1 %v418_v59, %s7410_s20  ;;  %v5775_v62 = vmul.f32 -1.442695, %v409_v61 }
 0x38e   :  { %7270 = vpow2.f32 %v5775_v62 }
 0x39b   :  { %v7271_v63 = vpop.eup %7270 }
 0x39c   :  { %v413_v2 = vadd.f32 1.0, %v7271_v63 }
 0x39e   :  { %7272 = vrcp.f32 %v413_v2 }
 0x3ab   :  { %v7273_v5 = vpop.eup %7272 }
 0x3ac   :  { %v429_v12 = vsub.f32 1.0, %v7273_v5  ;;  %v437_v15 = vmul.f32 %v7273_v5, %v435_v11 }
 0x3fe   :  { %v420_v6 = vpop.permute.xlu1 %419 }
 0x3ff   :  { %v422_v7 = vmul.f32 %v7273_v5, %v420_v6 }
 0x401   :  { %424 = vrot.lane.b32.xlu0 %v422_v7, %s7410_s20 }
 0x473   :  { %v425_v8 = vpop.permute.xlu0 %424 }
 0x474   :  { %v427_v9 = vadd.f32 %v425_v8, %v7612_v39 }
 0x476   :  { %7274 = vtanh.f32 %v427_v9 }
 0x483   :  { %v7275_v10 = vpop.eup %7274 }
 0x484   :  { %431 = vrot.lane.b32.xlu1 %v7275_v10, %s7411_s4 }
 0x4f6   :  { %v432_v13 = vpop.permute.xlu1 %431 }
 0x4f7   :  { %v434_v14 = vmul.f32 %v432_v13, %v429_v12 }
 0x4f9   :  { %v438_v16 = vadd.f32 %v437_v15, %v434_v14 }
 0x4fb   :  { %v440_v18 = vrot.slane %v438_v16, 2  ;;  %v544_v36 = vrot.slane %v438_v16, 6 }
 0x4fd   :  { %441 = vrot.lane.b32.xlu0 %v440_v18, %s7411_s4 }
 0x56f   :  { %v442_v19 = vpop.permute.xlu0 %441 }
 0x570   :  { %6361 = vmatmul.mubr.msk.f32.vlgmr.msra.gmra.mxu1 %vm227_vm3, %v442_v19 }
 0x571   :  { %6375 = vmatpush3.msra.mxu1 %v7518_v0  ;;  %6382 = vmatprep.mubr.msk.f32.mxu1 %vm7408_vm1, %v7407_v3 }
 0x572   :  { %6376 = vmatprep.subr.mxu1 %v7407_v3 }
 0x573   :  { %6377 = vmatpush3.msra.mxu1 %v7523_v1 }
 0x574   :  { %6378 = vmatprep.subr.mxu1 %v7407_v3 }
 0x575   :  { %6379 = vmatpush3.msra.mxu1 %v7529_v4 }
 0x576   :  { %6380 = vmatprep.subr.mxu1 %v7407_v3 }
 0x577   :  { %6381 = vmatpush3.msra.mxu1 %v7570_v17 }
 0x578   :  { %6396 = vmatprep.subr.mxu1 %v7407_v3 }
 0x630   :  { %v511_v20 = vpop.f32.mrf.mxu1 }
 0x631   :  { %v525_v21 = vadd.f32 %v511_v20, %v7603_v31  ;;  %v516_v24 = vrot.slane %v511_v20, 4 }
 0x632   :  { %v6362_v22 = vpop.f32.mrf.mxu1 }
 0x633   :  { %v527_v23 = vrot.slane %v525_v21, 4  ;;  %v518_v25 = vadd.f32 %v516_v24, %v7612_v39 }
 0x635   :  { %528 = vrot.lane.b32.xlu1 %v527_v23, %s7410_s20  ;;  %v5777_v26 = vmul.f32 -1.442695, %v518_v25 }
 0x637   :  { %7276 = vpow2.f32 %v5777_v26 }
 0x644   :  { %v7277_v27 = vpop.eup %7276 }
 0x645   :  { %v522_v28 = vadd.f32 1.0, %v7277_v27 }
 0x647   :  { %7278 = vrcp.f32 %v522_v28 }
 0x654   :  { %v7279_v29 = vpop.eup %7278 }
 0x655   :  { %v538_v38 = vsub.f32 1.0, %v7279_v29  ;;  %v546_v41 = vmul.f32 %v7279_v29, %v544_v36 }
 0x6a7   :  { %v529_v30 = vpop.permute.xlu1 %528 }
 0x6a8   :  { %v531_v32 = vmul.f32 %v7279_v29, %v529_v30 }
 0x6aa   :  { %533 = vrot.lane.b32.xlu0 %v531_v32, %s7410_s20 }
 0x71c   :  { %v534_v33 = vpop.permute.xlu0 %533 }
 0x71d   :  { %v536_v34 = vadd.f32 %v534_v33, %v7612_v39 }
 0x71f   :  { %7280 = vtanh.f32 %v536_v34 }
 0x72c   :  { %v7281_v35 = vpop.eup %7280 }
 0x72d   :  { %540 = vrot.lane.b32.xlu1 %v7281_v35, %s7411_s4 }
 0x79f   :  { %v541_v40 = vpop.permute.xlu1 %540 }
 0x7a0   :  { %v543_v42 = vmul.f32 %v541_v40, %v538_v38 }
 0x7a2   :  { %v547_v43 = vadd.f32 %v546_v41, %v543_v42 }
 0x7a4   :  { %v549_v44 = vrot.slane %v547_v43, 4  ;;  %v653_v61 = vrot.slane %v547_v43, 6 }
 0x7a6   :  { %550 = vrot.lane.b32.xlu0 %v549_v44, %s7411_s4 }
 0x818   :  { %v551_v45 = vpop.permute.xlu0 %550 }
 0x819   :  { %6372 = vmatmul.mubr.msk.f32.vlgmr.msra.gmra.mxu0 %vm227_vm3, %v551_v45 }
 0x81a   :  { %6386 = vmatpush3.msra.mxu0 %v7518_v0  ;;  %6393 = vmatprep.mubr.msk.f32.mxu0 %vm7408_vm1, %v7407_v3 }
 0x81b   :  { %6387 = vmatprep.subr.mxu0 %v7407_v3 }
 0x81c   :  { %6388 = vmatpush3.msra.mxu0 %v7523_v1 }
 0x81d   :  { %6389 = vmatprep.subr.mxu0 %v7407_v3 }
 0x81e   :  { %6390 = vmatpush3.msra.mxu0 %v7529_v4 }
 0x81f   :  { %6391 = vmatprep.subr.mxu0 %v7407_v3 }
 0x820   :  { %6392 = vmatpush3.msra.mxu0 %v7570_v17 }
 0x821   :  { %6407 = vmatprep.subr.mxu0 %v7407_v3 }
 0x8d9   :  { %v620_v46 = vpop.f32.mrf.mxu0 }
 0x8da   :  { %v634_v47 = vadd.f32 %v620_v46, %v7603_v31  ;;  %v625_v50 = vrot.slane %v620_v46, 2 }
 0x8db   :  { %v6373_v48 = vpop.f32.mrf.mxu0 }
 0x8dc   :  { %v636_v49 = vrot.slane %v634_v47, 2  ;;  %v627_v51 = vadd.f32 %v625_v50, %v7612_v39 }
 0x8de   :  { %637 = vrot.lane.b32.xlu1 %v636_v49, %s7410_s20  ;;  %v5779_v52 = vmul.f32 -1.442695, %v627_v51 }
 0x8e0   :  { %7282 = vpow2.f32 %v5779_v52 }
 0x8ed   :  { %v7283_v53 = vpop.eup %7282 }
 0x8ee   :  { %v631_v54 = vadd.f32 1.0, %v7283_v53 }
 0x8f0   :  { %7284 = vrcp.f32 %v631_v54 }
 0x8fd   :  { %v7285_v55 = vpop.eup %7284 }
 0x8fe   :  { %v647_v62 = vsub.f32 1.0, %v7285_v55  ;;  %v655_v2 = vmul.f32 %v7285_v55, %v653_v61 }
 0x950   :  { %v638_v56 = vpop.permute.xlu1 %637 }
 0x951   :  { %v640_v57 = vmul.f32 %v7285_v55, %v638_v56 }
 0x953   :  { %642 = vrot.lane.b32.xlu0 %v640_v57, %s7410_s20 }
 0x9c5   :  { %v643_v58 = vpop.permute.xlu0 %642 }
 0x9c6   :  { %v645_v59 = vadd.f32 %v643_v58, %v7612_v39 }
 0x9c8   :  { %7286 = vtanh.f32 %v645_v59 }
 0x9d5   :  { %v7287_v60 = vpop.eup %7286 }
 0x9d6   :  { %649 = vrot.lane.b32.xlu1 %v7287_v60, %s7411_s4 }
 0xa48   :  { %v650_v63 = vpop.permute.xlu1 %649 }
 0xa49   :  { %v652_v5 = vmul.f32 %v650_v63, %v647_v62 }
 0xa4b   :  { %v656_v6 = vadd.f32 %v655_v2, %v652_v5 }
 0xa4d   :  { %v658_v7 = vrot.slane %v656_v6, 6 }
 0xa4f   :  { %659 = vrot.lane.b32.xlu0 %v658_v7, %s7411_s4 }
 0xac1   :  { %v660_v8 = vpop.permute.xlu0 %659 }
 0xac2   :  { %6383 = vmatmul.mubr.msk.f32.vlgmr.msra.gmra.mxu1 %vm227_vm3, %v660_v8 }
 0xac3   :  { %6397 = vmatpush3.msra.mxu1 %v7518_v0  ;;  %6404 = vmatprep.mubr.msk.f32.mxu1 %vm7408_vm1, %v7407_v3 }
 0xac4   :  { %6398 = vmatprep.subr.mxu1 %v7407_v3 }
 0xac5   :  { %6399 = vmatpush3.msra.mxu1 %v7523_v1 }
 0xac6   :  { %6400 = vmatprep.subr.mxu1 %v7407_v3 }
 0xac7   :  { %6401 = vmatpush3.msra.mxu1 %v7529_v4 }
 0xac8   :  { %6402 = vmatprep.subr.mxu1 %v7407_v3 }
 0xac9   :  { %6403 = vmatpush3.msra.mxu1 %v7570_v17 }
 0xaca   :  { %6418 = vmatprep.subr.mxu1 %v7407_v3 }
 0xb82   :  { %v729_v39 = vpop.f32.mrf.mxu1 }
 0xb83   :  { %v740_v9 = vadd.f32 %v729_v39, %v7603_v31  ;;  %v733_v11 = vadd.f32 %v729_v39, %v7610_v37 }
 0xb84   :  { %v6384_v10 = vpop.f32.mrf.mxu1 }
 0xb85   :  { %742 = vrot.lane.b32.xlu1 %v740_v9, %s7410_s20  ;;  %v5781_v12 = vmul.f32 -1.442695, %v733_v11 }
 0xb87   :  { %7288 = vpow2.f32 %v5781_v12 }
 0xb94   :  { %v7289_v13 = vpop.eup %7288 }
 0xb95   :  { %v737_v14 = vadd.f32 1.0, %v7289_v13 }
 0xb97   :  { %7290 = vrcp.f32 %v737_v14 }
 0xba4   :  { %v7291_v15 = vpop.eup %7290 }
 0xba5   :  { %v752_v22 = vsub.f32 1.0, %v7291_v15  ;;  %v759_v24 = vmul.f32 %v7291_v15, %v658_v7 }
 0xbf7   :  { %v743_v16 = vpop.permute.xlu1 %742 }
 0xbf8   :  { %v745_v18 = vmul.f32 %v7291_v15, %v743_v16 }
 0xbfa   :  { %747 = vrot.lane.b32.xlu0 %v745_v18, %s7410_s20 }
 0xc6c   :  { %v748_v19 = vpop.permute.xlu0 %747 }
 0xc6d   :  { %v750_v20 = vadd.f32 %v748_v19, %v7610_v37 }
 0xc6f   :  { %7292 = vtanh.f32 %v750_v20 }
 0xc7c   :  { %v7293_v21 = vpop.eup %7292 }
 0xc7d   :  { %754 = vrot.lane.b32.xlu1 %v7293_v21, %s7411_s4 }
 0xcef   :  { %v755_v23 = vpop.permute.xlu1 %754 }
 0xcf0   :  { %v757_v25 = vmul.f32 %v755_v23, %v752_v22 }
 0xcf2   :  { %v760_v26 = vadd.f32 %v759_v24, %v757_v25 }
 0xcf4   :  { %762 = vrot.lane.b32.xlu0 %v760_v26, %s7411_s4  ;;  %v865_v42 = vrot.slane %v760_v26, 6  ;;  %v1090_v26 = vld [vmem:[%s9068_s7 + $0x18] sm:$0xff] }
 0xd66   :  { %v763_v27 = vpop.permute.xlu0 %762 }
 0xd67   :  { %6394 = vmatmul.mubr.msk.f32.vlgmr.msra.gmra.mxu0 %vm227_vm3, %v763_v27  ;;  %v1089_v27 = vld [vmem:[%s9068_s7 + $0x10] sm:$0xff] }
 0xd68   :  { %6408 = vmatpush3.msra.mxu0 %v7518_v0  ;;  %6415 = vmatprep.mubr.msk.f32.mxu0 %vm7408_vm1, %v7407_v3 }
 0xd69   :  { %6409 = vmatprep.subr.mxu0 %v7407_v3 }
 0xd6a   :  { %6410 = vmatpush3.msra.mxu0 %v7523_v1 }
 0xd6b   :  { %6411 = vmatprep.subr.mxu0 %v7407_v3 }
 0xd6c   :  { %6412 = vmatpush3.msra.mxu0 %v7529_v4 }
 0xd6d   :  { %6413 = vmatprep.subr.mxu0 %v7407_v3 }
 0xd6e   :  { %6414 = vmatpush3.msra.mxu0 %v7570_v17 }
 0xd6f   :  { %6429 = vmatprep.subr.mxu0 %v7407_v3 }
 0xe27   :  { %v832_v28 = vpop.f32.mrf.mxu0 }
 0xe28   :  { %v846_v0 = vadd.f32 %v832_v28, %v7603_v31  ;;  %v837_v32 = vrot.slane %v832_v28, 6  ;;  %v1088_v28 = vld [vmem:[%s9068_s7 + $0x8] sm:$0xff] }
 0xe29   :  { %v6395_v29 = vpop.f32.mrf.mxu0 }
 0xe2a   :  { %v848_v30 = vrot.slane %v846_v0, 6  ;;  %v839_v1 = vadd.f32 %v837_v32, %v7610_v37 }
 0xe2c   :  { %849 = vrot.lane.b32.xlu1 %v848_v30, %s7410_s20  ;;  %v5783_v33 = vmul.f32 -1.442695, %v839_v1 }
 0xe2e   :  { %7294 = vpow2.f32 %v5783_v33 }
 0xe3b   :  { %v7295_v34 = vpop.eup %7294 }
 0xe3c   :  { %v843_v4 = vadd.f32 1.0, %v7295_v34 }
 0xe3e   :  { %7296 = vrcp.f32 %v843_v4 }
 0xe4b   :  { %v7297_v35 = vpop.eup %7296 }
 0xe4c   :  { %v859_v43 = vsub.f32 1.0, %v7297_v35  ;;  %v867_v46 = vmul.f32 %v7297_v35, %v865_v42  ;;  %v1271_v42 = vld [vmem:[%s9072_s11 + $0x20] sm:$0xff] }
 0xe9e   :  { %v850_v36 = vpop.permute.xlu1 %849 }
 0xe9f   :  { %v852_v17 = vmul.f32 %v7297_v35, %v850_v36  ;;  %v1181_v36 = vld [vmem:[%s9070_s9 + $0x30] sm:$0x3] }
 0xea1   :  { %854 = vrot.lane.b32.xlu0 %v852_v17, %s7410_s20  ;;  %v1273_v17 = vld [vmem:[%s9072_s11 + $0x30] sm:$0x3] }
 0xf13   :  { %v855_v38 = vpop.permute.xlu0 %854 }
 0xf14   :  { %v857_v40 = vadd.f32 %v855_v38, %v7610_v37  ;;  %v1180_v38 = vld [vmem:[%s9070_s9 + $0x28] sm:$0xff] }
 0xf16   :  { %7298 = vtanh.f32 %v857_v40  ;;  %v1272_v40 = vld [vmem:[%s9072_s11 + $0x28] sm:$0xff] }
 0xf23   :  { %v7299_v41 = vpop.eup %7298 }
 0xf24   :  { %861 = vrot.lane.b32.xlu1 %v7299_v41, %s7411_s4  ;;  %v1179_v41 = vld [vmem:[%s9070_s9 + $0x20] sm:$0xff] }
 0xf96   :  { %v862_v44 = vpop.permute.xlu1 %861 }
 0xf97   :  { %v864_v45 = vmul.f32 %v862_v44, %v859_v43  ;;  %v1178_v43 = vld [vmem:[%s9070_s9 + $0x18] sm:$0xff] }
 0xf98   :  { %v1270_v44 = vld [vmem:[%s9072_s11 + $0x18] sm:$0xff] }
 0xf99   :  { %v868_v47 = vadd.f32 %v867_v46, %v864_v45  ;;  %v1177_v45 = vld [vmem:[%s9070_s9 + $0x10] sm:$0xff] }
 0xf9a   :  { %v1269_v46 = vld [vmem:[%s9072_s11 + $0x10] sm:$0xff] }
 0xf9b   :  { %v870_v48 = vrot.slane %v868_v47, 2  ;;  %v974_v5 = vrot.slane %v868_v47, 6  ;;  %v1176_v47 = vld [vmem:[%s9070_s9 + $0x8] sm:$0xff] }
 0xf9d   :  { %871 = vrot.lane.b32.xlu0 %v870_v48, %s7411_s4  ;;  %v1268_v48 = vld [vmem:[%s9072_s11 + $0x8] sm:$0xff] }
0x100f   :  { %v872_v49 = vpop.permute.xlu0 %871 }
0x1010   :  { %6405 = vmatmul.mubr.msk.f32.vlgmr.msra.gmra.mxu1 %vm227_vm3, %v872_v49  ;;  %v1175_v49 = vld [vmem:[%s9070_s9] sm:$0xff] }
0x1011   :  { %6426 = vmatprep.mubr.msk.f32.mxu1 %vm7408_vm1, %v7407_v3  ;;  %6419 = vmatpush3.msra.mxu1 %v1090_v26 }
0x1012   :  { %6420 = vmatprep.subr.mxu1 %v7407_v3 }
0x1013   :  { %6421 = vmatpush3.msra.mxu1 %v1089_v27 }
0x1014   :  { %6422 = vmatprep.subr.mxu1 %v7407_v3 }
0x1015   :  { %6423 = vmatpush3.msra.mxu1 %v1088_v28 }
0x1016   :  { %6424 = vmatprep.subr.mxu1 %v7407_v3 }
0x10d0   :  { %v941_v50 = vpop.f32.mrf.mxu1 }
0x10d1   :  { %v955_v51 = vadd.f32 %v941_v50, %v7603_v31  ;;  %v946_v54 = vrot.slane %v941_v50, 4  ;;  %v1267_v50 = vld [vmem:[%s9072_s11] sm:$0xff] }
0x10d2   :  { %v6406_v52 = vpop.f32.mrf.mxu1 }
0x10d3   :  { %v957_v53 = vrot.slane %v955_v51, 4  ;;  %v948_v55 = vadd.f32 %v946_v54, %v7610_v37  ;;  %v5788_v51 = vld [vmem:[%s9069_s8] ss:$0 sm:$0xff] }
0x10d5   :  { %958 = vrot.lane.b32.xlu1 %v957_v53, %s7410_s20  ;;  %v5785_v56 = vmul.f32 -1.442695, %v948_v55 }
0x10d7   :  { %7300 = vpow2.f32 %v5785_v56  ;;  %v7818_v56 = vld [vmem:[%s9074_s13 + $0x18] sm:$0xff] }
0x10e4   :  { %v7301_v57 = vpop.eup %7300 }
0x10e5   :  { %v952_v58 = vadd.f32 1.0, %v7301_v57  ;;  %v7825_v57 = vld [vmem:[%s9074_s13 + $0x10] sm:$0xff] }
0x10e7   :  { %7302 = vrcp.f32 %v952_v58  ;;  %v7831_v58 = vld [vmem:[%s9074_s13 + $0x8] sm:$0xff] }
0x10f4   :  { %v7303_v59 = vpop.eup %7302 }
0x10f5   :  { %v968_v6 = vsub.f32 1.0, %v7303_v59  ;;  %v976_v8 = vmul.f32 %v7303_v59, %v974_v5  ;;  %v1355_v5 = vld [vmem:[%s9089_s21] sm:$0x3]  ;;  %s3209_s21 = smul.f32 0.125, %s8240_s30 }
0x1147   :  { %v959_v60 = vpop.permute.xlu1 %958 }
0x1148   :  { %v961_v61 = vmul.f32 %v7303_v59, %v959_v60  ;;  %v7837_v59 = vld [vmem:[%s9074_s13] sm:$0xff] }
0x1149   :  { %v5793_v60 = vld [vmem:[%s9073_s12] ss:$0 sm:$0xff] }
0x114a   :  { %963 = vrot.lane.b32.xlu0 %v961_v61, %s7410_s20 }
0x11bc   :  { %v964_v62 = vpop.permute.xlu0 %963 }
0x11bd   :  { %v966_v63 = vadd.f32 %v964_v62, %v7610_v37 }
0x11bf   :  { %7304 = vtanh.f32 %v966_v63 }
0x11cc   :  { %v7305_v2 = vpop.eup %7304 }
0x11cd   :  { %970 = vrot.lane.b32.xlu1 %v7305_v2, %s7411_s4  ;;  %v5790_v2 = vld [vmem:[%s9071_s10] ss:$0 sm:$0xff] }
0x123f   :  { %v971_v7 = vpop.permute.xlu1 %970 }
0x1240   :  { %v973_v39 = vmul.f32 %v971_v7, %v968_v6 }
0x1242   :  { %v977_v9 = vadd.f32 %v976_v8, %v973_v39 }
0x1244   :  { %v979_v10 = vrot.slane %v977_v9, 4  ;;  %v1083_v29 = vrot.slane %v977_v9, 6 }
0x1246   :  { %980 = vrot.lane.b32.xlu0 %v979_v10, %s7411_s4 }
0x12b8   :  { %v981_v11 = vpop.permute.xlu0 %980 }
0x12b9   :  { %6416 = vmatmul.mubr.msk.f32.vlgmr.msra.gmra.mxu0 %vm227_vm3, %v981_v11  ;;  %v7869_v11 = vld [vmem:[%s9076_s15 + $0x30] sm:$0x3] }
0x12ba   :  { %6443 = vmatprep.mubr.msk.f32.mxu0 %vm7408_vm1, %v7407_v3  ;;  %6430 = vmatpush3.msk.msra.mxu0 %vm1193_vm4, %v1181_v36 }
0x12bb   :  { %6431 = vmatprep.subr.mxu0 %v7407_v3 }
0x12bc   :  { %6432 = vmatpush3.msra.mxu0 %v1180_v38 }
0x12bd   :  { %6433 = vmatprep.subr.mxu0 %v7407_v3 }
0x12be   :  { %6434 = vmatpush3.msra.mxu0 %v1179_v41 }
0x12bf   :  { %6435 = vmatprep.subr.mxu0 %v7407_v3 }
0x12c0   :  { %6436 = vmatpush3.msra.mxu0 %v1178_v43 }
0x12c1   :  { %6437 = vmatprep.subr.mxu0 %v7407_v3 }
0x12c2   :  { %6438 = vmatpush3.msra.mxu0 %v1177_v45 }
0x12c3   :  { %6439 = vmatprep.subr.mxu0 %v7407_v3 }
0x12c4   :  { %6440 = vmatpush3.msra.mxu0 %v1176_v47 }
0x12c5   :  { %6441 = vmatprep.subr.mxu0 %v7407_v3 }
0x12c6   :  { %6442 = vmatpush3.msra.mxu0 %v1175_v49 }
0x12c7   :  { %6463 = vmatprep.subr.mxu0 %v7407_v3 }
0x1379   :  { %v1050_v12 = vpop.f32.mrf.mxu0 }
0x137a   :  { %v1064_v13 = vadd.f32 %v1050_v12, %v7603_v31  ;;  %v1055_v16 = vrot.slane %v1050_v12, 2  ;;  %v7874_v12 = vld [vmem:[%s9076_s15 + $0x28] sm:$0xff] }
0x137b   :  { %v6417_v14 = vpop.f32.mrf.mxu0 }
0x137c   :  { %v1066_v15 = vrot.slane %v1064_v13, 2  ;;  %v1057_v18 = vadd.f32 %v1055_v16, %v7610_v37  ;;  %v7882_v13 = vld [vmem:[%s9076_s15 + $0x20] sm:$0xff]  ;;  %v7889_v14 = vld [vmem:[%s9076_s15 + $0x18] sm:$0xff]  ;;  %v7903_v16 = vld [vmem:[%s9076_s15 + $0x8] sm:$0xff] }
0x137e   :  { %1067 = vrot.lane.b32.xlu1 %v1066_v15, %s7410_s20  ;;  %v5787_v19 = vmul.f32 -1.442695, %v1057_v18  ;;  %v7896_v15 = vld [vmem:[%s9076_s15 + $0x10] sm:$0xff]  ;;  %v7910_v18 = vld [vmem:[%s9076_s15] sm:$0xff] }
0x1380   :  { %7306 = vpow2.f32 %v5787_v19  ;;  %v7919_v19 = vld [vmem:[%s9075_s14] ss:$0 sm:$0xff] }
0x138d   :  { %v7307_v20 = vpop.eup %7306 }
0x138e   :  { %v1061_v21 = vadd.f32 1.0, %v7307_v20 }
0x1390   :  { %7308 = vrcp.f32 %v1061_v21 }
0x139d   :  { %v7309_v22 = vpop.eup %7308 }
0x139e   :  { %v1077_v30 = vsub.f32 1.0, %v7309_v22  ;;  %v1085_v1 = vmul.f32 %v7309_v22, %v1083_v29 }
0x13f0   :  { %v1068_v23 = vpop.permute.xlu1 %1067 }
0x13f1   :  { %v1070_v24 = vmul.f32 %v7309_v22, %v1068_v23 }
0x13f3   :  { %1072 = vrot.lane.b32.xlu0 %v1070_v24, %s7410_s20  ;;  %v7938_v24 = vld [vmem:[%s9077_s16] ss:$0 sm:$0xff]  ;;  %s8758_s20 = sld [smem:[#allocation2 + $0x5]] }
0x13f9   :  { %s5036_s5 = smul.f32 0.125, %s8758_s20 }
0x1465   :  { %v1073_v25 = vpop.permute.xlu0 %1072 }
0x1466   :  { %v1075_v31 = vadd.f32 %v1073_v25, %v7610_v37  ;;  %v1087_v37 = vld [vmem:[%s9068_s7] sm:$0xff]  ;;  %s8089_s7 = sld [smem:[#allocation2 + $0x1]] }
0x1467   :  { %6425 = vmatpush3.msra.mxu1 %v1087_v37 }
0x1468   :  { %7310 = vtanh.f32 %v1075_v31  ;;  %6446 = vmatprep.subr.mxu1 %v7407_v3  ;;  %v7941_v31 = vstv %s7933_s26 }
0x146c   :  { %s2600_s0 = smul.f32 0.125, %s8089_s7 }
0x1475   :  { %v7311_v0 = vpop.eup %7310 }
0x1476   :  { %1079 = vrot.lane.b32.xlu1 %v7311_v0, %s7411_s4 }
0x14e8   :  { %v1080_v32 = vpop.permute.xlu1 %1079 }
0x14e9   :  { %v1082_v33 = vmul.f32 %v1080_v32, %v1077_v30 }
0x14eb   :  { %v1086_v34 = vadd.f32 %v1085_v1, %v1082_v33 }
0x14ed   :  { %v1099_v4 = vrot.slane %v1086_v34, 6 }
0x14ef   :  { %1100 = vrot.lane.b32.xlu0 %v1099_v4, %s7411_s4  ;;  %s8411_s4 = sld [smem:[#allocation2 + $0x3]] }
0x14f5   :  { %s3818_s1 = smul.f32 0.125, %s8411_s4 }
0x1561   :  { %v1101_v35 = vpop.permute.xlu0 %1100 }
0x1562   :  { %6427 = vmatmul.mubr.msk.f32.vlgmr.msra.gmra.mxu1 %vm227_vm3, %v1101_v35 }
0x1563   :  { %6460 = vmatprep.mubr.msk.f32.mxu1 %vm7408_vm1, %v7407_v3  ;;  %6447 = vmatpush3.msk.msra.mxu1 %vm1193_vm4, %v1273_v17 }
0x1564   :  { %6448 = vmatprep.subr.mxu1 %v7407_v3 }
0x1565   :  { %6449 = vmatpush3.msra.mxu1 %v1272_v40 }
0x1566   :  { %6450 = vmatprep.subr.mxu1 %v7407_v3 }
0x1567   :  { %6451 = vmatpush3.msra.mxu1 %v1271_v42 }
0x1568   :  { %6452 = vmatprep.subr.mxu1 %v7407_v3 }
0x1569   :  { %6453 = vmatpush3.msra.mxu1 %v1270_v44 }
0x156a   :  { %6454 = vmatprep.subr.mxu1 %v7407_v3 }
0x156b   :  { %6455 = vmatpush3.msra.mxu1 %v1269_v46 }
0x156c   :  { %6456 = vmatprep.subr.mxu1 %v7407_v3 }
0x156d   :  { %6457 = vmatpush3.msra.mxu1 %v1268_v48 }
0x156e   :  { %6458 = vmatprep.subr.mxu1 %v7407_v3 }
0x156f   :  { %6459 = vmatpush3.msra.mxu1 %v1267_v50 }
0x1570   :  { %6474 = vmatprep.subr.mxu1 %v7407_v3 }
0x1622   :  { %v1170_v52 = vpop.f32.mrf.mxu1 }
0x1623   :  { %v1171_v53 = vadd.f32 %v5788_v51, %v1170_v52 }
0x1624   :  { %v6428_v54 = vpop.f32.mrf.mxu1 }
0x1625   :  { %7312 = vtanh.f32 %v1171_v53 }
0x1632   :  { %v7313_v55 = vpop.eup %7312 }
0x1633   :  { %6444 = vmatmul.mubr.msk.f32.vlgmr.msra.gmra.mxu0 %vm1189_vm5, %v7313_v55  ;;  %6461 = vmatmul.mubr.msk.f32.vlgmr.msra.gmra.mxu1 %vm1189_vm5, %v7313_v55 }
0x1634   :  { %6471 = vmatprep.mubr.msk.f32.mxu0 %vm7408_vm1, %v7407_v3  ;;  %6488 = vmatprep.mubr.msk.f32.mxu1 %vm7408_vm1, %v7407_v3 }
0x1635   :  { %6464 = vmatpush3.msra.mxu0 %v7818_v56  ;;  %6475 = vmatpush3.msk.msra.mxu1 %vm1193_vm4, %v7869_v11 }
0x1636   :  { %6465 = vmatprep.subr.mxu0 %v7407_v3  ;;  %6476 = vmatprep.subr.mxu1 %v7407_v3 }
0x1637   :  { %6466 = vmatpush3.msra.mxu0 %v7825_v57  ;;  %6477 = vmatpush3.msra.mxu1 %v7874_v12 }
0x1638   :  { %6467 = vmatprep.subr.mxu0 %v7407_v3  ;;  %6478 = vmatprep.subr.mxu1 %v7407_v3 }
0x1639   :  { %6468 = vmatpush3.msra.mxu0 %v7831_v58  ;;  %6479 = vmatpush3.msra.mxu1 %v7882_v13 }
0x163a   :  { %6469 = vmatprep.subr.mxu0 %v7407_v3  ;;  %6480 = vmatprep.subr.mxu1 %v7407_v3 }
0x163b   :  { %6470 = vmatpush3.msra.mxu0 %v7837_v59  ;;  %6481 = vmatpush3.msra.mxu1 %v7889_v14 }
0x163c   :  { %6491 = vmatprep.subr.mxu0 %v7407_v3  ;;  %6482 = vmatprep.subr.mxu1 %v7407_v3 }
0x163d   :  { %6483 = vmatpush3.msra.mxu1 %v7896_v15 }
0x163e   :  { %6484 = vmatprep.subr.mxu1 %v7407_v3 }
0x163f   :  { %6485 = vmatpush3.msra.mxu1 %v7903_v16 }
0x1640   :  { %6486 = vmatprep.subr.mxu1 %v7407_v3 }
0x1641   :  { %6487 = vmatpush3.msra.mxu1 %v7910_v18 }
0x1642   :  { %6519 = vmatprep.subr.mxu1 %v7407_v3 }
0x16f3   :  { %v1263_v61 = vpop.f32.mrf.mxu0  ;;  %v1350_v62 = vpop.f32.mrf.mxu1 }
0x16f4   :  { %v1351_v63 = vadd.f32 %v5793_v60, %v1350_v62  ;;  %v1264_v39 = vadd.f32 %v5790_v2, %v1263_v61  ;;  %v1992_v2 = vstv %s1991_s29 }
0x16f5   :  { %v6445_v6 = vpop.f32.mrf.mxu0  ;;  %v6462_v7 = vpop.f32.mrf.mxu1 }
0x16f6   :  { %v1354_v8 = vand.u32 2147483647, %v1351_v63 }
0x16f8   :  { %v1356_v9 = vmul.f32 %v1355_v5, %v1354_v8 }
0x16fa   :  { %v7852_v10 = vadd.f32 %v1356_v9, %v1264_v39 }
0x16fc   :  { %6472 = vmatmul.mubr.msk.f32.vlgmr.msra.gmra.mxu0 %vm227_vm3, %v7852_v10 }
0x16fd   :  { %6492 = vmatpush3.msra.mxu0 %v7818_v56  ;;  %6499 = vmatprep.mubr.msk.f32.mxu0 %vm7408_vm1, %v7407_v3 }
0x16fe   :  { %6493 = vmatprep.subr.mxu0 %v7407_v3 }
0x16ff   :  { %6494 = vmatpush3.msra.mxu0 %v7825_v57 }
0x1700   :  { %6495 = vmatprep.subr.mxu0 %v7407_v3 }
0x1701   :  { %6496 = vmatpush3.msra.mxu0 %v7831_v58 }
0x1702   :  { %6497 = vmatprep.subr.mxu0 %v7407_v3 }
0x1703   :  { %6498 = vmatpush3.msra.mxu0 %v7837_v59 }
0x1704   :  { %6502 = vmatprep.subr.mxu0 %v7407_v3 }
0x17bc   :  { %v1453_v20 = vpop.f32.mrf.mxu0 }
0x17bd   :  { %v1454_v21 = vadd.f32 %v7919_v19, %v1453_v20 }
0x17be   :  { %v6473_v22 = vpop.f32.mrf.mxu0 }
0x17bf   :  { %7314 = vtanh.f32 %v1454_v21 }
0x17cc   :  { %v7315_v23 = vpop.eup %7314 }
0x17cd   :  { %6489 = vmatmul.mubr.msk.f32.vlgmr.msra.gmra.mxu1 %vm1189_vm5, %v7315_v23  ;;  %v8092_v23 = vstv %s8089_s7 }
0x17ce   :  { %6520 = vmatpush3.msra.mxu1 %v7818_v56  ;;  %6527 = vmatprep.mubr.msk.f32.mxu1 %vm7408_vm1, %v7407_v3 }
0x17cf   :  { %6521 = vmatprep.subr.mxu1 %v7407_v3 }
0x17d0   :  { %6522 = vmatpush3.msra.mxu1 %v7825_v57 }
0x17d1   :  { %6523 = vmatprep.subr.mxu1 %v7407_v3 }
0x17d2   :  { %6524 = vmatpush3.msra.mxu1 %v7831_v58 }
0x17d3   :  { %6525 = vmatprep.subr.mxu1 %v7407_v3 }
0x17d4   :  { %6526 = vmatpush3.msra.mxu1 %v7837_v59 }
0x17d5   :  { %6530 = vmatprep.subr.mxu1 %v7407_v3 }
0x188d   :  { %v1530_v25 = vpop.f32.mrf.mxu1 }
0x188e   :  { %v7944_v26 = vadd.f32 %v7938_v24, %v1530_v25 }
0x188f   :  { %v6490_v27 = vpop.f32.mrf.mxu1 }
0x1890   :  { %v1535_v28 = vmul.f32 %v7941_v31, %v7944_v26  ;;  %v1685_v4 = vmul.f32 0.33333334, %v7944_v26 }
0x1892   :  { %v1536_v37 = vmul.f32 0.33333334, %v1535_v28 }
0x1894   :  { %v1537_v0 = vadd.f32 %v1536_v37, %v7852_v10 }
0x1896   :  { %6500 = vmatmul.mubr.msk.f32.vlgmr.msra.gmra.mxu0 %vm227_vm3, %v1537_v0 }
0x1897   :  { %6503 = vmatpush3.msk.msra.mxu0 %vm1193_vm4, %v7869_v11  ;;  %6516 = vmatprep.mubr.msk.f32.mxu0 %vm7408_vm1, %v7407_v3 }
0x1898   :  { %6504 = vmatprep.subr.mxu0 %v7407_v3 }
0x1899   :  { %6505 = vmatpush3.msra.mxu0 %v7874_v12 }
0x189a   :  { %6506 = vmatprep.subr.mxu0 %v7407_v3 }
0x189b   :  { %6507 = vmatpush3.msra.mxu0 %v7882_v13 }
0x189c   :  { %6508 = vmatprep.subr.mxu0 %v7407_v3 }
0x189d   :  { %6509 = vmatpush3.msra.mxu0 %v7889_v14 }
0x189e   :  { %6510 = vmatprep.subr.mxu0 %v7407_v3 }
0x189f   :  { %6511 = vmatpush3.msra.mxu0 %v7896_v15 }
0x18a0   :  { %6512 = vmatprep.subr.mxu0 %v7407_v3 }
0x18a1   :  { %6513 = vmatpush3.msra.mxu0 %v7903_v16 }
0x18a2   :  { %6514 = vmatprep.subr.mxu0 %v7407_v3 }
0x18a3   :  { %6515 = vmatpush3.msra.mxu0 %v7910_v18 }
0x18a4   :  { %6547 = vmatprep.subr.mxu0 %v7407_v3 }
0x1956   :  { %v1607_v29 = vpop.f32.mrf.mxu0 }
0x1957   :  { %v1608_v30 = vadd.f32 %v7919_v19, %v1607_v29 }
0x1958   :  { %v6501_v32 = vpop.f32.mrf.mxu0 }
0x1959   :  { %7316 = vtanh.f32 %v1608_v30 }
0x1966   :  { %v7317_v1 = vpop.eup %7316 }
0x1967   :  { %6517 = vmatmul.mubr.msk.f32.vlgmr.msra.gmra.mxu0 %vm1189_vm5, %v7317_v1 }
0x1968   :  { %6548 = vmatpush3.msra.mxu0 %v7818_v56  ;;  %6555 = vmatprep.mubr.msk.f32.mxu0 %vm7408_vm1, %v7407_v3 }
0x1969   :  { %6549 = vmatprep.subr.mxu0 %v7407_v3 }
0x196a   :  { %6550 = vmatpush3.msra.mxu0 %v7825_v57 }
0x196b   :  { %6551 = vmatprep.subr.mxu0 %v7407_v3 }
0x196c   :  { %6552 = vmatpush3.msra.mxu0 %v7831_v58 }
0x196d   :  { %6553 = vmatprep.subr.mxu0 %v7407_v3 }
0x196e   :  { %6554 = vmatpush3.msra.mxu0 %v7837_v59 }
0x196f   :  { %6558 = vmatprep.subr.mxu0 %v7407_v3 }
0x1a27   :  { %v1681_v33 = vpop.f32.mrf.mxu0 }
0x1a28   :  { %v7980_v34 = vadd.f32 %v7938_v24, %v1681_v33 }
0x1a29   :  { %v6518_v35 = vpop.f32.mrf.mxu0 }
0x1a2a   :  { %v1686_v36 = vsub.f32 %v7980_v34, %v1685_v4  ;;  %v1836_v46 = vsub.f32 %v7944_v26, %v7980_v34 }
0x1a2c   :  { %v1687_v17 = vmul.f32 %v1686_v36, %v7941_v31 }
0x1a2e   :  { %v1688_v38 = vadd.f32 %v1687_v17, %v7852_v10 }
0x1a30   :  { %6528 = vmatmul.mubr.msk.f32.vlgmr.msra.gmra.mxu1 %vm227_vm3, %v1688_v38 }
0x1a31   :  { %6531 = vmatpush3.msk.msra.mxu1 %vm1193_vm4, %v7869_v11  ;;  %6544 = vmatprep.mubr.msk.f32.mxu1 %vm7408_vm1, %v7407_v3 }
0x1a32   :  { %6532 = vmatprep.subr.mxu1 %v7407_v3 }
0x1a33   :  { %6533 = vmatpush3.msra.mxu1 %v7874_v12 }
0x1a34   :  { %6534 = vmatprep.subr.mxu1 %v7407_v3 }
0x1a35   :  { %6535 = vmatpush3.msra.mxu1 %v7882_v13 }
0x1a36   :  { %6536 = vmatprep.subr.mxu1 %v7407_v3 }
0x1a37   :  { %6537 = vmatpush3.msra.mxu1 %v7889_v14 }
0x1a38   :  { %6538 = vmatprep.subr.mxu1 %v7407_v3 }
0x1a39   :  { %6539 = vmatpush3.msra.mxu1 %v7896_v15 }
0x1a3a   :  { %6540 = vmatprep.subr.mxu1 %v7407_v3 }
0x1a3b   :  { %6541 = vmatpush3.msra.mxu1 %v7903_v16 }
0x1a3c   :  { %6542 = vmatprep.subr.mxu1 %v7407_v3 }
0x1a3d   :  { %6543 = vmatpush3.msra.mxu1 %v7910_v18 }
0x1a3e   :  { %6575 = vmatprep.subr.mxu1 %v7407_v3 }
0x1af0   :  { %v1758_v40 = vpop.f32.mrf.mxu1 }
0x1af1   :  { %v1759_v41 = vadd.f32 %v7919_v19, %v1758_v40 }
0x1af2   :  { %v6529_v42 = vpop.f32.mrf.mxu1 }
0x1af3   :  { %7318 = vtanh.f32 %v1759_v41 }
0x1b00   :  { %v7319_v43 = vpop.eup %7318 }
0x1b01   :  { %6545 = vmatmul.mubr.msk.f32.vlgmr.msra.gmra.mxu1 %vm1189_vm5, %v7319_v43 }
0x1b02   :  { %6576 = vmatpush3.msra.mxu1 %v7818_v56  ;;  %6583 = vmatprep.mubr.msk.f32.mxu1 %vm7408_vm1, %v7407_v3 }
0x1b03   :  { %6577 = vmatprep.subr.mxu1 %v7407_v3 }
0x1b04   :  { %6578 = vmatpush3.msra.mxu1 %v7825_v57 }
0x1b05   :  { %6579 = vmatprep.subr.mxu1 %v7407_v3 }
0x1b06   :  { %6580 = vmatpush3.msra.mxu1 %v7831_v58 }
0x1b07   :  { %6581 = vmatprep.subr.mxu1 %v7407_v3 }
0x1b08   :  { %6582 = vmatpush3.msra.mxu1 %v7837_v59 }
0x1b09   :  { %6586 = vmatprep.subr.mxu1 %v7407_v3 }
0x1bc1   :  { %v1832_v44 = vpop.f32.mrf.mxu1 }
0x1bc2   :  { %v1833_v45 = vadd.f32 %v7938_v24, %v1832_v44 }
0x1bc3   :  { %v6546_v47 = vpop.f32.mrf.mxu1 }
0x1bc4   :  { %v1837_v48 = vadd.f32 %v1836_v46, %v1833_v45  ;;  %v1987_v55 = vadd.f32 %v1833_v45, %v7980_v34 }
0x1bc6   :  { %v1838_v49 = vmul.f32 %v1837_v48, %v7941_v31  ;;  %v1988_v60 = vmul.f32 3.0, %v1987_v55 }
0x1bc8   :  { %v1839_v50 = vadd.f32 %v1838_v49, %v7852_v10  ;;  %v1989_v63 = vadd.f32 %v1988_v60, %v7944_v26 }
0x1bca   :  { %6556 = vmatmul.mubr.msk.f32.vlgmr.msra.gmra.mxu0 %vm227_vm3, %v1839_v50 }
0x1bcb   :  { %6559 = vmatpush3.msk.msra.mxu0 %vm1193_vm4, %v7869_v11  ;;  %6572 = vmatprep.mubr.msk.f32.mxu0 %vm7408_vm1, %v7407_v3 }
0x1bcc   :  { %6560 = vmatprep.subr.mxu0 %v7407_v3 }
0x1bcd   :  { %6561 = vmatpush3.msra.mxu0 %v7874_v12 }
0x1bce   :  { %6562 = vmatprep.subr.mxu0 %v7407_v3 }
0x1bcf   :  { %6563 = vmatpush3.msra.mxu0 %v7882_v13 }
0x1bd0   :  { %6564 = vmatprep.subr.mxu0 %v7407_v3 }
0x1bd1   :  { %6565 = vmatpush3.msra.mxu0 %v7889_v14 }
0x1bd2   :  { %6566 = vmatprep.subr.mxu0 %v7407_v3 }
0x1bd3   :  { %6567 = vmatpush3.msra.mxu0 %v7896_v15 }
0x1bd4   :  { %6568 = vmatprep.subr.mxu0 %v7407_v3 }
0x1bd5   :  { %6569 = vmatpush3.msra.mxu0 %v7903_v16 }
0x1bd6   :  { %6570 = vmatprep.subr.mxu0 %v7407_v3 }
0x1bd7   :  { %6571 = vmatpush3.msra.mxu0 %v7910_v18 }
0x1bd8   :  { %6603 = vmatprep.subr.mxu0 %v7407_v3 }
0x1c8a   :  { %v1909_v51 = vpop.f32.mrf.mxu0 }
0x1c8b   :  { %v1910_v52 = vadd.f32 %v7919_v19, %v1909_v51 }
0x1c8c   :  { %v6557_v53 = vpop.f32.mrf.mxu0 }
0x1c8d   :  { %7320 = vtanh.f32 %v1910_v52 }
0x1c9a   :  { %v7321_v54 = vpop.eup %7320 }
0x1c9b   :  { %6573 = vmatmul.mubr.msk.f32.vlgmr.msra.gmra.mxu0 %vm1189_vm5, %v7321_v54 }
0x1c9c   :  { %6604 = vmatpush3.msra.mxu0 %v7818_v56  ;;  %6611 = vmatprep.mubr.msk.f32.mxu0 %vm7408_vm1, %v7407_v3 }
0x1c9d   :  { %6605 = vmatprep.subr.mxu0 %v7407_v3 }
0x1c9e   :  { %6606 = vmatpush3.msra.mxu0 %v7825_v57 }
0x1c9f   :  { %6607 = vmatprep.subr.mxu0 %v7407_v3 }
0x1ca0   :  { %6608 = vmatpush3.msra.mxu0 %v7831_v58 }
0x1ca1   :  { %6609 = vmatprep.subr.mxu0 %v7407_v3 }
0x1ca2   :  { %6610 = vmatpush3.msra.mxu0 %v7837_v59 }
0x1ca3   :  { %6614 = vmatprep.subr.mxu0 %v7407_v3 }
0x1d5b   :  { %v1983_v61 = vpop.f32.mrf.mxu0 }
0x1d5c   :  { %v1984_v62 = vadd.f32 %v7938_v24, %v1983_v61 }
0x1d5d   :  { %v6574_v5 = vpop.f32.mrf.mxu0 }
0x1d5e   :  { %v1990_v6 = vadd.f32 %v1989_v63, %v1984_v62  ;;  %v2601_v62 = vstv %s2600_s0 }
0x1d60   :  { %v1993_v7 = vmul.f32 %v1992_v2, %v1990_v6 }
0x1d62   :  { %v8056_v8 = vadd.f32 %v1993_v7, %v7852_v10 }
0x1d64   :  { %6584 = vmatmul.mubr.msk.f32.vlgmr.msra.gmra.mxu1 %vm227_vm3, %v8056_v8 }
0x1d65   :  { %6587 = vmatpush3.msk.msra.mxu1 %vm1193_vm4, %v7869_v11  ;;  %6600 = vmatprep.mubr.msk.f32.mxu1 %vm7408_vm1, %v7407_v3 }
0x1d66   :  { %6588 = vmatprep.subr.mxu1 %v7407_v3 }
0x1d67   :  { %6589 = vmatpush3.msra.mxu1 %v7874_v12 }
0x1d68   :  { %6590 = vmatprep.subr.mxu1 %v7407_v3 }
0x1d69   :  { %6591 = vmatpush3.msra.mxu1 %v7882_v13 }
0x1d6a   :  { %6592 = vmatprep.subr.mxu1 %v7407_v3 }
0x1d6b   :  { %6593 = vmatpush3.msra.mxu1 %v7889_v14 }
0x1d6c   :  { %6594 = vmatprep.subr.mxu1 %v7407_v3 }
0x1d6d   :  { %6595 = vmatpush3.msra.mxu1 %v7896_v15 }
0x1d6e   :  { %6596 = vmatprep.subr.mxu1 %v7407_v3 }
0x1d6f   :  { %6597 = vmatpush3.msra.mxu1 %v7903_v16 }
0x1d70   :  { %6598 = vmatprep.subr.mxu1 %v7407_v3 }
0x1d71   :  { %6599 = vmatpush3.msra.mxu1 %v7910_v18 }
0x1d72   :  { %6631 = vmatprep.subr.mxu1 %v7407_v3 }
0x1e24   :  { %v2065_v39 = vpop.f32.mrf.mxu1 }
0x1e25   :  { %v2066_v9 = vadd.f32 %v7919_v19, %v2065_v39 }
0x1e26   :  { %v6585_v20 = vpop.f32.mrf.mxu1 }
0x1e27   :  { %7322 = vtanh.f32 %v2066_v9 }
0x1e34   :  { %v7323_v21 = vpop.eup %7322 }
0x1e35   :  { %6601 = vmatmul.mubr.msk.f32.vlgmr.msra.gmra.mxu1 %vm1189_vm5, %v7323_v21 }
0x1e36   :  { %6632 = vmatpush3.msra.mxu1 %v7818_v56  ;;  %6639 = vmatprep.mubr.msk.f32.mxu1 %vm7408_vm1, %v7407_v3 }
0x1e37   :  { %6633 = vmatprep.subr.mxu1 %v7407_v3 }
0x1e38   :  { %6634 = vmatpush3.msra.mxu1 %v7825_v57 }
0x1e39   :  { %6635 = vmatprep.subr.mxu1 %v7407_v3 }
0x1e3a   :  { %6636 = vmatpush3.msra.mxu1 %v7831_v58 }
0x1e3b   :  { %6637 = vmatprep.subr.mxu1 %v7407_v3 }
0x1e3c   :  { %6638 = vmatpush3.msra.mxu1 %v7837_v59 }
0x1e3d   :  { %6642 = vmatprep.subr.mxu1 %v7407_v3 }
0x1ef5   :  { %v2139_v22 = vpop.f32.mrf.mxu1 }
0x1ef6   :  { %v8095_v25 = vadd.f32 %v7938_v24, %v2139_v22  ;;  %v8243_v22 = vstv %s8240_s30 }
0x1ef7   :  { %v6602_v31 = vpop.f32.mrf.mxu1 }
0x1ef8   :  { %v2144_v26 = vmul.f32 %v8092_v23, %v8095_v25  ;;  %v2294_v33 = vmul.f32 0.33333334, %v8095_v25 }
0x1efa   :  { %v2145_v27 = vmul.f32 0.33333334, %v2144_v26 }
0x1efc   :  { %v2146_v28 = vadd.f32 %v2145_v27, %v8056_v8 }
0x1efe   :  { %6612 = vmatmul.mubr.msk.f32.vlgmr.msra.gmra.mxu0 %vm227_vm3, %v2146_v28 }
0x1eff   :  { %6615 = vmatpush3.msk.msra.mxu0 %vm1193_vm4, %v7869_v11  ;;  %6628 = vmatprep.mubr.msk.f32.mxu0 %vm7408_vm1, %v7407_v3 }
0x1f00   :  { %6616 = vmatprep.subr.mxu0 %v7407_v3 }
0x1f01   :  { %6617 = vmatpush3.msra.mxu0 %v7874_v12 }
0x1f02   :  { %6618 = vmatprep.subr.mxu0 %v7407_v3 }
0x1f03   :  { %6619 = vmatpush3.msra.mxu0 %v7882_v13 }
0x1f04   :  { %6620 = vmatprep.subr.mxu0 %v7407_v3 }
0x1f05   :  { %6621 = vmatpush3.msra.mxu0 %v7889_v14 }
0x1f06   :  { %6622 = vmatprep.subr.mxu0 %v7407_v3 }
0x1f07   :  { %6623 = vmatpush3.msra.mxu0 %v7896_v15 }
0x1f08   :  { %6624 = vmatprep.subr.mxu0 %v7407_v3 }
0x1f09   :  { %6625 = vmatpush3.msra.mxu0 %v7903_v16 }
0x1f0a   :  { %6626 = vmatprep.subr.mxu0 %v7407_v3 }
0x1f0b   :  { %6627 = vmatpush3.msra.mxu0 %v7910_v18 }
0x1f0c   :  { %6659 = vmatprep.subr.mxu0 %v7407_v3 }
0x1fbe   :  { %v2216_v37 = vpop.f32.mrf.mxu0 }
0x1fbf   :  { %v2217_v0 = vadd.f32 %v7919_v19, %v2216_v37 }
0x1fc0   :  { %v6613_v29 = vpop.f32.mrf.mxu0 }
0x1fc1   :  { %7324 = vtanh.f32 %v2217_v0 }
0x1fce   :  { %v7325_v30 = vpop.eup %7324 }
0x1fcf   :  { %6629 = vmatmul.mubr.msk.f32.vlgmr.msra.gmra.mxu0 %vm1189_vm5, %v7325_v30 }
0x1fd0   :  { %6660 = vmatpush3.msra.mxu0 %v7818_v56  ;;  %6667 = vmatprep.mubr.msk.f32.mxu0 %vm7408_vm1, %v7407_v3 }
0x1fd1   :  { %6661 = vmatprep.subr.mxu0 %v7407_v3 }
0x1fd2   :  { %6662 = vmatpush3.msra.mxu0 %v7825_v57 }
0x1fd3   :  { %6663 = vmatprep.subr.mxu0 %v7407_v3 }
0x1fd4   :  { %6664 = vmatpush3.msra.mxu0 %v7831_v58 }
0x1fd5   :  { %6665 = vmatprep.subr.mxu0 %v7407_v3 }
0x1fd6   :  { %6666 = vmatpush3.msra.mxu0 %v7837_v59 }
0x1fd7   :  { %6670 = vmatprep.subr.mxu0 %v7407_v3 }
0x208f   :  { %v2290_v32 = vpop.f32.mrf.mxu0 }
0x2090   :  { %v8131_v1 = vadd.f32 %v7938_v24, %v2290_v32 }
0x2091   :  { %v6630_v34 = vpop.f32.mrf.mxu0 }
0x2092   :  { %v2295_v4 = vsub.f32 %v8131_v1, %v2294_v33  ;;  %v2445_v44 = vsub.f32 %v8095_v25, %v8131_v1 }
0x2094   :  { %v2296_v35 = vmul.f32 %v2295_v4, %v8092_v23 }
0x2096   :  { %v2297_v36 = vadd.f32 %v2296_v35, %v8056_v8 }
0x2098   :  { %6640 = vmatmul.mubr.msk.f32.vlgmr.msra.gmra.mxu1 %vm227_vm3, %v2297_v36 }
0x2099   :  { %6643 = vmatpush3.msk.msra.mxu1 %vm1193_vm4, %v7869_v11  ;;  %6656 = vmatprep.mubr.msk.f32.mxu1 %vm7408_vm1, %v7407_v3 }
0x209a   :  { %6644 = vmatprep.subr.mxu1 %v7407_v3 }
0x209b   :  { %6645 = vmatpush3.msra.mxu1 %v7874_v12 }
0x209c   :  { %6646 = vmatprep.subr.mxu1 %v7407_v3 }
0x209d   :  { %6647 = vmatpush3.msra.mxu1 %v7882_v13 }
0x209e   :  { %6648 = vmatprep.subr.mxu1 %v7407_v3 }
0x209f   :  { %6649 = vmatpush3.msra.mxu1 %v7889_v14 }
0x20a0   :  { %6650 = vmatprep.subr.mxu1 %v7407_v3 }
0x20a1   :  { %6651 = vmatpush3.msra.mxu1 %v7896_v15 }
0x20a2   :  { %6652 = vmatprep.subr.mxu1 %v7407_v3 }
0x20a3   :  { %6653 = vmatpush3.msra.mxu1 %v7903_v16 }
0x20a4   :  { %6654 = vmatprep.subr.mxu1 %v7407_v3 }
0x20a5   :  { %6655 = vmatpush3.msra.mxu1 %v7910_v18 }
0x20a6   :  { %6687 = vmatprep.subr.mxu1 %v7407_v3 }
0x2158   :  { %v2367_v17 = vpop.f32.mrf.mxu1 }
0x2159   :  { %v2368_v38 = vadd.f32 %v7919_v19, %v2367_v17 }
0x215a   :  { %v6641_v40 = vpop.f32.mrf.mxu1 }
0x215b   :  { %7326 = vtanh.f32 %v2368_v38 }
0x2168   :  { %v7327_v41 = vpop.eup %7326 }
0x2169   :  { %6657 = vmatmul.mubr.msk.f32.vlgmr.msra.gmra.mxu1 %vm1189_vm5, %v7327_v41 }
0x216a   :  { %6688 = vmatpush3.msra.mxu1 %v7818_v56  ;;  %6695 = vmatprep.mubr.msk.f32.mxu1 %vm7408_vm1, %v7407_v3 }
0x216b   :  { %6689 = vmatprep.subr.mxu1 %v7407_v3 }
0x216c   :  { %6690 = vmatpush3.msra.mxu1 %v7825_v57 }
0x216d   :  { %6691 = vmatprep.subr.mxu1 %v7407_v3 }
0x216e   :  { %6692 = vmatpush3.msra.mxu1 %v7831_v58 }
0x216f   :  { %6693 = vmatprep.subr.mxu1 %v7407_v3 }
0x2170   :  { %6694 = vmatpush3.msra.mxu1 %v7837_v59 }
0x2171   :  { %6698 = vmatprep.subr.mxu1 %v7407_v3 }
0x2229   :  { %v2441_v42 = vpop.f32.mrf.mxu1 }
0x222a   :  { %v2442_v43 = vadd.f32 %v7938_v24, %v2441_v42 }
0x222b   :  { %v6658_v45 = vpop.f32.mrf.mxu1 }
0x222c   :  { %v2446_v46 = vadd.f32 %v2445_v44, %v2442_v43  ;;  %v2596_v53 = vadd.f32 %v2442_v43, %v8131_v1 }
0x222e   :  { %v2447_v47 = vmul.f32 %v2446_v46, %v8092_v23  ;;  %v2597_v54 = vmul.f32 3.0, %v2596_v53 }
0x2230   :  { %v2448_v48 = vadd.f32 %v2447_v47, %v8056_v8  ;;  %v2598_v61 = vadd.f32 %v2597_v54, %v8095_v25 }
0x2232   :  { %6668 = vmatmul.mubr.msk.f32.vlgmr.msra.gmra.mxu0 %vm227_vm3, %v2448_v48 }
0x2233   :  { %6671 = vmatpush3.msk.msra.mxu0 %vm1193_vm4, %v7869_v11  ;;  %6684 = vmatprep.mubr.msk.f32.mxu0 %vm7408_vm1, %v7407_v3 }
0x2234   :  { %6672 = vmatprep.subr.mxu0 %v7407_v3 }
0x2235   :  { %6673 = vmatpush3.msra.mxu0 %v7874_v12 }
0x2236   :  { %6674 = vmatprep.subr.mxu0 %v7407_v3 }
0x2237   :  { %6675 = vmatpush3.msra.mxu0 %v7882_v13 }
0x2238   :  { %6676 = vmatprep.subr.mxu0 %v7407_v3 }
0x2239   :  { %6677 = vmatpush3.msra.mxu0 %v7889_v14 }
0x223a   :  { %6678 = vmatprep.subr.mxu0 %v7407_v3 }
0x223b   :  { %6679 = vmatpush3.msra.mxu0 %v7896_v15 }
0x223c   :  { %6680 = vmatprep.subr.mxu0 %v7407_v3 }
0x223d   :  { %6681 = vmatpush3.msra.mxu0 %v7903_v16 }
0x223e   :  { %6682 = vmatprep.subr.mxu0 %v7407_v3 }
0x223f   :  { %6683 = vmatpush3.msra.mxu0 %v7910_v18 }
0x2240   :  { %6715 = vmatprep.subr.mxu0 %v7407_v3 }
0x22f2   :  { %v2518_v49 = vpop.f32.mrf.mxu0 }
0x22f3   :  { %v2519_v50 = vadd.f32 %v7919_v19, %v2518_v49 }
0x22f4   :  { %v6669_v51 = vpop.f32.mrf.mxu0 }
0x22f5   :  { %7328 = vtanh.f32 %v2519_v50 }
0x2302   :  { %v7329_v52 = vpop.eup %7328 }
0x2303   :  { %6685 = vmatmul.mubr.msk.f32.vlgmr.msra.gmra.mxu0 %vm1189_vm5, %v7329_v52 }
0x2304   :  { %6716 = vmatpush3.msra.mxu0 %v7818_v56  ;;  %6723 = vmatprep.mubr.msk.f32.mxu0 %vm7408_vm1, %v7407_v3 }
0x2305   :  { %6717 = vmatprep.subr.mxu0 %v7407_v3 }
0x2306   :  { %6718 = vmatpush3.msra.mxu0 %v7825_v57 }
0x2307   :  { %6719 = vmatprep.subr.mxu0 %v7407_v3 }
0x2308   :  { %6720 = vmatpush3.msra.mxu0 %v7831_v58 }
0x2309   :  { %6721 = vmatprep.subr.mxu0 %v7407_v3 }
0x230a   :  { %6722 = vmatpush3.msra.mxu0 %v7837_v59 }
0x230b   :  { %6726 = vmatprep.subr.mxu0 %v7407_v3 }
0x23c3   :  { %v2592_v55 = vpop.f32.mrf.mxu0 }
0x23c4   :  { %v2593_v60 = vadd.f32 %v7938_v24, %v2592_v55 }
0x23c5   :  { %v6686_v63 = vpop.f32.mrf.mxu0 }
0x23c6   :  { %v2599_v2 = vadd.f32 %v2598_v61, %v2593_v60  ;;  %v8414_v63 = vstv %s8411_s4 }
0x23c8   :  { %v2602_v5 = vmul.f32 %v2601_v62, %v2599_v2 }
0x23ca   :  { %v8207_v6 = vadd.f32 %v2602_v5, %v8056_v8 }
0x23cc   :  { %6696 = vmatmul.mubr.msk.f32.vlgmr.msra.gmra.mxu1 %vm227_vm3, %v8207_v6 }
0x23cd   :  { %6699 = vmatpush3.msk.msra.mxu1 %vm1193_vm4, %v7869_v11  ;;  %6712 = vmatprep.mubr.msk.f32.mxu1 %vm7408_vm1, %v7407_v3 }
0x23ce   :  { %6700 = vmatprep.subr.mxu1 %v7407_v3 }
0x23cf   :  { %6701 = vmatpush3.msra.mxu1 %v7874_v12 }
0x23d0   :  { %6702 = vmatprep.subr.mxu1 %v7407_v3 }
0x23d1   :  { %6703 = vmatpush3.msra.mxu1 %v7882_v13 }
0x23d2   :  { %6704 = vmatprep.subr.mxu1 %v7407_v3 }
0x23d3   :  { %6705 = vmatpush3.msra.mxu1 %v7889_v14 }
0x23d4   :  { %6706 = vmatprep.subr.mxu1 %v7407_v3 }
0x23d5   :  { %6707 = vmatpush3.msra.mxu1 %v7896_v15 }
0x23d6   :  { %6708 = vmatprep.subr.mxu1 %v7407_v3 }
0x23d7   :  { %6709 = vmatpush3.msra.mxu1 %v7903_v16 }
0x23d8   :  { %6710 = vmatprep.subr.mxu1 %v7407_v3 }
0x23d9   :  { %6711 = vmatpush3.msra.mxu1 %v7910_v18 }
0x23da   :  { %6743 = vmatprep.subr.mxu1 %v7407_v3 }
0x248c   :  { %v2674_v7 = vpop.f32.mrf.mxu1 }
0x248d   :  { %v2675_v39 = vadd.f32 %v7919_v19, %v2674_v7 }
0x248e   :  { %v6697_v9 = vpop.f32.mrf.mxu1 }
0x248f   :  { %7330 = vtanh.f32 %v2675_v39 }
0x249c   :  { %v7331_v20 = vpop.eup %7330 }
0x249d   :  { %6713 = vmatmul.mubr.msk.f32.vlgmr.msra.gmra.mxu1 %vm1189_vm5, %v7331_v20  ;;  %v8426_v20 = vld [vmem:[%s9076_s15 + $0x30] sm:$0x3] }
0x249e   :  { %6744 = vmatpush3.msra.mxu1 %v7818_v56  ;;  %6751 = vmatprep.mubr.msk.f32.mxu1 %vm7408_vm1, %v7407_v3 }
0x249f   :  { %6745 = vmatprep.subr.mxu1 %v7407_v3 }
0x24a0   :  { %6746 = vmatpush3.msra.mxu1 %v7825_v57 }
0x24a1   :  { %6747 = vmatprep.subr.mxu1 %v7407_v3 }
0x24a2   :  { %6748 = vmatpush3.msra.mxu1 %v7831_v58 }
0x24a3   :  { %6749 = vmatprep.subr.mxu1 %v7407_v3 }
0x24a4   :  { %6750 = vmatpush3.msra.mxu1 %v7837_v59 }
0x24a5   :  { %6754 = vmatprep.subr.mxu1 %v7407_v3 }
0x255d   :  { %v2748_v21 = vpop.f32.mrf.mxu1 }
0x255e   :  { %v8246_v23 = vadd.f32 %v7938_v24, %v2748_v21  ;;  %v8436_v21 = vld [vmem:[%s9076_s15 + $0x28] sm:$0xff] }
0x255f   :  { %v6714_v25 = vpop.f32.mrf.mxu1 }
0x2560   :  { %v2753_v31 = vmul.f32 %v8243_v22, %v8246_v23  ;;  %v2903_v1 = vmul.f32 0.33333334, %v8246_v23  ;;  %v8457_v25 = vld [vmem:[%s9076_s15 + $0x10] sm:$0xff] }
0x2562   :  { %v2754_v26 = vmul.f32 0.33333334, %v2753_v31  ;;  %v8464_v31 = vld [vmem:[%s9076_s15 + $0x8] sm:$0xff] }
0x2564   :  { %v2755_v27 = vadd.f32 %v2754_v26, %v8207_v6  ;;  %v8471_v26 = vld [vmem:[%s9076_s15] sm:$0xff] }
0x2566   :  { %6724 = vmatmul.mubr.msk.f32.vlgmr.msra.gmra.mxu0 %vm227_vm3, %v2755_v27 }
0x2567   :  { %6727 = vmatpush3.msk.msra.mxu0 %vm1193_vm4, %v7869_v11  ;;  %6740 = vmatprep.mubr.msk.f32.mxu0 %vm7408_vm1, %v7407_v3 }
0x2568   :  { %6728 = vmatprep.subr.mxu0 %v7407_v3 }
0x2569   :  { %6729 = vmatpush3.msra.mxu0 %v7874_v12 }
0x256a   :  { %6730 = vmatprep.subr.mxu0 %v7407_v3 }
0x256b   :  { %6731 = vmatpush3.msra.mxu0 %v7882_v13 }
0x256c   :  { %6732 = vmatprep.subr.mxu0 %v7407_v3 }
0x256d   :  { %6733 = vmatpush3.msra.mxu0 %v7889_v14 }
0x256e   :  { %6734 = vmatprep.subr.mxu0 %v7407_v3 }
0x256f   :  { %6735 = vmatpush3.msra.mxu0 %v7896_v15 }
0x2570   :  { %6736 = vmatprep.subr.mxu0 %v7407_v3 }
0x2571   :  { %6737 = vmatpush3.msra.mxu0 %v7903_v16 }
0x2572   :  { %6738 = vmatprep.subr.mxu0 %v7407_v3 }
0x2573   :  { %6739 = vmatpush3.msra.mxu0 %v7910_v18 }
0x2574   :  { %6771 = vmatprep.subr.mxu0 %v7407_v3 }
0x2626   :  { %v2825_v28 = vpop.f32.mrf.mxu0 }
0x2627   :  { %v2826_v37 = vadd.f32 %v7919_v19, %v2825_v28  ;;  %v8478_v28 = vld [vmem:[%s9075_s14] ss:$0 sm:$0xff] }
0x2628   :  { %v6725_v0 = vpop.f32.mrf.mxu0 }
0x2629   :  { %7332 = vtanh.f32 %v2826_v37 }
0x2636   :  { %v7333_v29 = vpop.eup %7332 }
0x2637   :  { %6741 = vmatmul.mubr.msk.f32.vlgmr.msra.gmra.mxu0 %vm1189_vm5, %v7333_v29 }
0x2638   :  { %6772 = vmatpush3.msra.mxu0 %v7818_v56  ;;  %6779 = vmatprep.mubr.msk.f32.mxu0 %vm7408_vm1, %v7407_v3 }
0x2639   :  { %6773 = vmatprep.subr.mxu0 %v7407_v3 }
0x263a   :  { %6774 = vmatpush3.msra.mxu0 %v7825_v57 }
0x263b   :  { %6775 = vmatprep.subr.mxu0 %v7407_v3 }
0x263c   :  { %6776 = vmatpush3.msra.mxu0 %v7831_v58 }
0x263d   :  { %6777 = vmatprep.subr.mxu0 %v7407_v3 }
0x263e   :  { %6778 = vmatpush3.msra.mxu0 %v7837_v59 }
0x263f   :  { %6782 = vmatprep.subr.mxu0 %v7407_v3 }
0x26f7   :  { %v2899_v30 = vpop.f32.mrf.mxu0 }
0x26f8   :  { %v8282_v32 = vadd.f32 %v7938_v24, %v2899_v30 }
0x26f9   :  { %v6742_v33 = vpop.f32.mrf.mxu0 }
0x26fa   :  { %v2904_v34 = vsub.f32 %v8282_v32, %v2903_v1  ;;  %v3054_v43 = vsub.f32 %v8246_v23, %v8282_v32 }
0x26fc   :  { %v2905_v4 = vmul.f32 %v2904_v34, %v8243_v22 }
0x26fe   :  { %v2906_v35 = vadd.f32 %v2905_v4, %v8207_v6 }
0x2700   :  { %6752 = vmatmul.mubr.msk.f32.vlgmr.msra.gmra.mxu1 %vm227_vm3, %v2906_v35 }
0x2701   :  { %6755 = vmatpush3.msk.msra.mxu1 %vm1193_vm4, %v7869_v11  ;;  %6768 = vmatprep.mubr.msk.f32.mxu1 %vm7408_vm1, %v7407_v3 }
0x2702   :  { %6756 = vmatprep.subr.mxu1 %v7407_v3 }
0x2703   :  { %6757 = vmatpush3.msra.mxu1 %v7874_v12 }
0x2704   :  { %6758 = vmatprep.subr.mxu1 %v7407_v3 }
0x2705   :  { %6759 = vmatpush3.msra.mxu1 %v7882_v13 }
0x2706   :  { %6760 = vmatprep.subr.mxu1 %v7407_v3 }
0x2707   :  { %6761 = vmatpush3.msra.mxu1 %v7889_v14 }
0x2708   :  { %6762 = vmatprep.subr.mxu1 %v7407_v3 }
0x2709   :  { %6763 = vmatpush3.msra.mxu1 %v7896_v15 }
0x270a   :  { %6764 = vmatprep.subr.mxu1 %v7407_v3 }
0x270b   :  { %6765 = vmatpush3.msra.mxu1 %v7903_v16 }
0x270c   :  { %6766 = vmatprep.subr.mxu1 %v7407_v3 }
0x270d   :  { %6767 = vmatpush3.msra.mxu1 %v7910_v18 }
0x270e   :  { %6799 = vmatprep.subr.mxu1 %v7407_v3 }
0x27c0   :  { %v2976_v36 = vpop.f32.mrf.mxu1 }
0x27c1   :  { %v2977_v17 = vadd.f32 %v7919_v19, %v2976_v36 }
0x27c2   :  { %v6753_v38 = vpop.f32.mrf.mxu1 }
0x27c3   :  { %7334 = vtanh.f32 %v2977_v17 }
0x27d0   :  { %v7335_v40 = vpop.eup %7334 }
0x27d1   :  { %6769 = vmatmul.mubr.msk.f32.vlgmr.msra.gmra.mxu1 %vm1189_vm5, %v7335_v40 }
0x27d2   :  { %6800 = vmatpush3.msra.mxu1 %v7818_v56  ;;  %6807 = vmatprep.mubr.msk.f32.mxu1 %vm7408_vm1, %v7407_v3 }
0x27d3   :  { %6801 = vmatprep.subr.mxu1 %v7407_v3 }
0x27d4   :  { %6802 = vmatpush3.msra.mxu1 %v7825_v57 }
0x27d5   :  { %6803 = vmatprep.subr.mxu1 %v7407_v3 }
0x27d6   :  { %6804 = vmatpush3.msra.mxu1 %v7831_v58 }
0x27d7   :  { %6805 = vmatprep.subr.mxu1 %v7407_v3 }
0x27d8   :  { %6806 = vmatpush3.msra.mxu1 %v7837_v59 }
0x27d9   :  { %6810 = vmatprep.subr.mxu1 %v7407_v3 }
0x2891   :  { %v3050_v41 = vpop.f32.mrf.mxu1 }
0x2892   :  { %v3051_v42 = vadd.f32 %v7938_v24, %v3050_v41  ;;  %v8532_v41 = vld [vmem:[%s9077_s16] ss:$0 sm:$0xff] }
0x2893   :  { %v6770_v44 = vpop.f32.mrf.mxu1 }
0x2894   :  { %v3055_v45 = vadd.f32 %v3054_v43, %v3051_v42  ;;  %v3205_v52 = vadd.f32 %v3051_v42, %v8282_v32 }
0x2896   :  { %v3056_v46 = vmul.f32 %v3055_v45, %v8243_v22  ;;  %v8443_v22 = vld [vmem:[%s9076_s15 + $0x20] sm:$0xff] }
0x2898   :  { %v3057_v47 = vadd.f32 %v3056_v46, %v8207_v6 }
0x289a   :  { %6780 = vmatmul.mubr.msk.f32.vlgmr.msra.gmra.mxu0 %vm227_vm3, %v3057_v47 }
0x289b   :  { %6783 = vmatpush3.msk.msra.mxu0 %vm1193_vm4, %v7869_v11  ;;  %6796 = vmatprep.mubr.msk.f32.mxu0 %vm7408_vm1, %v7407_v3 }
0x289c   :  { %6784 = vmatprep.subr.mxu0 %v7407_v3 }
0x289d   :  { %6785 = vmatpush3.msra.mxu0 %v7874_v12 }
0x289e   :  { %6786 = vmatprep.subr.mxu0 %v7407_v3 }
0x289f   :  { %6787 = vmatpush3.msra.mxu0 %v7882_v13 }
0x28a0   :  { %6788 = vmatprep.subr.mxu0 %v7407_v3 }
0x28a1   :  { %6789 = vmatpush3.msra.mxu0 %v7889_v14 }
0x28a2   :  { %6790 = vmatprep.subr.mxu0 %v7407_v3 }
0x28a3   :  { %6791 = vmatpush3.msra.mxu0 %v7896_v15 }
0x28a4   :  { %6792 = vmatprep.subr.mxu0 %v7407_v3 }
0x28a5   :  { %6793 = vmatpush3.msra.mxu0 %v7903_v16 }
0x28a6   :  { %6794 = vmatprep.subr.mxu0 %v7407_v3 }
0x28a7   :  { %6795 = vmatpush3.msra.mxu0 %v7910_v18 }
0x28a8   :  { %6827 = vmatprep.subr.mxu0 %v7407_v3 }
0x295a   :  { %v3127_v48 = vpop.f32.mrf.mxu0 }
0x295b   :  { %v3128_v49 = vadd.f32 %v7919_v19, %v3127_v48 }
0x295c   :  { %v6781_v50 = vpop.f32.mrf.mxu0 }
0x295d   :  { %7336 = vtanh.f32 %v3128_v49 }
0x296a   :  { %v7337_v51 = vpop.eup %7336 }
0x296b   :  { %6797 = vmatmul.mubr.msk.f32.vlgmr.msra.gmra.mxu0 %vm1189_vm5, %v7337_v51 }
0x296c   :  { %6828 = vmatpush3.msra.mxu0 %v7818_v56  ;;  %6835 = vmatprep.mubr.msk.f32.mxu0 %vm7408_vm1, %v7407_v3  ;;  %v3206_v56 = vmul.f32 3.0, %v3205_v52 }
0x296d   :  { %6829 = vmatprep.subr.mxu0 %v7407_v3 }
0x296e   :  { %6830 = vmatpush3.msra.mxu0 %v7825_v57  ;;  %v3207_v55 = vadd.f32 %v3206_v56, %v8246_v23  ;;  %v3210_v57 = vstv %s3209_s21  ;;  %v8450_v23 = vld [vmem:[%s9076_s15 + $0x18] sm:$0xff] }
0x296f   :  { %6831 = vmatprep.subr.mxu0 %v7407_v3 }
0x2970   :  { %6832 = vmatpush3.msra.mxu0 %v7831_v58 }
0x2971   :  { %6833 = vmatprep.subr.mxu0 %v7407_v3 }
0x2972   :  { %6834 = vmatpush3.msra.mxu0 %v7837_v59 }
0x2973   :  { %6838 = vmatprep.subr.mxu0 %v7407_v3 }
0x2a2b   :  { %v3201_v53 = vpop.f32.mrf.mxu0 }
0x2a2c   :  { %v3202_v54 = vadd.f32 %v7938_v24, %v3201_v53 }
0x2a2d   :  { %v6798_v60 = vpop.f32.mrf.mxu0 }
0x2a2e   :  { %v3208_v61 = vadd.f32 %v3207_v55, %v3202_v54 }
0x2a30   :  { %v3211_v62 = vmul.f32 %v3210_v57, %v3208_v61  ;;  %v3819_v57 = vstv %s3818_s1 }
0x2a32   :  { %v8358_v58 = vadd.f32 %v3211_v62, %v8207_v6 }
0x2a34   :  { %6808 = vmatmul.mubr.msk.f32.vlgmr.msra.gmra.mxu1 %vm227_vm3, %v8358_v58 }
0x2a35   :  { %6811 = vmatpush3.msk.msra.mxu1 %vm1193_vm4, %v7869_v11  ;;  %6824 = vmatprep.mubr.msk.f32.mxu1 %vm7408_vm1, %v7407_v3 }
0x2a36   :  { %6812 = vmatprep.subr.mxu1 %v7407_v3 }
0x2a37   :  { %6813 = vmatpush3.msra.mxu1 %v7874_v12 }
0x2a38   :  { %6814 = vmatprep.subr.mxu1 %v7407_v3 }
0x2a39   :  { %6815 = vmatpush3.msra.mxu1 %v7882_v13 }
0x2a3a   :  { %6816 = vmatprep.subr.mxu1 %v7407_v3 }
0x2a3b   :  { %6817 = vmatpush3.msra.mxu1 %v7889_v14  ;;  %v8384_v14 = vld [vmem:[%s9074_s13 + $0x18] sm:$0xff] }
0x2a3c   :  { %6818 = vmatprep.subr.mxu1 %v7407_v3 }
0x2a3d   :  { %6819 = vmatpush3.msra.mxu1 %v7896_v15  ;;  %v8393_v15 = vld [vmem:[%s9074_s13 + $0x10] sm:$0xff] }
0x2a3e   :  { %6820 = vmatprep.subr.mxu1 %v7407_v3 }
0x2a3f   :  { %6821 = vmatpush3.msra.mxu1 %v7903_v16  ;;  %v8400_v16 = vld [vmem:[%s9074_s13 + $0x8] sm:$0xff] }
0x2a40   :  { %6822 = vmatprep.subr.mxu1 %v7407_v3 }
0x2a41   :  { %6823 = vmatpush3.msra.mxu1 %v7910_v18  ;;  %v8407_v18 = vld [vmem:[%s9074_s13] sm:$0xff] }
0x2a42   :  { %6855 = vmatprep.subr.mxu1 %v7407_v3 }
0x2af4   :  { %v3283_v59 = vpop.f32.mrf.mxu1 }
0x2af5   :  { %v3284_v11 = vadd.f32 %v7919_v19, %v3283_v59 }
0x2af6   :  { %v6809_v12 = vpop.f32.mrf.mxu1 }
0x2af7   :  { %7338 = vtanh.f32 %v3284_v11 }
0x2b04   :  { %v7339_v13 = vpop.eup %7338 }
0x2b05   :  { %6825 = vmatmul.mubr.msk.f32.vlgmr.msra.gmra.mxu1 %vm1189_vm5, %v7339_v13 }
0x2b06   :  { %6856 = vmatpush3.msra.mxu1 %v8384_v14  ;;  %6863 = vmatprep.mubr.msk.f32.mxu1 %vm7408_vm1, %v7407_v3 }
0x2b07   :  { %6857 = vmatprep.subr.mxu1 %v7407_v3 }
0x2b08   :  { %6858 = vmatpush3.msra.mxu1 %v8393_v15 }
0x2b09   :  { %6859 = vmatprep.subr.mxu1 %v7407_v3 }
0x2b0a   :  { %6860 = vmatpush3.msra.mxu1 %v8400_v16 }
0x2b0b   :  { %6861 = vmatprep.subr.mxu1 %v7407_v3 }
0x2b0c   :  { %6862 = vmatpush3.msra.mxu1 %v8407_v18 }
0x2b0d   :  { %6866 = vmatprep.subr.mxu1 %v7407_v3 }
0x2bc5   :  { %v3357_v19 = vpop.f32.mrf.mxu1 }
0x2bc6   :  { %v8417_v2 = vadd.f32 %v7938_v24, %v3357_v19 }
0x2bc7   :  { %v6826_v5 = vpop.f32.mrf.mxu1 }
0x2bc8   :  { %v3362_v7 = vmul.f32 %v8414_v63, %v8417_v2  ;;  %v3512_v1 = vmul.f32 0.33333334, %v8417_v2 }
0x2bca   :  { %v3363_v39 = vmul.f32 0.33333334, %v3362_v7 }
0x2bcc   :  { %v3364_v9 = vadd.f32 %v3363_v39, %v8358_v58 }
0x2bce   :  { %6836 = vmatmul.mubr.msk.f32.vlgmr.msra.gmra.mxu0 %vm227_vm3, %v3364_v9 }
0x2bcf   :  { %6839 = vmatpush3.msk.msra.mxu0 %vm1193_vm4, %v8426_v20  ;;  %6852 = vmatprep.mubr.msk.f32.mxu0 %vm7408_vm1, %v7407_v3 }
0x2bd0   :  { %6840 = vmatprep.subr.mxu0 %v7407_v3 }
0x2bd1   :  { %6841 = vmatpush3.msra.mxu0 %v8436_v21 }
0x2bd2   :  { %6842 = vmatprep.subr.mxu0 %v7407_v3 }
0x2bd3   :  { %6843 = vmatpush3.msra.mxu0 %v8443_v22 }
0x2bd4   :  { %6844 = vmatprep.subr.mxu0 %v7407_v3 }
0x2bd5   :  { %6845 = vmatpush3.msra.mxu0 %v8450_v23 }
0x2bd6   :  { %6846 = vmatprep.subr.mxu0 %v7407_v3 }
0x2bd7   :  { %6847 = vmatpush3.msra.mxu0 %v8457_v25 }
0x2bd8   :  { %6848 = vmatprep.subr.mxu0 %v7407_v3 }
0x2bd9   :  { %6849 = vmatpush3.msra.mxu0 %v8464_v31 }
0x2bda   :  { %6850 = vmatprep.subr.mxu0 %v7407_v3 }
0x2bdb   :  { %6851 = vmatpush3.msra.mxu0 %v8471_v26 }
0x2bdc   :  { %6883 = vmatprep.subr.mxu0 %v7407_v3 }
0x2c8e   :  { %v3434_v27 = vpop.f32.mrf.mxu0 }
0x2c8f   :  { %v3435_v37 = vadd.f32 %v8478_v28, %v3434_v27 }
0x2c90   :  { %v6837_v0 = vpop.f32.mrf.mxu0 }
0x2c91   :  { %7340 = vtanh.f32 %v3435_v37 }
0x2c9e   :  { %v7341_v29 = vpop.eup %7340 }
0x2c9f   :  { %6853 = vmatmul.mubr.msk.f32.vlgmr.msra.gmra.mxu0 %vm1189_vm5, %v7341_v29 }
0x2ca0   :  { %6884 = vmatpush3.msra.mxu0 %v8384_v14  ;;  %6891 = vmatprep.mubr.msk.f32.mxu0 %vm7408_vm1, %v7407_v3 }
0x2ca1   :  { %6885 = vmatprep.subr.mxu0 %v7407_v3 }
0x2ca2   :  { %6886 = vmatpush3.msra.mxu0 %v8393_v15 }
0x2ca3   :  { %6887 = vmatprep.subr.mxu0 %v7407_v3 }
0x2ca4   :  { %6888 = vmatpush3.msra.mxu0 %v8400_v16 }
0x2ca5   :  { %6889 = vmatprep.subr.mxu0 %v7407_v3 }
0x2ca6   :  { %6890 = vmatpush3.msra.mxu0 %v8407_v18 }
0x2ca7   :  { %6894 = vmatprep.subr.mxu0 %v7407_v3 }
0x2d5f   :  { %v3508_v30 = vpop.f32.mrf.mxu0 }
0x2d60   :  { %v8493_v32 = vadd.f32 %v7938_v24, %v3508_v30 }
0x2d61   :  { %v6854_v33 = vpop.f32.mrf.mxu0 }
0x2d62   :  { %v3513_v34 = vsub.f32 %v8493_v32, %v3512_v1  ;;  %v3663_v43 = vsub.f32 %v8417_v2, %v8493_v32 }
0x2d64   :  { %v3514_v4 = vmul.f32 %v3513_v34, %v8414_v63 }
0x2d66   :  { %v3515_v35 = vadd.f32 %v3514_v4, %v8358_v58 }
0x2d68   :  { %6864 = vmatmul.mubr.msk.f32.vlgmr.msra.gmra.mxu1 %vm227_vm3, %v3515_v35 }
0x2d69   :  { %6867 = vmatpush3.msk.msra.mxu1 %vm1193_vm4, %v8426_v20  ;;  %6880 = vmatprep.mubr.msk.f32.mxu1 %vm7408_vm1, %v7407_v3 }
0x2d6a   :  { %6868 = vmatprep.subr.mxu1 %v7407_v3 }
0x2d6b   :  { %6869 = vmatpush3.msra.mxu1 %v8436_v21 }
0x2d6c   :  { %6870 = vmatprep.subr.mxu1 %v7407_v3 }
0x2d6d   :  { %6871 = vmatpush3.msra.mxu1 %v8443_v22 }
0x2d6e   :  { %6872 = vmatprep.subr.mxu1 %v7407_v3 }
0x2d6f   :  { %6873 = vmatpush3.msra.mxu1 %v8450_v23 }
0x2d70   :  { %6874 = vmatprep.subr.mxu1 %v7407_v3 }
0x2d71   :  { %6875 = vmatpush3.msra.mxu1 %v8457_v25 }
0x2d72   :  { %6876 = vmatprep.subr.mxu1 %v7407_v3 }
0x2d73   :  { %6877 = vmatpush3.msra.mxu1 %v8464_v31 }
0x2d74   :  { %6878 = vmatprep.subr.mxu1 %v7407_v3 }
0x2d75   :  { %6879 = vmatpush3.msra.mxu1 %v8471_v26 }
0x2d76   :  { %6911 = vmatprep.subr.mxu1 %v7407_v3 }
0x2e28   :  { %v3585_v24 = vpop.f32.mrf.mxu1 }
0x2e29   :  { %v3586_v36 = vadd.f32 %v8478_v28, %v3585_v24 }
0x2e2a   :  { %v6865_v17 = vpop.f32.mrf.mxu1 }
0x2e2b   :  { %7342 = vtanh.f32 %v3586_v36 }
0x2e38   :  { %v7343_v38 = vpop.eup %7342 }
0x2e39   :  { %6881 = vmatmul.mubr.msk.f32.vlgmr.msra.gmra.mxu1 %vm1189_vm5, %v7343_v38 }
0x2e3a   :  { %6912 = vmatpush3.msra.mxu1 %v8384_v14  ;;  %6919 = vmatprep.mubr.msk.f32.mxu1 %vm7408_vm1, %v7407_v3 }
0x2e3b   :  { %6913 = vmatprep.subr.mxu1 %v7407_v3 }
0x2e3c   :  { %6914 = vmatpush3.msra.mxu1 %v8393_v15 }
0x2e3d   :  { %6915 = vmatprep.subr.mxu1 %v7407_v3 }
0x2e3e   :  { %6916 = vmatpush3.msra.mxu1 %v8400_v16 }
0x2e3f   :  { %6917 = vmatprep.subr.mxu1 %v7407_v3 }
0x2e40   :  { %6918 = vmatpush3.msra.mxu1 %v8407_v18 }
0x2e41   :  { %6922 = vmatprep.subr.mxu1 %v7407_v3 }
0x2ef9   :  { %v3659_v40 = vpop.f32.mrf.mxu1 }
0x2efa   :  { %v3660_v42 = vadd.f32 %v8532_v41, %v3659_v40 }
0x2efb   :  { %v6882_v44 = vpop.f32.mrf.mxu1 }
0x2efc   :  { %v3664_v45 = vadd.f32 %v3663_v43, %v3660_v42  ;;  %v3814_v52 = vadd.f32 %v3660_v42, %v8493_v32 }
0x2efe   :  { %v3665_v46 = vmul.f32 %v3664_v45, %v8414_v63  ;;  %v3815_v56 = vmul.f32 3.0, %v3814_v52 }
0x2f00   :  { %v3666_v47 = vadd.f32 %v3665_v46, %v8358_v58  ;;  %v3816_v55 = vadd.f32 %v3815_v56, %v8417_v2  ;;  %v8610_v2 = vstv %s8607_s22 }
0x2f02   :  { %6892 = vmatmul.mubr.msk.f32.vlgmr.msra.gmra.mxu0 %vm227_vm3, %v3666_v47 }
0x2f03   :  { %6895 = vmatpush3.msk.msra.mxu0 %vm1193_vm4, %v8426_v20  ;;  %6908 = vmatprep.mubr.msk.f32.mxu0 %vm7408_vm1, %v7407_v3 }
0x2f04   :  { %6896 = vmatprep.subr.mxu0 %v7407_v3 }
0x2f05   :  { %6897 = vmatpush3.msra.mxu0 %v8436_v21 }
0x2f06   :  { %6898 = vmatprep.subr.mxu0 %v7407_v3 }
0x2f07   :  { %6899 = vmatpush3.msra.mxu0 %v8443_v22 }
0x2f08   :  { %6900 = vmatprep.subr.mxu0 %v7407_v3 }
0x2f09   :  { %6901 = vmatpush3.msra.mxu0 %v8450_v23 }
0x2f0a   :  { %6902 = vmatprep.subr.mxu0 %v7407_v3 }
0x2f0b   :  { %6903 = vmatpush3.msra.mxu0 %v8457_v25 }
0x2f0c   :  { %6904 = vmatprep.subr.mxu0 %v7407_v3 }
0x2f0d   :  { %6905 = vmatpush3.msra.mxu0 %v8464_v31 }
0x2f0e   :  { %6906 = vmatprep.subr.mxu0 %v7407_v3 }
0x2f0f   :  { %6907 = vmatpush3.msra.mxu0 %v8471_v26 }
0x2f10   :  { %6939 = vmatprep.subr.mxu0 %v7407_v3 }
0x2fc2   :  { %v3736_v48 = vpop.f32.mrf.mxu0 }
0x2fc3   :  { %v3737_v49 = vadd.f32 %v8478_v28, %v3736_v48 }
0x2fc4   :  { %v6893_v50 = vpop.f32.mrf.mxu0 }
0x2fc5   :  { %7344 = vtanh.f32 %v3737_v49 }
0x2fd2   :  { %v7345_v51 = vpop.eup %7344 }
0x2fd3   :  { %6909 = vmatmul.mubr.msk.f32.vlgmr.msra.gmra.mxu0 %vm1189_vm5, %v7345_v51 }
0x2fd4   :  { %6940 = vmatpush3.msra.mxu0 %v8384_v14  ;;  %6947 = vmatprep.mubr.msk.f32.mxu0 %vm7408_vm1, %v7407_v3 }
0x2fd5   :  { %6941 = vmatprep.subr.mxu0 %v7407_v3 }
0x2fd6   :  { %6942 = vmatpush3.msra.mxu0 %v8393_v15 }
0x2fd7   :  { %6943 = vmatprep.subr.mxu0 %v7407_v3 }
0x2fd8   :  { %6944 = vmatpush3.msra.mxu0 %v8400_v16 }
0x2fd9   :  { %6945 = vmatprep.subr.mxu0 %v7407_v3 }
0x2fda   :  { %6946 = vmatpush3.msra.mxu0 %v8407_v18 }
0x2fdb   :  { %6950 = vmatprep.subr.mxu0 %v7407_v3 }
0x3093   :  { %v3810_v53 = vpop.f32.mrf.mxu0 }
0x3094   :  { %v3811_v54 = vadd.f32 %v8532_v41, %v3810_v53 }
0x3095   :  { %v6910_v60 = vpop.f32.mrf.mxu0 }
0x3096   :  { %v3817_v61 = vadd.f32 %v3816_v55, %v3811_v54  ;;  %v4428_v60 = vstv %s4427_s2 }
0x3098   :  { %v3820_v62 = vmul.f32 %v3819_v57, %v3817_v61 }
0x309a   :  { %v8574_v59 = vadd.f32 %v3820_v62, %v8358_v58 }
0x309c   :  { %6920 = vmatmul.mubr.msk.f32.vlgmr.msra.gmra.mxu1 %vm227_vm3, %v8574_v59 }
0x309d   :  { %6923 = vmatpush3.msk.msra.mxu1 %vm1193_vm4, %v8426_v20  ;;  %6936 = vmatprep.mubr.msk.f32.mxu1 %vm7408_vm1, %v7407_v3 }
0x309e   :  { %6924 = vmatprep.subr.mxu1 %v7407_v3 }
0x309f   :  { %6925 = vmatpush3.msra.mxu1 %v8436_v21 }
0x30a0   :  { %6926 = vmatprep.subr.mxu1 %v7407_v3 }
0x30a1   :  { %6927 = vmatpush3.msra.mxu1 %v8443_v22 }
0x30a2   :  { %6928 = vmatprep.subr.mxu1 %v7407_v3 }
0x30a3   :  { %6929 = vmatpush3.msra.mxu1 %v8450_v23 }
0x30a4   :  { %6930 = vmatprep.subr.mxu1 %v7407_v3 }
0x30a5   :  { %6931 = vmatpush3.msra.mxu1 %v8457_v25 }
0x30a6   :  { %6932 = vmatprep.subr.mxu1 %v7407_v3 }
0x30a7   :  { %6933 = vmatpush3.msra.mxu1 %v8464_v31 }
0x30a8   :  { %6934 = vmatprep.subr.mxu1 %v7407_v3 }
0x30a9   :  { %6935 = vmatpush3.msra.mxu1 %v8471_v26 }
0x30aa   :  { %6967 = vmatprep.subr.mxu1 %v7407_v3 }
0x315c   :  { %v3892_v11 = vpop.f32.mrf.mxu1 }
0x315d   :  { %v3893_v12 = vadd.f32 %v8478_v28, %v3892_v11 }
0x315e   :  { %v6921_v13 = vpop.f32.mrf.mxu1 }
0x315f   :  { %7346 = vtanh.f32 %v3893_v12 }
0x316c   :  { %v7347_v19 = vpop.eup %7346 }
0x316d   :  { %6937 = vmatmul.mubr.msk.f32.vlgmr.msra.gmra.mxu1 %vm1189_vm5, %v7347_v19 }
0x316e   :  { %6968 = vmatpush3.msra.mxu1 %v8384_v14  ;;  %6975 = vmatprep.mubr.msk.f32.mxu1 %vm7408_vm1, %v7407_v3 }
0x316f   :  { %6969 = vmatprep.subr.mxu1 %v7407_v3 }
0x3170   :  { %6970 = vmatpush3.msra.mxu1 %v8393_v15 }
0x3171   :  { %6971 = vmatprep.subr.mxu1 %v7407_v3 }
0x3172   :  { %6972 = vmatpush3.msra.mxu1 %v8400_v16 }
0x3173   :  { %6973 = vmatprep.subr.mxu1 %v7407_v3 }
0x3174   :  { %6974 = vmatpush3.msra.mxu1 %v8407_v18 }
0x3175   :  { %6978 = vmatprep.subr.mxu1 %v7407_v3 }
0x322d   :  { %v3966_v63 = vpop.f32.mrf.mxu1 }
0x322e   :  { %v8613_v5 = vadd.f32 %v8532_v41, %v3966_v63 }
0x322f   :  { %v6938_v7 = vpop.f32.mrf.mxu1 }
0x3230   :  { %v3971_v39 = vmul.f32 %v8610_v2, %v8613_v5  ;;  %v4121_v33 = vmul.f32 0.33333334, %v8613_v5  ;;  %v8761_v7 = vstv %s8758_s20  ;;  %s5645_s20 = smul.f32 0.125, %s8909_s6 }
0x3232   :  { %v3972_v9 = vmul.f32 0.33333334, %v3971_v39 }
0x3234   :  { %v3973_v27 = vadd.f32 %v3972_v9, %v8574_v59 }
0x3236   :  { %6948 = vmatmul.mubr.msk.f32.vlgmr.msra.gmra.mxu0 %vm227_vm3, %v3973_v27 }
0x3237   :  { %6951 = vmatpush3.msk.msra.mxu0 %vm1193_vm4, %v8426_v20  ;;  %6964 = vmatprep.mubr.msk.f32.mxu0 %vm7408_vm1, %v7407_v3 }
0x3238   :  { %6952 = vmatprep.subr.mxu0 %v7407_v3 }
0x3239   :  { %6953 = vmatpush3.msra.mxu0 %v8436_v21 }
0x323a   :  { %6954 = vmatprep.subr.mxu0 %v7407_v3 }
0x323b   :  { %6955 = vmatpush3.msra.mxu0 %v8443_v22 }
0x323c   :  { %6956 = vmatprep.subr.mxu0 %v7407_v3 }
0x323d   :  { %6957 = vmatpush3.msra.mxu0 %v8450_v23 }
0x323e   :  { %6958 = vmatprep.subr.mxu0 %v7407_v3 }
0x323f   :  { %6959 = vmatpush3.msra.mxu0 %v8457_v25 }
0x3240   :  { %6960 = vmatprep.subr.mxu0 %v7407_v3 }
0x3241   :  { %6961 = vmatpush3.msra.mxu0 %v8464_v31 }
0x3242   :  { %6962 = vmatprep.subr.mxu0 %v7407_v3 }
0x3243   :  { %6963 = vmatpush3.msra.mxu0 %v8471_v26 }
0x3244   :  { %6995 = vmatprep.subr.mxu0 %v7407_v3 }
0x32f6   :  { %v4043_v37 = vpop.f32.mrf.mxu0 }
0x32f7   :  { %v4044_v0 = vadd.f32 %v8478_v28, %v4043_v37 }
0x32f8   :  { %v6949_v29 = vpop.f32.mrf.mxu0 }
0x32f9   :  { %7348 = vtanh.f32 %v4044_v0 }
0x3306   :  { %v7349_v30 = vpop.eup %7348 }
0x3307   :  { %6965 = vmatmul.mubr.msk.f32.vlgmr.msra.gmra.mxu0 %vm1189_vm5, %v7349_v30 }
0x3308   :  { %6996 = vmatpush3.msra.mxu0 %v8384_v14  ;;  %7003 = vmatprep.mubr.msk.f32.mxu0 %vm7408_vm1, %v7407_v3 }
0x3309   :  { %6997 = vmatprep.subr.mxu0 %v7407_v3 }
0x330a   :  { %6998 = vmatpush3.msra.mxu0 %v8393_v15 }
0x330b   :  { %6999 = vmatprep.subr.mxu0 %v7407_v3 }
0x330c   :  { %7000 = vmatpush3.msra.mxu0 %v8400_v16 }
0x330d   :  { %7001 = vmatprep.subr.mxu0 %v7407_v3 }
0x330e   :  { %7002 = vmatpush3.msra.mxu0 %v8407_v18 }
0x330f   :  { %7006 = vmatprep.subr.mxu0 %v7407_v3 }
0x33c7   :  { %v4117_v32 = vpop.f32.mrf.mxu0 }
0x33c8   :  { %v8649_v1 = vadd.f32 %v8532_v41, %v4117_v32 }
0x33c9   :  { %v6966_v34 = vpop.f32.mrf.mxu0 }
0x33ca   :  { %v4122_v4 = vsub.f32 %v8649_v1, %v4121_v33  ;;  %v4272_v44 = vsub.f32 %v8613_v5, %v8649_v1 }
0x33cc   :  { %v4123_v35 = vmul.f32 %v4122_v4, %v8610_v2 }
0x33ce   :  { %v4124_v24 = vadd.f32 %v4123_v35, %v8574_v59 }
0x33d0   :  { %6976 = vmatmul.mubr.msk.f32.vlgmr.msra.gmra.mxu1 %vm227_vm3, %v4124_v24 }
0x33d1   :  { %6979 = vmatpush3.msk.msra.mxu1 %vm1193_vm4, %v8426_v20  ;;  %6992 = vmatprep.mubr.msk.f32.mxu1 %vm7408_vm1, %v7407_v3 }
0x33d2   :  { %6980 = vmatprep.subr.mxu1 %v7407_v3 }
0x33d3   :  { %6981 = vmatpush3.msra.mxu1 %v8436_v21 }
0x33d4   :  { %6982 = vmatprep.subr.mxu1 %v7407_v3 }
0x33d5   :  { %6983 = vmatpush3.msra.mxu1 %v8443_v22 }
0x33d6   :  { %6984 = vmatprep.subr.mxu1 %v7407_v3 }
0x33d7   :  { %6985 = vmatpush3.msra.mxu1 %v8450_v23 }
0x33d8   :  { %6986 = vmatprep.subr.mxu1 %v7407_v3 }
0x33d9   :  { %6987 = vmatpush3.msra.mxu1 %v8457_v25 }
0x33da   :  { %6988 = vmatprep.subr.mxu1 %v7407_v3 }
0x33db   :  { %6989 = vmatpush3.msra.mxu1 %v8464_v31 }
0x33dc   :  { %6990 = vmatprep.subr.mxu1 %v7407_v3 }
0x33dd   :  { %6991 = vmatpush3.msra.mxu1 %v8471_v26 }
0x33de   :  { %7023 = vmatprep.subr.mxu1 %v7407_v3 }
0x3490   :  { %v4194_v36 = vpop.f32.mrf.mxu1 }
0x3491   :  { %v4195_v17 = vadd.f32 %v8478_v28, %v4194_v36 }
0x3492   :  { %v6977_v38 = vpop.f32.mrf.mxu1 }
0x3493   :  { %7350 = vtanh.f32 %v4195_v17 }
0x34a0   :  { %v7351_v40 = vpop.eup %7350 }
0x34a1   :  { %6993 = vmatmul.mubr.msk.f32.vlgmr.msra.gmra.mxu1 %vm1189_vm5, %v7351_v40 }
0x34a2   :  { %7024 = vmatpush3.msra.mxu1 %v8384_v14  ;;  %7031 = vmatprep.mubr.msk.f32.mxu1 %vm7408_vm1, %v7407_v3 }
0x34a3   :  { %7025 = vmatprep.subr.mxu1 %v7407_v3 }
0x34a4   :  { %7026 = vmatpush3.msra.mxu1 %v8393_v15 }
0x34a5   :  { %7027 = vmatprep.subr.mxu1 %v7407_v3 }
0x34a6   :  { %7028 = vmatpush3.msra.mxu1 %v8400_v16 }
0x34a7   :  { %7029 = vmatprep.subr.mxu1 %v7407_v3 }
0x34a8   :  { %7030 = vmatpush3.msra.mxu1 %v8407_v18 }
0x34a9   :  { %7034 = vmatprep.subr.mxu1 %v7407_v3 }
0x3561   :  { %v4268_v42 = vpop.f32.mrf.mxu1 }
0x3562   :  { %v4269_v43 = vadd.f32 %v8532_v41, %v4268_v42 }
0x3563   :  { %v6994_v45 = vpop.f32.mrf.mxu1 }
0x3564   :  { %v4273_v46 = vadd.f32 %v4272_v44, %v4269_v43  ;;  %v4423_v56 = vadd.f32 %v4269_v43, %v8649_v1 }
0x3566   :  { %v4274_v47 = vmul.f32 %v4273_v46, %v8610_v2  ;;  %v4424_v53 = vmul.f32 3.0, %v4423_v56 }
0x3568   :  { %v4275_v48 = vadd.f32 %v4274_v47, %v8574_v59  ;;  %v4425_v57 = vadd.f32 %v4424_v53, %v8613_v5 }
0x356a   :  { %7004 = vmatmul.mubr.msk.f32.vlgmr.msra.gmra.mxu0 %vm227_vm3, %v4275_v48 }
0x356b   :  { %7007 = vmatpush3.msk.msra.mxu0 %vm1193_vm4, %v8426_v20  ;;  %7020 = vmatprep.mubr.msk.f32.mxu0 %vm7408_vm1, %v7407_v3 }
0x356c   :  { %7008 = vmatprep.subr.mxu0 %v7407_v3 }
0x356d   :  { %7009 = vmatpush3.msra.mxu0 %v8436_v21 }
0x356e   :  { %7010 = vmatprep.subr.mxu0 %v7407_v3 }
0x356f   :  { %7011 = vmatpush3.msra.mxu0 %v8443_v22 }
0x3570   :  { %7012 = vmatprep.subr.mxu0 %v7407_v3 }
0x3571   :  { %7013 = vmatpush3.msra.mxu0 %v8450_v23 }
0x3572   :  { %7014 = vmatprep.subr.mxu0 %v7407_v3 }
0x3573   :  { %7015 = vmatpush3.msra.mxu0 %v8457_v25 }
0x3574   :  { %7016 = vmatprep.subr.mxu0 %v7407_v3 }
0x3575   :  { %7017 = vmatpush3.msra.mxu0 %v8464_v31 }
0x3576   :  { %7018 = vmatprep.subr.mxu0 %v7407_v3 }
0x3577   :  { %7019 = vmatpush3.msra.mxu0 %v8471_v26 }
0x3578   :  { %7051 = vmatprep.subr.mxu0 %v7407_v3 }
0x362a   :  { %v4345_v49 = vpop.f32.mrf.mxu0 }
0x362b   :  { %v4346_v50 = vadd.f32 %v8478_v28, %v4345_v49 }
0x362c   :  { %v7005_v51 = vpop.f32.mrf.mxu0 }
0x362d   :  { %7352 = vtanh.f32 %v4346_v50 }
0x363a   :  { %v7353_v52 = vpop.eup %7352 }
0x363b   :  { %7021 = vmatmul.mubr.msk.f32.vlgmr.msra.gmra.mxu0 %vm1189_vm5, %v7353_v52 }
0x363c   :  { %7052 = vmatpush3.msra.mxu0 %v8384_v14  ;;  %7059 = vmatprep.mubr.msk.f32.mxu0 %vm7408_vm1, %v7407_v3 }
0x363d   :  { %7053 = vmatprep.subr.mxu0 %v7407_v3 }
0x363e   :  { %7054 = vmatpush3.msra.mxu0 %v8393_v15 }
0x363f   :  { %7055 = vmatprep.subr.mxu0 %v7407_v3 }
0x3640   :  { %7056 = vmatpush3.msra.mxu0 %v8400_v16 }
0x3641   :  { %7057 = vmatprep.subr.mxu0 %v7407_v3 }
0x3642   :  { %7058 = vmatpush3.msra.mxu0 %v8407_v18 }
0x3643   :  { %7062 = vmatprep.subr.mxu0 %v7407_v3 }
0x36fb   :  { %v4419_v54 = vpop.f32.mrf.mxu0 }
0x36fc   :  { %v4420_v55 = vadd.f32 %v8532_v41, %v4419_v54 }
0x36fd   :  { %v7022_v61 = vpop.f32.mrf.mxu0 }
0x36fe   :  { %v4426_v62 = vadd.f32 %v4425_v57, %v4420_v55 }
0x3700   :  { %v4429_v11 = vmul.f32 %v4428_v60, %v4426_v62  ;;  %v5037_v62 = vstv %s5036_s5 }
0x3702   :  { %v8725_v12 = vadd.f32 %v4429_v11, %v8574_v59 }
0x3704   :  { %7032 = vmatmul.mubr.msk.f32.vlgmr.msra.gmra.mxu1 %vm227_vm3, %v8725_v12 }
0x3705   :  { %7035 = vmatpush3.msk.msra.mxu1 %vm1193_vm4, %v8426_v20  ;;  %7048 = vmatprep.mubr.msk.f32.mxu1 %vm7408_vm1, %v7407_v3 }
0x3706   :  { %7036 = vmatprep.subr.mxu1 %v7407_v3 }
0x3707   :  { %7037 = vmatpush3.msra.mxu1 %v8436_v21 }
0x3708   :  { %7038 = vmatprep.subr.mxu1 %v7407_v3 }
0x3709   :  { %7039 = vmatpush3.msra.mxu1 %v8443_v22 }
0x370a   :  { %7040 = vmatprep.subr.mxu1 %v7407_v3 }
0x370b   :  { %7041 = vmatpush3.msra.mxu1 %v8450_v23 }
0x370c   :  { %7042 = vmatprep.subr.mxu1 %v7407_v3 }
0x370d   :  { %7043 = vmatpush3.msra.mxu1 %v8457_v25 }
0x370e   :  { %7044 = vmatprep.subr.mxu1 %v7407_v3 }
0x370f   :  { %7045 = vmatpush3.msra.mxu1 %v8464_v31 }
0x3710   :  { %7046 = vmatprep.subr.mxu1 %v7407_v3 }
0x3711   :  { %7047 = vmatpush3.msra.mxu1 %v8471_v26 }
0x3712   :  { %7079 = vmatprep.subr.mxu1 %v7407_v3 }
0x37c4   :  { %v4501_v13 = vpop.f32.mrf.mxu1 }
0x37c5   :  { %v4502_v19 = vadd.f32 %v8478_v28, %v4501_v13 }
0x37c6   :  { %v7033_v63 = vpop.f32.mrf.mxu1 }
0x37c7   :  { %7354 = vtanh.f32 %v4502_v19 }
0x37d4   :  { %v7355_v2 = vpop.eup %7354 }
0x37d5   :  { %7049 = vmatmul.mubr.msk.f32.vlgmr.msra.gmra.mxu1 %vm1189_vm5, %v7355_v2 }
0x37d6   :  { %7080 = vmatpush3.msra.mxu1 %v8384_v14  ;;  %7087 = vmatprep.mubr.msk.f32.mxu1 %vm7408_vm1, %v7407_v3 }
0x37d7   :  { %7081 = vmatprep.subr.mxu1 %v7407_v3 }
0x37d8   :  { %7082 = vmatpush3.msra.mxu1 %v8393_v15 }
0x37d9   :  { %7083 = vmatprep.subr.mxu1 %v7407_v3 }
0x37da   :  { %7084 = vmatpush3.msra.mxu1 %v8400_v16 }
0x37db   :  { %7085 = vmatprep.subr.mxu1 %v7407_v3 }
0x37dc   :  { %7086 = vmatpush3.msra.mxu1 %v8407_v18 }
0x37dd   :  { %7090 = vmatprep.subr.mxu1 %v7407_v3 }
0x3895   :  { %v4575_v5 = vpop.f32.mrf.mxu1 }
0x3896   :  { %v8764_v39 = vadd.f32 %v8532_v41, %v4575_v5 }
0x3897   :  { %v7050_v9 = vpop.f32.mrf.mxu1 }
0x3898   :  { %v4580_v27 = vmul.f32 %v8761_v7, %v8764_v39  ;;  %v4730_v4 = vmul.f32 0.33333334, %v8764_v39 }
0x389a   :  { %v4581_v37 = vmul.f32 0.33333334, %v4580_v27  ;;  %v8912_v27 = vstv %s8909_s6 }
0x389c   :  { %v4582_v0 = vadd.f32 %v4581_v37, %v8725_v12 }
0x389e   :  { %7060 = vmatmul.mubr.msk.f32.vlgmr.msra.gmra.mxu0 %vm227_vm3, %v4582_v0 }
0x389f   :  { %7063 = vmatpush3.msk.msra.mxu0 %vm1193_vm4, %v8426_v20  ;;  %7076 = vmatprep.mubr.msk.f32.mxu0 %vm7408_vm1, %v7407_v3 }
0x38a0   :  { %7064 = vmatprep.subr.mxu0 %v7407_v3 }
0x38a1   :  { %7065 = vmatpush3.msra.mxu0 %v8436_v21 }
0x38a2   :  { %7066 = vmatprep.subr.mxu0 %v7407_v3 }
0x38a3   :  { %7067 = vmatpush3.msra.mxu0 %v8443_v22 }
0x38a4   :  { %7068 = vmatprep.subr.mxu0 %v7407_v3 }
0x38a5   :  { %7069 = vmatpush3.msra.mxu0 %v8450_v23 }
0x38a6   :  { %7070 = vmatprep.subr.mxu0 %v7407_v3 }
0x38a7   :  { %7071 = vmatpush3.msra.mxu0 %v8457_v25 }
0x38a8   :  { %7072 = vmatprep.subr.mxu0 %v7407_v3 }
0x38a9   :  { %7073 = vmatpush3.msra.mxu0 %v8464_v31 }
0x38aa   :  { %7074 = vmatprep.subr.mxu0 %v7407_v3 }
0x38ab   :  { %7075 = vmatpush3.msra.mxu0 %v8471_v26 }
0x38ac   :  { %7107 = vmatprep.subr.mxu0 %v7407_v3 }
0x395e   :  { %v4652_v29 = vpop.f32.mrf.mxu0 }
0x395f   :  { %v4653_v30 = vadd.f32 %v8478_v28, %v4652_v29 }
0x3960   :  { %v7061_v32 = vpop.f32.mrf.mxu0 }
0x3961   :  { %7356 = vtanh.f32 %v4653_v30 }
0x396e   :  { %v7357_v1 = vpop.eup %7356 }
0x396f   :  { %7077 = vmatmul.mubr.msk.f32.vlgmr.msra.gmra.mxu0 %vm1189_vm5, %v7357_v1 }
0x3970   :  { %7108 = vmatpush3.msra.mxu0 %v8384_v14  ;;  %7115 = vmatprep.mubr.msk.f32.mxu0 %vm7408_vm1, %v7407_v3 }
0x3971   :  { %7109 = vmatprep.subr.mxu0 %v7407_v3 }
0x3972   :  { %7110 = vmatpush3.msra.mxu0 %v8393_v15 }
0x3973   :  { %7111 = vmatprep.subr.mxu0 %v7407_v3 }
0x3974   :  { %7112 = vmatpush3.msra.mxu0 %v8400_v16 }
0x3975   :  { %7113 = vmatprep.subr.mxu0 %v7407_v3 }
0x3976   :  { %7114 = vmatpush3.msra.mxu0 %v8407_v18 }
0x3977   :  { %7118 = vmatprep.subr.mxu0 %v7407_v3 }
0x3a2f   :  { %v4726_v33 = vpop.f32.mrf.mxu0 }
0x3a30   :  { %v8800_v34 = vadd.f32 %v8532_v41, %v4726_v33 }
0x3a31   :  { %v7078_v35 = vpop.f32.mrf.mxu0 }
0x3a32   :  { %v4731_v24 = vsub.f32 %v8800_v34, %v4730_v4  ;;  %v4881_v46 = vsub.f32 %v8764_v39, %v8800_v34 }
0x3a34   :  { %v4732_v36 = vmul.f32 %v4731_v24, %v8761_v7 }
0x3a36   :  { %v4733_v17 = vadd.f32 %v4732_v36, %v8725_v12 }
0x3a38   :  { %7088 = vmatmul.mubr.msk.f32.vlgmr.msra.gmra.mxu1 %vm227_vm3, %v4733_v17 }
0x3a39   :  { %7091 = vmatpush3.msk.msra.mxu1 %vm1193_vm4, %v8426_v20  ;;  %7104 = vmatprep.mubr.msk.f32.mxu1 %vm7408_vm1, %v7407_v3 }
0x3a3a   :  { %7092 = vmatprep.subr.mxu1 %v7407_v3 }
0x3a3b   :  { %7093 = vmatpush3.msra.mxu1 %v8436_v21 }
0x3a3c   :  { %7094 = vmatprep.subr.mxu1 %v7407_v3 }
0x3a3d   :  { %7095 = vmatpush3.msra.mxu1 %v8443_v22 }
0x3a3e   :  { %7096 = vmatprep.subr.mxu1 %v7407_v3 }
0x3a3f   :  { %7097 = vmatpush3.msra.mxu1 %v8450_v23 }
0x3a40   :  { %7098 = vmatprep.subr.mxu1 %v7407_v3 }
0x3a41   :  { %7099 = vmatpush3.msra.mxu1 %v8457_v25 }
0x3a42   :  { %7100 = vmatprep.subr.mxu1 %v7407_v3 }
0x3a43   :  { %7101 = vmatpush3.msra.mxu1 %v8464_v31 }
0x3a44   :  { %7102 = vmatprep.subr.mxu1 %v7407_v3 }
0x3a45   :  { %7103 = vmatpush3.msra.mxu1 %v8471_v26 }
0x3a46   :  { %7135 = vmatprep.subr.mxu1 %v7407_v3 }
0x3af8   :  { %v4803_v38 = vpop.f32.mrf.mxu1 }
0x3af9   :  { %v4804_v40 = vadd.f32 %v8478_v28, %v4803_v38 }
0x3afa   :  { %v7089_v42 = vpop.f32.mrf.mxu1 }
0x3afb   :  { %7358 = vtanh.f32 %v4804_v40 }
0x3b08   :  { %v7359_v43 = vpop.eup %7358 }
0x3b09   :  { %7105 = vmatmul.mubr.msk.f32.vlgmr.msra.gmra.mxu1 %vm1189_vm5, %v7359_v43 }
0x3b0a   :  { %7136 = vmatpush3.msra.mxu1 %v8384_v14  ;;  %7143 = vmatprep.mubr.msk.f32.mxu1 %vm7408_vm1, %v7407_v3 }
0x3b0b   :  { %7137 = vmatprep.subr.mxu1 %v7407_v3 }
0x3b0c   :  { %7138 = vmatpush3.msra.mxu1 %v8393_v15 }
0x3b0d   :  { %7139 = vmatprep.subr.mxu1 %v7407_v3 }
0x3b0e   :  { %7140 = vmatpush3.msra.mxu1 %v8400_v16 }
0x3b0f   :  { %7141 = vmatprep.subr.mxu1 %v7407_v3 }
0x3b10   :  { %7142 = vmatpush3.msra.mxu1 %v8407_v18 }
0x3b11   :  { %7146 = vmatprep.subr.mxu1 %v7407_v3 }
0x3bc9   :  { %v4877_v44 = vpop.f32.mrf.mxu1 }
0x3bca   :  { %v4878_v45 = vadd.f32 %v8532_v41, %v4877_v44  ;;  %v7383_v44 = vld [vmem:[%s9076_s15 + $0x30] sm:$0x3] }
0x3bcb   :  { %v7106_v47 = vpop.f32.mrf.mxu1 }
0x3bcc   :  { %v4882_v48 = vadd.f32 %v4881_v46, %v4878_v45  ;;  %v5032_v54 = vadd.f32 %v4878_v45, %v8800_v34  ;;  %v7385_v45 = vld [vmem:[%s9076_s15 + $0x20] sm:$0xff]  ;;  %v7386_v46 = vld [vmem:[%s9076_s15 + $0x18] sm:$0xff]  ;;  %v7387_v47 = vld [vmem:[%s9076_s15 + $0x10] sm:$0xff] }
0x3bce   :  { %v4883_v49 = vmul.f32 %v4882_v48, %v8761_v7  ;;  %v5033_v55 = vmul.f32 3.0, %v5032_v54  ;;  %v7388_v48 = vld [vmem:[%s9076_s15 + $0x8] sm:$0xff]  ;;  %v5671_v54 = vld [vmem:[%s9078_s17 + $0x10] sm:$0xff] }
0x3bd0   :  { %v4884_v50 = vadd.f32 %v4883_v49, %v8725_v12  ;;  %v5034_v61 = vadd.f32 %v5033_v55, %v8764_v39  ;;  %v7389_v49 = vld [vmem:[%s9076_s15] sm:$0xff]  ;;  %v5670_v55 = vld [vmem:[%s9078_s17 + $0x8] sm:$0xff] }
0x3bd2   :  { %7116 = vmatmul.mubr.msk.f32.vlgmr.msra.gmra.mxu0 %vm227_vm3, %v4884_v50 }
0x3bd3   :  { %7119 = vmatpush3.msk.msra.mxu0 %vm1193_vm4, %v8426_v20  ;;  %7132 = vmatprep.mubr.msk.f32.mxu0 %vm7408_vm1, %v7407_v3 }
0x3bd4   :  { %7120 = vmatprep.subr.mxu0 %v7407_v3 }
0x3bd5   :  { %7121 = vmatpush3.msra.mxu0 %v8436_v21 }
0x3bd6   :  { %7122 = vmatprep.subr.mxu0 %v7407_v3 }
0x3bd7   :  { %7123 = vmatpush3.msra.mxu0 %v8443_v22 }
0x3bd8   :  { %7124 = vmatprep.subr.mxu0 %v7407_v3 }
0x3bd9   :  { %7125 = vmatpush3.msra.mxu0 %v8450_v23 }
0x3bda   :  { %7126 = vmatprep.subr.mxu0 %v7407_v3 }
0x3bdb   :  { %7127 = vmatpush3.msra.mxu0 %v8457_v25 }
0x3bdc   :  { %7128 = vmatprep.subr.mxu0 %v7407_v3 }
0x3bdd   :  { %7129 = vmatpush3.msra.mxu0 %v8464_v31 }
0x3bde   :  { %7130 = vmatprep.subr.mxu0 %v7407_v3 }
0x3bdf   :  { %7131 = vmatpush3.msra.mxu0 %v8471_v26 }
0x3be0   :  { %7163 = vmatprep.subr.mxu0 %v7407_v3 }
0x3c92   :  { %v4954_v51 = vpop.f32.mrf.mxu0 }
0x3c93   :  { %v4955_v52 = vadd.f32 %v8478_v28, %v4954_v51  ;;  %v7390_v51 = vld [vmem:[%s9075_s14] ss:$0 sm:$0xff] }
0x3c94   :  { %v7117_v56 = vpop.f32.mrf.mxu0 }
0x3c95   :  { %7360 = vtanh.f32 %v4955_v52 }
0x3ca2   :  { %v7361_v53 = vpop.eup %7360 }
0x3ca3   :  { %7133 = vmatmul.mubr.msk.f32.vlgmr.msra.gmra.mxu0 %vm1189_vm5, %v7361_v53 }
0x3ca4   :  { %7164 = vmatpush3.msra.mxu0 %v8384_v14  ;;  %7171 = vmatprep.mubr.msk.f32.mxu0 %vm7408_vm1, %v7407_v3 }
0x3ca5   :  { %7165 = vmatprep.subr.mxu0 %v7407_v3 }
0x3ca6   :  { %7166 = vmatpush3.msra.mxu0 %v8393_v15 }
0x3ca7   :  { %7167 = vmatprep.subr.mxu0 %v7407_v3 }
0x3ca8   :  { %7168 = vmatpush3.msra.mxu0 %v8400_v16 }
0x3ca9   :  { %7169 = vmatprep.subr.mxu0 %v7407_v3 }
0x3caa   :  { %7170 = vmatpush3.msra.mxu0 %v8407_v18 }
0x3cab   :  { %7174 = vmatprep.subr.mxu0 %v7407_v3 }
0x3d63   :  { %v5028_v57 = vpop.f32.mrf.mxu0 }
0x3d64   :  { %v5029_v60 = vadd.f32 %v8532_v41, %v5028_v57  ;;  %v5669_v57 = vld [vmem:[%s9078_s17] sm:$0xff] }
0x3d65   :  { %v7134_v11 = vpop.f32.mrf.mxu0 }
0x3d66   :  { %v5035_v13 = vadd.f32 %v5034_v61, %v5029_v60  ;;  %v7391_v11 = vld [vmem:[%s9077_s16] ss:$0 sm:$0xff] }
0x3d68   :  { %v5038_v19 = vmul.f32 %v5037_v62, %v5035_v13 }
0x3d6a   :  { %v8876_v63 = vadd.f32 %v5038_v19, %v8725_v12 }
0x3d6c   :  { %7144 = vmatmul.mubr.msk.f32.vlgmr.msra.gmra.mxu1 %vm227_vm3, %v8876_v63 }
0x3d6d   :  { %7147 = vmatpush3.msk.msra.mxu1 %vm1193_vm4, %v8426_v20  ;;  %7160 = vmatprep.mubr.msk.f32.mxu1 %vm7408_vm1, %v7407_v3 }
0x3d6e   :  { %7148 = vmatprep.subr.mxu1 %v7407_v3 }
0x3d6f   :  { %7149 = vmatpush3.msra.mxu1 %v8436_v21 }
0x3d70   :  { %7150 = vmatprep.subr.mxu1 %v7407_v3 }
0x3d71   :  { %7151 = vmatpush3.msra.mxu1 %v8443_v22 }
0x3d72   :  { %7152 = vmatprep.subr.mxu1 %v7407_v3 }
0x3d73   :  { %7153 = vmatpush3.msra.mxu1 %v8450_v23 }
0x3d74   :  { %7154 = vmatprep.subr.mxu1 %v7407_v3 }
0x3d75   :  { %7155 = vmatpush3.msra.mxu1 %v8457_v25 }
0x3d76   :  { %7156 = vmatprep.subr.mxu1 %v7407_v3 }
0x3d77   :  { %7157 = vmatpush3.msra.mxu1 %v8464_v31 }
0x3d78   :  { %7158 = vmatprep.subr.mxu1 %v7407_v3 }
0x3d79   :  { %7159 = vmatpush3.msra.mxu1 %v8471_v26 }
0x3d7a   :  { %7191 = vmatprep.subr.mxu1 %v7407_v3 }
0x3e2c   :  { %v5110_v2 = vpop.f32.mrf.mxu1 }
0x3e2d   :  { %v5111_v5 = vadd.f32 %v8478_v28, %v5110_v2  ;;  %v5646_v2 = vstv %s5645_s20 }
0x3e2e   :  { %v7145_v7 = vpop.f32.mrf.mxu1 }
0x3e2f   :  { %7362 = vtanh.f32 %v5111_v5 }
0x3e3c   :  { %v7363_v39 = vpop.eup %7362 }
0x3e3d   :  { %7161 = vmatmul.mubr.msk.f32.vlgmr.msra.gmra.mxu1 %vm1189_vm5, %v7363_v39 }
0x3e3e   :  { %7192 = vmatpush3.msra.mxu1 %v8384_v14  ;;  %7199 = vmatprep.mubr.msk.f32.mxu1 %vm7408_vm1, %v7407_v3 }
0x3e3f   :  { %7193 = vmatprep.subr.mxu1 %v7407_v3 }
0x3e40   :  { %7194 = vmatpush3.msra.mxu1 %v8393_v15 }
0x3e41   :  { %7195 = vmatprep.subr.mxu1 %v7407_v3 }
0x3e42   :  { %7196 = vmatpush3.msra.mxu1 %v8400_v16 }
0x3e43   :  { %7197 = vmatprep.subr.mxu1 %v7407_v3 }
0x3e44   :  { %7198 = vmatpush3.msra.mxu1 %v8407_v18 }
0x3e45   :  { %7202 = vmatprep.subr.mxu1 %v7407_v3 }
0x3efd   :  { %v5184_v9 = vpop.f32.mrf.mxu1 }
0x3efe   :  { %v8915_v37 = vadd.f32 %v8532_v41, %v5184_v9  ;;  %v5655_v9 = vrot.slane %v8725_v12, 6 }
0x3eff   :  { %v7162_v0 = vpop.f32.mrf.mxu1 }
0x3f00   :  { %v5189_v29 = vmul.f32 %v8912_v27, %v8915_v37  ;;  %v5339_v24 = vmul.f32 0.33333334, %v8915_v37 }
0x3f02   :  { %v5190_v30 = vmul.f32 0.33333334, %v5189_v29 }
0x3f04   :  { %v5191_v32 = vadd.f32 %v5190_v30, %v8876_v63  ;;  %v5666_v30 = vsel %vm1193_vm4, %v8574_v59, %v5655_v9 }
0x3f06   :  { %7172 = vmatmul.mubr.msk.f32.vlgmr.msra.gmra.mxu0 %vm227_vm3, %v5191_v32 }
0x3f07   :  { %7175 = vmatpush3.msk.msra.mxu0 %vm1193_vm4, %v8426_v20  ;;  %7188 = vmatprep.mubr.msk.f32.mxu0 %vm7408_vm1, %v7407_v3 }
0x3f08   :  { %7176 = vmatprep.subr.mxu0 %v7407_v3 }
0x3f09   :  { %7177 = vmatpush3.msra.mxu0 %v8436_v21 }
0x3f0a   :  { %7178 = vmatprep.subr.mxu0 %v7407_v3 }
0x3f0b   :  { %7179 = vmatpush3.msra.mxu0 %v8443_v22 }
0x3f0c   :  { %7180 = vmatprep.subr.mxu0 %v7407_v3 }
0x3f0d   :  { %7181 = vmatpush3.msra.mxu0 %v8450_v23 }
0x3f0e   :  { %7182 = vmatprep.subr.mxu0 %v7407_v3 }
0x3f0f   :  { %7183 = vmatpush3.msra.mxu0 %v8457_v25 }
0x3f10   :  { %7184 = vmatprep.subr.mxu0 %v7407_v3 }
0x3f11   :  { %7185 = vmatpush3.msra.mxu0 %v8464_v31 }
0x3f12   :  { %7186 = vmatprep.subr.mxu0 %v7407_v3 }
0x3f13   :  { %7187 = vmatpush3.msra.mxu0 %v8471_v26 }
0x3f14   :  { %7219 = vmatprep.subr.mxu0 %v7407_v3 }
0x3fc6   :  { %v5261_v1 = vpop.f32.mrf.mxu0 }
0x3fc7   :  { %v5262_v33 = vadd.f32 %v8478_v28, %v5261_v1 }
0x3fc8   :  { %v7173_v34 = vpop.f32.mrf.mxu0 }
0x3fc9   :  { %7364 = vtanh.f32 %v5262_v33 }
0x3fd6   :  { %v7365_v4 = vpop.eup %7364 }
0x3fd7   :  { %7189 = vmatmul.mubr.msk.f32.vlgmr.msra.gmra.mxu0 %vm1189_vm5, %v7365_v4 }
0x3fd8   :  { %7220 = vmatpush3.msra.mxu0 %v8384_v14  ;;  %7227 = vmatprep.mubr.msk.f32.mxu0 %vm7408_vm1, %v7407_v3 }
0x3fd9   :  { %7221 = vmatprep.subr.mxu0 %v7407_v3 }
0x3fda   :  { %7222 = vmatpush3.msra.mxu0 %v8393_v15 }
0x3fdb   :  { %7223 = vmatprep.subr.mxu0 %v7407_v3 }
0x3fdc   :  { %7224 = vmatpush3.msra.mxu0 %v8400_v16 }
0x3fdd   :  { %7225 = vmatprep.subr.mxu0 %v7407_v3 }
0x3fde   :  { %7226 = vmatpush3.msra.mxu0 %v8407_v18 }
0x3fdf   :  { %7230 = vmatprep.subr.mxu0 %v7407_v3 }
0x4097   :  { %v5335_v35 = vpop.f32.mrf.mxu0 }
0x4098   :  { %v8951_v14 = vadd.f32 %v8532_v41, %v5335_v35 }
0x4099   :  { %v7190_v36 = vpop.f32.mrf.mxu0 }
0x409a   :  { %v5340_v17 = vsub.f32 %v8951_v14, %v5339_v24 }
0x409c   :  { %v5341_v15 = vmul.f32 %v5340_v17, %v8912_v27 }
0x409e   :  { %v5342_v38 = vadd.f32 %v5341_v15, %v8876_v63 }
0x40a0   :  { %7200 = vmatmul.mubr.msk.f32.vlgmr.msra.gmra.mxu1 %vm227_vm3, %v5342_v38 }
0x40a1   :  { %7203 = vmatpush3.msk.msra.mxu1 %vm1193_vm4, %v8426_v20  ;;  %7216 = vmatprep.mubr.msk.f32.mxu1 %vm7408_vm1, %v7407_v3 }
0x40a2   :  { %7204 = vmatprep.subr.mxu1 %v7407_v3 }
0x40a3   :  { %7205 = vmatpush3.msra.mxu1 %v8436_v21  ;;  %v5649_v21 = vrot.slane %v8056_v8, 6 }
0x40a4   :  { %7206 = vmatprep.subr.mxu1 %v7407_v3 }
0x40a5   :  { %7207 = vmatpush3.msra.mxu1 %v8443_v22  ;;  %v5651_v22 = vrot.slane %v8207_v6, 4  ;;  %v5490_v6 = vsub.f32 %v8915_v37, %v8951_v14 }
0x40a6   :  { %7208 = vmatprep.subr.mxu1 %v7407_v3 }
0x40a7   :  { %7209 = vmatpush3.msra.mxu1 %v8450_v23  ;;  %v5653_v23 = vrot.slane %v8358_v58, 2 }
0x40a8   :  { %7210 = vmatprep.subr.mxu1 %v7407_v3 }
0x40a9   :  { %7211 = vmatpush3.msra.mxu1 %v8457_v25  ;;  %v5662_v25 = vsel %vm1193_vm4, %v7852_v10, %v5649_v21 }
0x40aa   :  { %7212 = vmatprep.subr.mxu1 %v7407_v3  ;;  %v5663_v40 = vsel %vm138_vm0, %v5662_v25, %v5651_v22 }
0x40ab   :  { %7213 = vmatpush3.msra.mxu1 %v8464_v31 }
0x40ac   :  { %7214 = vmatprep.subr.mxu1 %v7407_v3 }
0x40ad   :  { %7215 = vmatpush3.msra.mxu1 %v8471_v26  ;;  %v5665_v26 = vsel %vm5664_vm6, %v5663_v40, %v5653_v23 }
0x4160   :  { %v5412_v16 = vpop.f32.mrf.mxu1 }
0x4161   :  { %v5413_v18 = vadd.f32 %v8478_v28, %v5412_v16 }
0x4162   :  { %v7201_v20 = vpop.f32.mrf.mxu1 }
0x4163   :  { %7366 = vtanh.f32 %v5413_v18 }
0x4170   :  { %v7367_v31 = vpop.eup %7366 }
0x4171   :  { %7217 = vmatmul.mubr.msk.f32.vlgmr.msra.gmra.mxu1 %vm1189_vm5, %v7367_v31 }
0x4172   :  { %7255 = vmatprep.mubr.msk.f32.mxu1 %vm227_vm3, %v5665_v26 }
0x4231   :  { %v5486_v28 = vpop.f32.mrf.mxu1 }
0x4232   :  { %v5487_v8 = vadd.f32 %v8532_v41, %v5486_v28  ;;  %v7384_v41 = vld [vmem:[%s9076_s15 + $0x28] sm:$0xff] }
0x4233   :  { %v7218_v58 = vpop.f32.mrf.mxu1 }
0x4234   :  { %v5491_v42 = vadd.f32 %v5490_v6, %v5487_v8  ;;  %v5641_v60 = vadd.f32 %v5487_v8, %v8951_v14 }
0x4236   :  { %v5492_v43 = vmul.f32 %v5491_v42, %v8912_v27  ;;  %v5642_v61 = vmul.f32 3.0, %v5641_v60  ;;  %v5657_v27 = vrot.slane %v8876_v63, 4 }
0x4238   :  { %v5493_v10 = vadd.f32 %v5492_v43, %v8876_v63  ;;  %v5643_v19 = vadd.f32 %v5642_v61, %v8915_v37  ;;  %v5667_v32 = vsel %vm138_vm0, %v5666_v30, %v5657_v27  ;;  %v5888_v37 = vld [vmem:[%s9079_s18] ss:$0 sm:$0xff] }
0x423a   :  { %7228 = vmatmul.mubr.msk.f32.vlgmr.msra.gmra.mxu0 %vm227_vm3, %v5493_v10 }
0x423b   :  { %7231 = vmatpush3.msk.msra.mxu0 %vm1193_vm4, %v7383_v44  ;;  %7244 = vmatprep.mubr.msk.f32.mxu0 %vm7408_vm1, %v7407_v3 }
0x423c   :  { %7232 = vmatprep.subr.mxu0 %v7407_v3 }
0x423d   :  { %7233 = vmatpush3.msra.mxu0 %v7384_v41 }
0x423e   :  { %7234 = vmatprep.subr.mxu0 %v7407_v3 }
0x423f   :  { %7235 = vmatpush3.msra.mxu0 %v7385_v45 }
0x4240   :  { %7236 = vmatprep.subr.mxu0 %v7407_v3 }
0x4241   :  { %7237 = vmatpush3.msra.mxu0 %v7386_v46 }
0x4242   :  { %7238 = vmatprep.subr.mxu0 %v7407_v3 }
0x4243   :  { %7239 = vmatpush3.msra.mxu0 %v7387_v47 }
0x4244   :  { %7240 = vmatprep.subr.mxu0 %v7407_v3 }
0x4245   :  { %7241 = vmatpush3.msra.mxu0 %v7388_v48 }
0x4246   :  { %7242 = vmatprep.subr.mxu0 %v7407_v3  ;;  %v5672_v3 = vld [vmem:[%s9078_s17 + $0x18] sm:$0xff] }
0x4247   :  { %7243 = vmatpush3.msra.mxu0 %v7389_v49  ;;  %7247 = vmatprep.subr.mxu1 %v5672_v3 }
0x4248   :  { %7248 = vmatpush3.msra.mxu1 %v5672_v3 }
0x4249   :  { %7249 = vmatprep.subr.mxu1 %v5671_v54 }
0x424a   :  { %7250 = vmatpush3.msra.mxu1 %v5671_v54 }
0x424b   :  { %7251 = vmatprep.subr.mxu1 %v5670_v55 }
0x424c   :  { %7252 = vmatpush3.msra.mxu1 %v5670_v55 }
0x424d   :  { %7253 = vmatprep.subr.mxu1 %v5669_v57 }
0x424e   :  { %7254 = vmatpush3.msra.mxu1 %v5669_v57 }
0x42fa   :  { %v5563_v50 = vpop.f32.mrf.mxu0 }
0x42fb   :  { %v5564_v52 = vadd.f32 %v7390_v51, %v5563_v50 }
0x42fc   :  { %v7229_v56 = vpop.f32.mrf.mxu0 }
0x42fd   :  { %7368 = vtanh.f32 %v5564_v52 }
0x430a   :  { %v7369_v53 = vpop.eup %7368 }
0x430b   :  { %7245 = vmatmul.mubr.msk.f32.vlgmr.msra.gmra.mxu0 %vm1189_vm5, %v7369_v53 }
0x43cb   :  { %v5637_v62 = vpop.f32.mrf.mxu0 }
0x43cc   :  { %v5638_v13 = vadd.f32 %v7391_v11, %v5637_v62 }
0x43cd   :  { %v7246_v5 = vpop.f32.mrf.mxu0 }
0x43ce   :  { %v5644_v7 = vadd.f32 %v5643_v19, %v5638_v13 }
0x43d0   :  { %v5647_v39 = vmul.f32 %v5646_v2, %v5644_v7 }
0x43d2   :  { %v5648_v0 = vadd.f32 %v5647_v39, %v8876_v63 }
0x43d4   :  { %v5660_v29 = vrot.slane %v5648_v0, 2 }
0x43d6   :  { %v5668_v1 = vsel %vm5664_vm6, %v5667_v32, %v5660_v29 }
0x43d7   :  { %7256 = vmatmul.mubr.msk.f32.vlgmr.msra.gmra.mxu1 %vm227_vm3, %v5668_v1 }
0x4497   :  { %v7257_v33 = vpop.f32.mrf.mxu1 }
0x4498   :  { %v5758_v12 = vadd.f32 %v7257_v33, %v5888_v37 }
0x4499   :  { %v5752_v34 = vpop.f32.mrf.mxu1 }
0x449a   :  { %5762 = vst.msk [vmem:[%s9080_s19 + $0x8] sm:$0xff] %vm133_vm2, %v5758_v12  ;;  %v5753_v63 = vadd.f32 %v5888_v37, %v5752_v34 }
0x449c   :  { %5761 = vst.msk [vmem:[%s9080_s19] sm:$0xff] %vm133_vm2, %v5753_v63 }
0x449d   :  { %5767 = vsyncpa [#allocation3], 1 }

</bundles_post_ra>
